<compile_context>
chip_gen: v6e
topology: v6e:2x2x1
jax: 0.10.0
libtpu: 0.0.40
codegen_flags: <defaults>
</compile_context>

<pallas_src>
import functools
from math import sqrt

import jax
import jax.numpy as jnp
import numpy as np
from jax.experimental import pallas as pl
from jax.experimental.pallas import tpu as pltpu

# ----------------------------- model config ---------------------------------
D_MODEL = 128                    # fixed by AttentionLayer defaults
N_HEADS = 8
D_HEAD = D_MODEL // N_HEADS      # 16
D_FF = 4 * D_MODEL               # 512
GATE = False                     # DecoderLayer(gate=False) default (static)
LN_EPS = 1e-5
ATTN_SCALE = 1.0 / sqrt(D_HEAD)

# Row indices inside the packed (16, 128) "vecs" constant array.
_V_SA_BQ, _V_SA_BK, _V_SA_BV, _V_SA_BO = 0, 1, 2, 3
_V_CA_BQ, _V_CA_BK, _V_CA_BV, _V_CA_BO = 4, 5, 6, 7
_V_C2_B = 8
_V_LN1W, _V_LN1B, _V_LN2W, _V_LN2B, _V_LN3W, _V_LN3B = 9, 10, 11, 12, 13, 14


# ------------------------------ kernel ---------------------------------------
def decoder_layer_kernel(
    x_ref, cross_ref,
    sa_wqkv_ref, sa_wo_ref,
    ca_wq_ref, ca_wkv_ref, ca_wo_ref,
    c1_w_ref, c1_b_ref, c2_w_ref,
    vecs_ref,
    out_ref,
    *, l_real, s_real,
):
    TB, Lp, D = x_ref.shape
    Sp = cross_ref.shape[1]
    H, E = N_HEADS, D_HEAD

    vecs = vecs_ref[...]                                      # (16, 128) f32

    # Flatten batch block + sequence into one MXU M dimension (Lp, Sp are
    # multiples of 8 -> layout-preserving).
    x = x_ref[...].reshape(TB * Lp, D).astype(jnp.float32)
    cr = cross_ref[...].reshape(TB * Sp, D).astype(jnp.float32)

    def matmul(a, w_ref):
        return jnp.dot(a.astype(jnp.bfloat16), w_ref[...],
                       preferred_element_type=jnp.float32)

    def split_heads(a, rows):
        # (TB*rows, H*E) -> (TB*H, rows, E)  (XLU relayout)
        a = a.reshape(TB, rows, H, E)
        return jnp.transpose(a, (0, 2, 1, 3)).reshape(TB * H, rows, E)

    def merge_heads(a, rows):
        # (TB*H, rows, E) -> (TB*rows, H*E)
        a = a.reshape(TB, H, rows, E)
        return jnp.transpose(a, (0, 2, 1, 3)).reshape(TB * rows, H * E)

    def attention(q, k, v, lk_pad, lk_real):
        qh = split_heads(q, Lp).astype(jnp.bfloat16)
        kh = split_heads(k, lk_pad).astype(jnp.bfloat16)
        vh = split_heads(v, lk_pad).astype(jnp.bfloat16)
        # scores: (TB*H, Lp, lk_pad); scale already folded into Q weights.
        s = jax.lax.dot_general(qh, kh, (((2,), (2,)), ((0,), (0,))),
                                preferred_element_type=jnp.float32)
        if lk_real < lk_pad:                                  # static key mask
            kidx = jax.lax.broadcasted_iota(jnp.int32, s.shape, 2)
            s = jnp.where(kidx < lk_real, s, -1e30)
        s = s - jnp.max(s, axis=-1, keepdims=True)
        p = jnp.exp(s)
        denom = jnp.sum(p, axis=-1, keepdims=True)
        ctx = jax.lax.dot_general(p.astype(jnp.bfloat16), vh,
                                  (((2,), (1,)), ((0,), (0,))),
                                  preferred_element_type=jnp.float32)
        ctx = ctx * pl.reciprocal(denom, approx=True)
        return merge_heads(ctx, Lp)                           # (TB*Lp, 128)

    def layernorm(v, w, b):
        mu = jnp.mean(v, axis=-1, keepdims=True)
        var = jnp.mean(jnp.square(v - mu), axis=-1, keepdims=True)
        return (v - mu) * jax.lax.rsqrt(var + LN_EPS) * w + b

    # ---- x = norm1(x + self_attention(x, x, x)) ------------------------------
    qkv = matmul(x, sa_wqkv_ref)                              # (R, 384) fused
    q = qkv[:, :D] + vecs[_V_SA_BQ:_V_SA_BQ + 1]
    k = qkv[:, D:2 * D] + vecs[_V_SA_BK:_V_SA_BK + 1]
    v = qkv[:, 2 * D:] + vecs[_V_SA_BV:_V_SA_BV + 1]
    ctx = attention(q, k, v, Lp, l_real)
    sa = matmul(ctx, sa_wo_ref) + vecs[_V_SA_BO:_V_SA_BO + 1]
    x1 = layernorm(x + sa, vecs[_V_LN1W:_V_LN1W + 1], vecs[_V_LN1B:_V_LN1B + 1])

    # ---- x = norm2(x + cross_attention(x, cross, cross)) ---------------------
    qc = matmul(x1, ca_wq_ref) + vecs[_V_CA_BQ:_V_CA_BQ + 1]
    kv = matmul(cr, ca_wkv_ref)                               # (Rs, 256) fused
    kc = kv[:, :D] + vecs[_V_CA_BK:_V_CA_BK + 1]
    vc = kv[:, D:] + vecs[_V_CA_BV:_V_CA_BV + 1]
    ctx = attention(qc, kc, vc, Sp, s_real)
    ca = matmul(ctx, ca_wo_ref) + vecs[_V_CA_BO:_V_CA_BO + 1]
    x2 = layernorm(x1 + ca, vecs[_V_LN2W:_V_LN2W + 1], vecs[_V_LN2B:_V_LN2B + 1])

    # ---- position-wise FFN (1x1 convs); gate half dropped (GATE is False) ----
    y = jnp.maximum(matmul(x2, c1_w_ref) + c1_b_ref[...], 0.0)   # (R, D_FF)
    ffn = matmul(y, c2_w_ref) + vecs[_V_C2_B:_V_C2_B + 1]
    x3 = layernorm(x2 + ffn, vecs[_V_LN3W:_V_LN3W + 1], vecs[_V_LN3B:_V_LN3B + 1])

    out_ref[...] = x3.reshape(TB, Lp, D).astype(out_ref.dtype)


# --------------------------- weight preparation --------------------------------
def prepare_weights(p):
    """Pack params once (setup time) into the layouts the kernel consumes."""
    assert not GATE, "conv2/c2_b trimming is only valid for gate=False"
    bf16 = lambda w: w.astype(jnp.bfloat16)

    sa_wqkv = bf16(jnp.concatenate(
        [p["sa_wq"] * ATTN_SCALE, p["sa_wk"], p["sa_wv"]], axis=1))   # (128, 384)
    sa_wo = bf16(p["sa_wo"])                                          # (128, 128)
    ca_wq = bf16(p["ca_wq"] * ATTN_SCALE)                             # (128, 128)
    ca_wkv = bf16(jnp.concatenate([p["ca_wk"], p["ca_wv"]], axis=1))  # (128, 256)
    ca_wo = bf16(p["ca_wo"])                                          # (128, 128)
    c1_w = bf16(p["c1_w"])                                            # (128, 512)
    c1_b = p["c1_b"].astype(jnp.float32)                              # (1, 512)
    c2_w = bf16(p["c2_w"][:, :D_MODEL])                               # (512, 128)

    rows = [p["sa_bq"] * ATTN_SCALE, p["sa_bk"], p["sa_bv"], p["sa_bo"],
            p["ca_bq"] * ATTN_SCALE, p["ca_bk"], p["ca_bv"], p["ca_bo"],
            p["c2_b"][:, :D_MODEL],
            p["ln1_w"], p["ln1_b"], p["ln2_w"], p["ln2_b"],
            p["ln3_w"], p["ln3_b"],
            jnp.zeros((1, D_MODEL), jnp.float32)]
    vecs = jnp.concatenate(
        [r.reshape(1, D_MODEL).astype(jnp.float32) for r in rows], axis=0)  # (16,128)

    return [sa_wqkv, sa_wo, ca_wq, ca_wkv, ca_wo, c1_w, c1_b, c2_w, vecs]


# ------------------------------ wrapper ---------------------------------------
def _const_spec(shape):
    nd = len(shape)
    return pl.BlockSpec(shape, lambda b, _nd=nd: (0,) * _nd)


def _round_up(n, m):
    return -(-n // m) * m


def _pick_tb(B, Lp, Sp, max_rows=512, vmem_budget=24 * 2 ** 20):
    """Largest divisor of B s.t. rows and in-kernel intermediates (incl. the
    materialized (H*TB, Lp, Sp) softmax scores) stay within budget, capped at
    B//2 so the parallel grid has >=2 steps for v7x's two TensorCores."""
    per_b = (6 * Lp * D_MODEL * 4 + 2 * Sp * D_MODEL * 4
             + 3 * N_HEADS * Lp * max(Lp, Sp) * 4
             + Lp * D_FF * 4)
    cap = min(max(1, max_rows // max(Lp, Sp)),
              max(1, vmem_budget // per_b),
              max(1, B // 2))
    best = 1
    for tb in range(1, min(B, cap) + 1):
        if B % tb == 0:
            best = tb
    return best


@jax.jit
def decoder_layer(x, cross, weights):
    B, L, Dm = x.shape
    _, S, _ = cross.shape
    assert Dm == D_MODEL

    # Pad sequence dims to multiples of 8 (sublane alignment); the kernel masks
    # padded keys statically, padded query rows are sliced off below.
    Lp, Sp = _round_up(L, 8), _round_up(S, 8)
    if Lp != L:
        x = jnp.pad(x, ((0, 0), (0, Lp - L), (0, 0)))
    if Sp != S:
        cross = jnp.pad(cross, ((0, 0), (0, Sp - S), (0, 0)))

    # TODO(synk): for L,S >~ 2k the (H*TB, Lp, Sp) scores exceed VMEM; a
    # key-blocked online-softmax loop over S would be needed.
    TB = _pick_tb(B, Lp, Sp)
    kernel = functools.partial(decoder_layer_kernel, l_real=L, s_real=S)

    in_specs = [
        pl.BlockSpec((TB, Lp, D_MODEL), lambda b: (b, 0, 0)),   # x
        pl.BlockSpec((TB, Sp, D_MODEL), lambda b: (b, 0, 0)),   # cross
    ] + [_const_spec(w.shape) for w in weights]                 # resident weights

    out = pl.pallas_call(
        kernel,
        out_shape=jax.ShapeDtypeStruct((B, Lp, D_MODEL), x.dtype),
        grid_spec=pltpu.PrefetchScalarGridSpec(
            num_scalar_prefetch=0,
            grid=(B // TB,),
            in_specs=in_specs,
            out_specs=pl.BlockSpec((TB, Lp, D_MODEL), lambda b: (b, 0, 0)),
        ),
        compiler_params=pltpu.CompilerParams(
            dimension_semantics=("parallel",),     # batch blocks independent
            vmem_limit_bytes=48 * 1024 * 1024),    # <=48 MiB: safe on v7x's 64 MiB
    )(x, cross, *weights)

    return out[:, :L, :] if Lp != L else out


# --------------------------- parameter init -----------------------------------
def init_params(key):
    """Deterministic synthetic parameters (shapes match the nn.Module)."""
    params = {}
    names_shapes = [
        # attention projections: stored already transposed to (in, out)
        ("sa_wq", (D_MODEL, D_MODEL)), ("sa_wk", (D_MODEL, D_MODEL)),
        ("sa_wv", (D_MODEL, D_MODEL)), ("sa_wo", (D_MODEL, D_MODEL)),
        ("ca_wq", (D_MODEL, D_MODEL)), ("ca_wk", (D_MODEL, D_MODEL)),
        ("ca_wv", (D_MODEL, D_MODEL)), ("ca_wo", (D_MODEL, D_MODEL)),
        # conv1d kernel_size=1 weights, transposed to (in_ch, out_ch)
        ("c1_w", (D_MODEL, D_FF)), ("c2_w", (D_FF, 2 * D_MODEL)),
    ]
    keys = jax.random.split(key, len(names_shapes) + 10)
    for i, (name, shape) in enumerate(names_shapes):
        fan_in = shape[0]
        params[name] = (jax.random.normal(keys[i], shape, jnp.float32)
                        / sqrt(fan_in))
    bias_shapes = {
        "sa_bq": D_MODEL, "sa_bk": D_MODEL, "sa_bv": D_MODEL, "sa_bo": D_MODEL,
        "ca_bq": D_MODEL, "ca_bk": D_MODEL, "ca_bv": D_MODEL, "ca_bo": D_MODEL,
        "c1_b": D_FF, "c2_b": 2 * D_MODEL,
    }
    for j, (name, n) in enumerate(bias_shapes.items()):
        params[name] = 0.01 * jax.random.normal(
            keys[len(names_shapes) + j], (1, n), jnp.float32)
    # LayerNorm: PyTorch default init (weight=1, bias=0)
    for ln in ("ln1", "ln2", "ln3"):
        params[f"{ln}_w"] = jnp.ones((1, D_MODEL), jnp.float32)
        params[f"{ln}_b"] = jnp.zeros((1, D_MODEL), jnp.float32)
    return params


# ------------------------- pure-JAX reference (f32) ----------------------------
def reference(x, cross, p):
    def ln(v, w, b):
        mu = v.mean(-1, keepdims=True)
        var = ((v - mu) ** 2).mean(-1, keepdims=True)
        return (v - mu) / jnp.sqrt(var + LN_EPS) * w + b

    def mha(qi, kvi, wq, bq, wk, bk, wv, bv, wo, bo):
        B, L, _ = qi.shape
        S = kvi.shape[1]
        q = (qi @ wq + bq).reshape(B, L, N_HEADS, D_HEAD)
        k = (kvi @ wk + bk).reshape(B, S, N_HEADS, D_HEAD)
        v = (kvi @ wv + bv).reshape(B, S, N_HEADS, D_HEAD)
        scores = jnp.einsum("blhe,bshe->bhls", q, k) * ATTN_SCALE
        A = jax.nn.softmax(scores, axis=-1)
        o = jnp.einsum("bhls,bshd->blhd", A, v).reshape(B, L, D_MODEL)
        return o @ wo + bo

    x = ln(x + mha(x, x, p["sa_wq"], p["sa_bq"], p["sa_wk"], p["sa_bk"],
                   p["sa_wv"], p["sa_bv"], p["sa_wo"], p["sa_bo"]),
           p["ln1_w"], p["ln1_b"])
    x = ln(x + mha(x, cross, p["ca_wq"], p["ca_bq"], p["ca_wk"], p["ca_bk"],
                   p["ca_wv"], p["ca_bv"], p["ca_wo"], p["ca_bo"]),
           p["ln2_w"], p["ln2_b"])
    y = jax.nn.relu(x @ p["c1_w"] + p["c1_b"])
    y = y @ p["c2_w"] + p["c2_b"]
    out, gate = y[..., :D_MODEL], y[..., D_MODEL:]
    res = ln(x + out, p["ln3_w"], p["ln3_b"])
    if GATE:
        res = res * jax.nn.sigmoid(gate)
    return res


# ---------------------------------- main ----------------------------------------
if __name__ == "__main__":
    key = jax.random.PRNGKey(0)
    kx, kc, kp = jax.random.split(key, 3)

    B, L, S = 2, 8, 8
    x = jax.random.normal(kx, (B, L, D_MODEL), jnp.float32)
    cross = jax.random.normal(kc, (B, S, D_MODEL), jnp.float32)
    params = init_params(kp)

    # Weight packing hoisted out of the per-call path (done once, setup time).
    weights = [jax.block_until_ready(w) for w in prepare_weights(params)]

    out = jax.block_until_ready(decoder_layer(x, cross, weights))
    ref = jax.block_until_ready(reference(x, cross, params))

    # bf16 MXU inputs + approx reciprocal -> loosened tolerance.
    np.testing.assert_allclose(np.asarray(out), np.asarray(ref),
                               rtol=3e-2, atol=3e-2)
    print("KERNEL_OK")
</pallas_src>

<mosaic_0001>
module attributes {stable_mosaic.version = 11 : i64} {
  func.func @decoder_layer_kernel(%arg0: i32, %arg1: memref<1x8x128xf32, #tpu.memory_space<vmem>>, %arg2: memref<1x8x128xf32, #tpu.memory_space<vmem>>, %arg3: memref<128x384xbf16, #tpu.memory_space<vmem>>, %arg4: memref<128x128xbf16, #tpu.memory_space<vmem>>, %arg5: memref<128x128xbf16, #tpu.memory_space<vmem>>, %arg6: memref<128x256xbf16, #tpu.memory_space<vmem>>, %arg7: memref<128x128xbf16, #tpu.memory_space<vmem>>, %arg8: memref<128x512xbf16, #tpu.memory_space<vmem>>, %arg9: memref<1x512xf32, #tpu.memory_space<vmem>>, %arg10: memref<512x128xbf16, #tpu.memory_space<vmem>>, %arg11: memref<16x128xf32, #tpu.memory_space<vmem>>, %arg12: memref<1x8x128xf32, #tpu.memory_space<vmem>>) attributes {dimension_semantics = [#tpu.dimension_semantics<parallel>], iteration_bounds = array<i64: 2>, scalar_prefetch = 0 : i64, scratch_operands = 0 : i64, tpu.core_type = #tpu.core_type<tc>, window_params = [{transform_indices = @transform_0, window_bounds = array<i64: 1, 8, 128>}, {transform_indices = @transform_1, window_bounds = array<i64: 1, 8, 128>}, {pipeline_mode = #tpu.pipeline_mode<synchronous>, transform_indices = @transform_2, window_bounds = array<i64: 128, 384>}, {pipeline_mode = #tpu.pipeline_mode<synchronous>, transform_indices = @transform_3, window_bounds = array<i64: 128, 128>}, {pipeline_mode = #tpu.pipeline_mode<synchronous>, transform_indices = @transform_4, window_bounds = array<i64: 128, 128>}, {pipeline_mode = #tpu.pipeline_mode<synchronous>, transform_indices = @transform_5, window_bounds = array<i64: 128, 256>}, {pipeline_mode = #tpu.pipeline_mode<synchronous>, transform_indices = @transform_6, window_bounds = array<i64: 128, 128>}, {pipeline_mode = #tpu.pipeline_mode<synchronous>, transform_indices = @transform_7, window_bounds = array<i64: 128, 512>}, {pipeline_mode = #tpu.pipeline_mode<synchronous>, transform_indices = @transform_8, window_bounds = array<i64: 1, 512>}, {pipeline_mode = #tpu.pipeline_mode<synchronous>, transform_indices = @transform_9, window_bounds = array<i64: 512, 128>}, {pipeline_mode = #tpu.pipeline_mode<synchronous>, transform_indices = @transform_10, window_bounds = array<i64: 16, 128>}, {transform_indices = @transform_11, window_bounds = array<i64: 1, 8, 128>}]} {
    %c0 = arith.constant 0 : index
    %c0_0 = arith.constant 0 : index
    %0 = vector.load %arg11[%c0, %c0_0] : memref<16x128xf32, #tpu.memory_space<vmem>>, vector<16x128xf32>
    %c0_1 = arith.constant 0 : index
    %c0_2 = arith.constant 0 : index
    %c0_3 = arith.constant 0 : index
    %1 = vector.load %arg1[%c0_1, %c0_2, %c0_3] : memref<1x8x128xf32, #tpu.memory_space<vmem>>, vector<1x8x128xf32>
    %2 = vector.shape_cast %1 : vector<1x8x128xf32> to vector<8x128xf32>
    %c0_4 = arith.constant 0 : index
    %c0_5 = arith.constant 0 : index
    %c0_6 = arith.constant 0 : index
    %3 = vector.load %arg2[%c0_4, %c0_5, %c0_6] : memref<1x8x128xf32, #tpu.memory_space<vmem>>, vector<1x8x128xf32>
    %4 = vector.shape_cast %3 : vector<1x8x128xf32> to vector<8x128xf32>
    %5 = arith.truncf %2 : vector<8x128xf32> to vector<8x128xbf16>
    %c0_7 = arith.constant 0 : index
    %c0_8 = arith.constant 0 : index
    %6 = vector.load %arg3[%c0_7, %c0_8] : memref<128x384xbf16, #tpu.memory_space<vmem>>, vector<128x384xbf16>
    %cst = arith.constant dense<0.000000e+00> : vector<8x384xf32>
    %7 = tpu.matmul %5, %6, %cst {dimension_numbers = #tpu.dot_dimension_numbers<[1], [0], [0], [1], [0, 0, 1, 1], [], []>} : vector<8x128xbf16>, vector<128x384xbf16>, vector<8x384xf32> -> vector<8x384xf32>
    %8 = vector.extract_strided_slice %7 {offsets = [0, 0], sizes = [8, 128], strides = [1, 1]} : vector<8x384xf32> to vector<8x128xf32>
    %9 = vector.extract_strided_slice %0 {offsets = [0, 0], sizes = [1, 128], strides = [1, 1]} : vector<16x128xf32> to vector<1x128xf32>
    %10 = vector.broadcast %9 : vector<1x128xf32> to vector<8x128xf32>
    %11 = arith.addf %8, %10 : vector<8x128xf32>
    %12 = vector.extract_strided_slice %7 {offsets = [0, 128], sizes = [8, 128], strides = [1, 1]} : vector<8x384xf32> to vector<8x128xf32>
    %13 = vector.extract_strided_slice %0 {offsets = [1, 0], sizes = [1, 128], strides = [1, 1]} : vector<16x128xf32> to vector<1x128xf32>
    %14 = vector.broadcast %13 : vector<1x128xf32> to vector<8x128xf32>
    %15 = arith.addf %12, %14 : vector<8x128xf32>
    %16 = vector.extract_strided_slice %7 {offsets = [0, 256], sizes = [8, 128], strides = [1, 1]} : vector<8x384xf32> to vector<8x128xf32>
    %17 = vector.extract_strided_slice %0 {offsets = [2, 0], sizes = [1, 128], strides = [1, 1]} : vector<16x128xf32> to vector<1x128xf32>
    %18 = vector.broadcast %17 : vector<1x128xf32> to vector<8x128xf32>
    %19 = arith.addf %16, %18 : vector<8x128xf32>
    %20 = vector.shape_cast %11 : vector<8x128xf32> to vector<1x8x8x16xf32>
    %21 = tpu.transpose %20, [0, 2, 1, 3] : vector<1x8x8x16xf32> -> vector<1x8x8x16xf32>
    %22 = vector.shape_cast %21 : vector<1x8x8x16xf32> to vector<8x8x16xf32>
    %23 = arith.truncf %22 : vector<8x8x16xf32> to vector<8x8x16xbf16>
    %24 = vector.shape_cast %15 : vector<8x128xf32> to vector<1x8x8x16xf32>
    %25 = tpu.transpose %24, [0, 2, 1, 3] : vector<1x8x8x16xf32> -> vector<1x8x8x16xf32>
    %26 = vector.shape_cast %25 : vector<1x8x8x16xf32> to vector<8x8x16xf32>
    %27 = arith.truncf %26 : vector<8x8x16xf32> to vector<8x8x16xbf16>
    %28 = vector.shape_cast %19 : vector<8x128xf32> to vector<1x8x8x16xf32>
    %29 = tpu.transpose %28, [0, 2, 1, 3] : vector<1x8x8x16xf32> -> vector<1x8x8x16xf32>
    %30 = vector.shape_cast %29 : vector<1x8x8x16xf32> to vector<8x8x16xf32>
    %31 = arith.truncf %30 : vector<8x8x16xf32> to vector<8x8x16xbf16>
    %cst_9 = arith.constant dense<0.000000e+00> : vector<8x8x8xf32>
    %32 = tpu.matmul %23, %27, %cst_9 {dimension_numbers = #tpu.dot_dimension_numbers<[2], [2], [1], [1], [0, 0, 0, 1, 1, 1], [0], [0]>} : vector<8x8x16xbf16>, vector<8x8x16xbf16>, vector<8x8x8xf32> -> vector<8x8x8xf32>
    %cst_10 = arith.constant dense<0xFF800000> : vector<8x8xf32>
    %33 = vector.multi_reduction <maximumf>, %32, %cst_10 [2] : vector<8x8x8xf32> to vector<8x8xf32>
    %34 = vector.shape_cast %33 : vector<8x8xf32> to vector<8x8x1xf32>
    %35 = vector.broadcast %34 : vector<8x8x1xf32> to vector<8x8x8xf32>
    %36 = arith.subf %32, %35 : vector<8x8x8xf32>
    %37 = math.exp %36 : vector<8x8x8xf32>
    %cst_11 = arith.constant dense<0.000000e+00> : vector<8x8xf32>
    %38 = vector.multi_reduction <add>, %37, %cst_11 [2] : vector<8x8x8xf32> to vector<8x8xf32>
    %39 = vector.shape_cast %38 : vector<8x8xf32> to vector<8x8x1xf32>
    %40 = arith.truncf %37 : vector<8x8x8xf32> to vector<8x8x8xbf16>
    %cst_12 = arith.constant dense<0.000000e+00> : vector<8x8x16xf32>
    %41 = tpu.matmul %40, %31, %cst_12 {dimension_numbers = #tpu.dot_dimension_numbers<[2], [1], [1], [2], [0, 0, 0, 1, 1, 2], [0], [0]>} : vector<8x8x8xbf16>, vector<8x8x16xbf16>, vector<8x8x16xf32> -> vector<8x8x16xf32>
    %42 = tpu.reciprocal %39 {approx = true} : vector<8x8x1xf32> -> vector<8x8x1xf32>
    %43 = vector.broadcast %42 : vector<8x8x1xf32> to vector<8x8x16xf32>
    %44 = arith.mulf %41, %43 : vector<8x8x16xf32>
    %45 = vector.shape_cast %44 : vector<8x8x16xf32> to vector<1x8x8x16xf32>
    %46 = tpu.transpose %45, [0, 2, 1, 3] : vector<1x8x8x16xf32> -> vector<1x8x8x16xf32>
    %47 = vector.shape_cast %46 : vector<1x8x8x16xf32> to vector<8x128xf32>
    %48 = arith.truncf %47 : vector<8x128xf32> to vector<8x128xbf16>
    %c0_13 = arith.constant 0 : index
    %c0_14 = arith.constant 0 : index
    %49 = vector.load %arg4[%c0_13, %c0_14] : memref<128x128xbf16, #tpu.memory_space<vmem>>, vector<128x128xbf16>
    %cst_15 = arith.constant dense<0.000000e+00> : vector<8x128xf32>
    %50 = tpu.matmul %48, %49, %cst_15 {dimension_numbers = #tpu.dot_dimension_numbers<[1], [0], [0], [1], [0, 0, 1, 1], [], []>} : vector<8x128xbf16>, vector<128x128xbf16>, vector<8x128xf32> -> vector<8x128xf32>
    %51 = vector.extract_strided_slice %0 {offsets = [3, 0], sizes = [1, 128], strides = [1, 1]} : vector<16x128xf32> to vector<1x128xf32>
    %52 = vector.broadcast %51 : vector<1x128xf32> to vector<8x128xf32>
    %53 = arith.addf %50, %52 : vector<8x128xf32>
    %54 = arith.addf %2, %53 : vector<8x128xf32>
    %55 = vector.extract_strided_slice %0 {offsets = [9, 0], sizes = [1, 128], strides = [1, 1]} : vector<16x128xf32> to vector<1x128xf32>
    %56 = vector.extract_strided_slice %0 {offsets = [10, 0], sizes = [1, 128], strides = [1, 1]} : vector<16x128xf32> to vector<1x128xf32>
    %cst_16 = arith.constant dense<0.000000e+00> : vector<8xf32>
    %57 = vector.multi_reduction <add>, %54, %cst_16 [1] : vector<8x128xf32> to vector<8xf32>
    %58 = vector.shape_cast %57 : vector<8xf32> to vector<8x1xf32>
    %cst_17 = arith.constant 1.280000e+02 : f32
    %59 = vector.broadcast %cst_17 : f32 to vector<8x1xf32>
    %60 = arith.divf %58, %59 : vector<8x1xf32>
    %61 = vector.broadcast %60 : vector<8x1xf32> to vector<8x128xf32>
    %62 = arith.subf %54, %61 : vector<8x128xf32>
    %63 = arith.mulf %62, %62 : vector<8x128xf32>
    %cst_18 = arith.constant dense<0.000000e+00> : vector<8xf32>
    %64 = vector.multi_reduction <add>, %63, %cst_18 [1] : vector<8x128xf32> to vector<8xf32>
    %65 = vector.shape_cast %64 : vector<8xf32> to vector<8x1xf32>
    %cst_19 = arith.constant 1.280000e+02 : f32
    %66 = vector.broadcast %cst_19 : f32 to vector<8x1xf32>
    %67 = arith.divf %65, %66 : vector<8x1xf32>
    %68 = vector.broadcast %60 : vector<8x1xf32> to vector<8x128xf32>
    %69 = arith.subf %54, %68 : vector<8x128xf32>
    %cst_20 = arith.constant 9.99999974E-6 : f32
    %70 = vector.broadcast %cst_20 : f32 to vector<8x1xf32>
    %71 = arith.addf %67, %70 : vector<8x1xf32>
    %72 = math.rsqrt %71 : vector<8x1xf32>
    %73 = vector.broadcast %72 : vector<8x1xf32> to vector<8x128xf32>
    %74 = arith.mulf %69, %73 : vector<8x128xf32>
    %75 = vector.broadcast %55 : vector<1x128xf32> to vector<8x128xf32>
    %76 = arith.mulf %74, %75 : vector<8x128xf32>
    %77 = vector.broadcast %56 : vector<1x128xf32> to vector<8x128xf32>
    %78 = arith.addf %76, %77 : vector<8x128xf32>
    %79 = arith.truncf %78 : vector<8x128xf32> to vector<8x128xbf16>
    %c0_21 = arith.constant 0 : index
    %c0_22 = arith.constant 0 : index
    %80 = vector.load %arg5[%c0_21, %c0_22] : memref<128x128xbf16, #tpu.memory_space<vmem>>, vector<128x128xbf16>
    %cst_23 = arith.constant dense<0.000000e+00> : vector<8x128xf32>
    %81 = tpu.matmul %79, %80, %cst_23 {dimension_numbers = #tpu.dot_dimension_numbers<[1], [0], [0], [1], [0, 0, 1, 1], [], []>} : vector<8x128xbf16>, vector<128x128xbf16>, vector<8x128xf32> -> vector<8x128xf32>
    %82 = vector.extract_strided_slice %0 {offsets = [4, 0], sizes = [1, 128], strides = [1, 1]} : vector<16x128xf32> to vector<1x128xf32>
    %83 = vector.broadcast %82 : vector<1x128xf32> to vector<8x128xf32>
    %84 = arith.addf %81, %83 : vector<8x128xf32>
    %85 = arith.truncf %4 : vector<8x128xf32> to vector<8x128xbf16>
    %c0_24 = arith.constant 0 : index
    %c0_25 = arith.constant 0 : index
    %86 = vector.load %arg6[%c0_24, %c0_25] : memref<128x256xbf16, #tpu.memory_space<vmem>>, vector<128x256xbf16>
    %cst_26 = arith.constant dense<0.000000e+00> : vector<8x256xf32>
    %87 = tpu.matmul %85, %86, %cst_26 {dimension_numbers = #tpu.dot_dimension_numbers<[1], [0], [0], [1], [0, 0, 1, 1], [], []>} : vector<8x128xbf16>, vector<128x256xbf16>, vector<8x256xf32> -> vector<8x256xf32>
    %88 = vector.extract_strided_slice %87 {offsets = [0, 0], sizes = [8, 128], strides = [1, 1]} : vector<8x256xf32> to vector<8x128xf32>
    %89 = vector.extract_strided_slice %0 {offsets = [5, 0], sizes = [1, 128], strides = [1, 1]} : vector<16x128xf32> to vector<1x128xf32>
    %90 = vector.broadcast %89 : vector<1x128xf32> to vector<8x128xf32>
    %91 = arith.addf %88, %90 : vector<8x128xf32>
    %92 = vector.extract_strided_slice %87 {offsets = [0, 128], sizes = [8, 128], strides = [1, 1]} : vector<8x256xf32> to vector<8x128xf32>
    %93 = vector.extract_strided_slice %0 {offsets = [6, 0], sizes = [1, 128], strides = [1, 1]} : vector<16x128xf32> to vector<1x128xf32>
    %94 = vector.broadcast %93 : vector<1x128xf32> to vector<8x128xf32>
    %95 = arith.addf %92, %94 : vector<8x128xf32>
    %96 = vector.shape_cast %84 : vector<8x128xf32> to vector<1x8x8x16xf32>
    %97 = tpu.transpose %96, [0, 2, 1, 3] : vector<1x8x8x16xf32> -> vector<1x8x8x16xf32>
    %98 = vector.shape_cast %97 : vector<1x8x8x16xf32> to vector<8x8x16xf32>
    %99 = arith.truncf %98 : vector<8x8x16xf32> to vector<8x8x16xbf16>
    %100 = vector.shape_cast %91 : vector<8x128xf32> to vector<1x8x8x16xf32>
    %101 = tpu.transpose %100, [0, 2, 1, 3] : vector<1x8x8x16xf32> -> vector<1x8x8x16xf32>
    %102 = vector.shape_cast %101 : vector<1x8x8x16xf32> to vector<8x8x16xf32>
    %103 = arith.truncf %102 : vector<8x8x16xf32> to vector<8x8x16xbf16>
    %104 = vector.shape_cast %95 : vector<8x128xf32> to vector<1x8x8x16xf32>
    %105 = tpu.transpose %104, [0, 2, 1, 3] : vector<1x8x8x16xf32> -> vector<1x8x8x16xf32>
    %106 = vector.shape_cast %105 : vector<1x8x8x16xf32> to vector<8x8x16xf32>
    %107 = arith.truncf %106 : vector<8x8x16xf32> to vector<8x8x16xbf16>
    %cst_27 = arith.constant dense<0.000000e+00> : vector<8x8x8xf32>
    %108 = tpu.matmul %99, %103, %cst_27 {dimension_numbers = #tpu.dot_dimension_numbers<[2], [2], [1], [1], [0, 0, 0, 1, 1, 1], [0], [0]>} : vector<8x8x16xbf16>, vector<8x8x16xbf16>, vector<8x8x8xf32> -> vector<8x8x8xf32>
    %cst_28 = arith.constant dense<0xFF800000> : vector<8x8xf32>
    %109 = vector.multi_reduction <maximumf>, %108, %cst_28 [2] : vector<8x8x8xf32> to vector<8x8xf32>
    %110 = vector.shape_cast %109 : vector<8x8xf32> to vector<8x8x1xf32>
    %111 = vector.broadcast %110 : vector<8x8x1xf32> to vector<8x8x8xf32>
    %112 = arith.subf %108, %111 : vector<8x8x8xf32>
    %113 = math.exp %112 : vector<8x8x8xf32>
    %cst_29 = arith.constant dense<0.000000e+00> : vector<8x8xf32>
    %114 = vector.multi_reduction <add>, %113, %cst_29 [2] : vector<8x8x8xf32> to vector<8x8xf32>
    %115 = vector.shape_cast %114 : vector<8x8xf32> to vector<8x8x1xf32>
    %116 = arith.truncf %113 : vector<8x8x8xf32> to vector<8x8x8xbf16>
    %cst_30 = arith.constant dense<0.000000e+00> : vector<8x8x16xf32>
    %117 = tpu.matmul %116, %107, %cst_30 {dimension_numbers = #tpu.dot_dimension_numbers<[2], [1], [1], [2], [0, 0, 0, 1, 1, 2], [0], [0]>} : vector<8x8x8xbf16>, vector<8x8x16xbf16>, vector<8x8x16xf32> -> vector<8x8x16xf32>
    %118 = tpu.reciprocal %115 {approx = true} : vector<8x8x1xf32> -> vector<8x8x1xf32>
    %119 = vector.broadcast %118 : vector<8x8x1xf32> to vector<8x8x16xf32>
    %120 = arith.mulf %117, %119 : vector<8x8x16xf32>
    %121 = vector.shape_cast %120 : vector<8x8x16xf32> to vector<1x8x8x16xf32>
    %122 = tpu.transpose %121, [0, 2, 1, 3] : vector<1x8x8x16xf32> -> vector<1x8x8x16xf32>
    %123 = vector.shape_cast %122 : vector<1x8x8x16xf32> to vector<8x128xf32>
    %124 = arith.truncf %123 : vector<8x128xf32> to vector<8x128xbf16>
    %c0_31 = arith.constant 0 : index
    %c0_32 = arith.constant 0 : index
    %125 = vector.load %arg7[%c0_31, %c0_32] : memref<128x128xbf16, #tpu.memory_space<vmem>>, vector<128x128xbf16>
    %cst_33 = arith.constant dense<0.000000e+00> : vector<8x128xf32>
    %126 = tpu.matmul %124, %125, %cst_33 {dimension_numbers = #tpu.dot_dimension_numbers<[1], [0], [0], [1], [0, 0, 1, 1], [], []>} : vector<8x128xbf16>, vector<128x128xbf16>, vector<8x128xf32> -> vector<8x128xf32>
    %127 = vector.extract_strided_slice %0 {offsets = [7, 0], sizes = [1, 128], strides = [1, 1]} : vector<16x128xf32> to vector<1x128xf32>
    %128 = vector.broadcast %127 : vector<1x128xf32> to vector<8x128xf32>
    %129 = arith.addf %126, %128 : vector<8x128xf32>
    %130 = arith.addf %78, %129 : vector<8x128xf32>
    %131 = vector.extract_strided_slice %0 {offsets = [11, 0], sizes = [1, 128], strides = [1, 1]} : vector<16x128xf32> to vector<1x128xf32>
    %132 = vector.extract_strided_slice %0 {offsets = [12, 0], sizes = [1, 128], strides = [1, 1]} : vector<16x128xf32> to vector<1x128xf32>
    %cst_34 = arith.constant dense<0.000000e+00> : vector<8xf32>
    %133 = vector.multi_reduction <add>, %130, %cst_34 [1] : vector<8x128xf32> to vector<8xf32>
    %134 = vector.shape_cast %133 : vector<8xf32> to vector<8x1xf32>
    %cst_35 = arith.constant 1.280000e+02 : f32
    %135 = vector.broadcast %cst_35 : f32 to vector<8x1xf32>
    %136 = arith.divf %134, %135 : vector<8x1xf32>
    %137 = vector.broadcast %136 : vector<8x1xf32> to vector<8x128xf32>
    %138 = arith.subf %130, %137 : vector<8x128xf32>
    %139 = arith.mulf %138, %138 : vector<8x128xf32>
    %cst_36 = arith.constant dense<0.000000e+00> : vector<8xf32>
    %140 = vector.multi_reduction <add>, %139, %cst_36 [1] : vector<8x128xf32> to vector<8xf32>
    %141 = vector.shape_cast %140 : vector<8xf32> to vector<8x1xf32>
    %cst_37 = arith.constant 1.280000e+02 : f32
    %142 = vector.broadcast %cst_37 : f32 to vector<8x1xf32>
    %143 = arith.divf %141, %142 : vector<8x1xf32>
    %144 = vector.broadcast %136 : vector<8x1xf32> to vector<8x128xf32>
    %145 = arith.subf %130, %144 : vector<8x128xf32>
    %cst_38 = arith.constant 9.99999974E-6 : f32
    %146 = vector.broadcast %cst_38 : f32 to vector<8x1xf32>
    %147 = arith.addf %143, %146 : vector<8x1xf32>
    %148 = math.rsqrt %147 : vector<8x1xf32>
    %149 = vector.broadcast %148 : vector<8x1xf32> to vector<8x128xf32>
    %150 = arith.mulf %145, %149 : vector<8x128xf32>
    %151 = vector.broadcast %131 : vector<1x128xf32> to vector<8x128xf32>
    %152 = arith.mulf %150, %151 : vector<8x128xf32>
    %153 = vector.broadcast %132 : vector<1x128xf32> to vector<8x128xf32>
    %154 = arith.addf %152, %153 : vector<8x128xf32>
    %155 = arith.truncf %154 : vector<8x128xf32> to vector<8x128xbf16>
    %c0_39 = arith.constant 0 : index
    %c0_40 = arith.constant 0 : index
    %156 = vector.load %arg8[%c0_39, %c0_40] : memref<128x512xbf16, #tpu.memory_space<vmem>>, vector<128x512xbf16>
    %cst_41 = arith.constant dense<0.000000e+00> : vector<8x512xf32>
    %157 = tpu.matmul %155, %156, %cst_41 {dimension_numbers = #tpu.dot_dimension_numbers<[1], [0], [0], [1], [0, 0, 1, 1], [], []>} : vector<8x128xbf16>, vector<128x512xbf16>, vector<8x512xf32> -> vector<8x512xf32>
    %c0_42 = arith.constant 0 : index
    %c0_43 = arith.constant 0 : index
    %158 = vector.load %arg9[%c0_42, %c0_43] : memref<1x512xf32, #tpu.memory_space<vmem>>, vector<1x512xf32>
    %159 = vector.broadcast %158 : vector<1x512xf32> to vector<8x512xf32>
    %160 = arith.addf %157, %159 : vector<8x512xf32>
    %cst_44 = arith.constant 0.000000e+00 : f32
    %161 = vector.broadcast %cst_44 : f32 to vector<8x512xf32>
    %162 = arith.maximumf %160, %161 : vector<8x512xf32>
    %163 = arith.truncf %162 : vector<8x512xf32> to vector<8x512xbf16>
    %c0_45 = arith.constant 0 : index
    %c0_46 = arith.constant 0 : index
    %164 = vector.load %arg10[%c0_45, %c0_46] : memref<512x128xbf16, #tpu.memory_space<vmem>>, vector<512x128xbf16>
    %cst_47 = arith.constant dense<0.000000e+00> : vector<8x128xf32>
    %165 = tpu.matmul %163, %164, %cst_47 {dimension_numbers = #tpu.dot_dimension_numbers<[1], [0], [0], [1], [0, 0, 1, 1], [], []>} : vector<8x512xbf16>, vector<512x128xbf16>, vector<8x128xf32> -> vector<8x128xf32>
    %166 = vector.extract_strided_slice %0 {offsets = [8, 0], sizes = [1, 128], strides = [1, 1]} : vector<16x128xf32> to vector<1x128xf32>
    %167 = vector.broadcast %166 : vector<1x128xf32> to vector<8x128xf32>
    %168 = arith.addf %165, %167 : vector<8x128xf32>
    %169 = arith.addf %154, %168 : vector<8x128xf32>
    %170 = vector.extract_strided_slice %0 {offsets = [13, 0], sizes = [1, 128], strides = [1, 1]} : vector<16x128xf32> to vector<1x128xf32>
    %171 = vector.extract_strided_slice %0 {offsets = [14, 0], sizes = [1, 128], strides = [1, 1]} : vector<16x128xf32> to vector<1x128xf32>
    %cst_48 = arith.constant dense<0.000000e+00> : vector<8xf32>
    %172 = vector.multi_reduction <add>, %169, %cst_48 [1] : vector<8x128xf32> to vector<8xf32>
    %173 = vector.shape_cast %172 : vector<8xf32> to vector<8x1xf32>
    %cst_49 = arith.constant 1.280000e+02 : f32
    %174 = vector.broadcast %cst_49 : f32 to vector<8x1xf32>
    %175 = arith.divf %173, %174 : vector<8x1xf32>
    %176 = vector.broadcast %175 : vector<8x1xf32> to vector<8x128xf32>
    %177 = arith.subf %169, %176 : vector<8x128xf32>
    %178 = arith.mulf %177, %177 : vector<8x128xf32>
    %cst_50 = arith.constant dense<0.000000e+00> : vector<8xf32>
    %179 = vector.multi_reduction <add>, %178, %cst_50 [1] : vector<8x128xf32> to vector<8xf32>
    %180 = vector.shape_cast %179 : vector<8xf32> to vector<8x1xf32>
    %cst_51 = arith.constant 1.280000e+02 : f32
    %181 = vector.broadcast %cst_51 : f32 to vector<8x1xf32>
    %182 = arith.divf %180, %181 : vector<8x1xf32>
    %183 = vector.broadcast %175 : vector<8x1xf32> to vector<8x128xf32>
    %184 = arith.subf %169, %183 : vector<8x128xf32>
    %cst_52 = arith.constant 9.99999974E-6 : f32
    %185 = vector.broadcast %cst_52 : f32 to vector<8x1xf32>
    %186 = arith.addf %182, %185 : vector<8x1xf32>
    %187 = math.rsqrt %186 : vector<8x1xf32>
    %188 = vector.broadcast %187 : vector<8x1xf32> to vector<8x128xf32>
    %189 = arith.mulf %184, %188 : vector<8x128xf32>
    %190 = vector.broadcast %170 : vector<1x128xf32> to vector<8x128xf32>
    %191 = arith.mulf %189, %190 : vector<8x128xf32>
    %192 = vector.broadcast %171 : vector<1x128xf32> to vector<8x128xf32>
    %193 = arith.addf %191, %192 : vector<8x128xf32>
    %194 = vector.shape_cast %193 : vector<8x128xf32> to vector<1x8x128xf32>
    %c0_53 = arith.constant 0 : index
    %c0_54 = arith.constant 0 : index
    %c0_55 = arith.constant 0 : index
    %195 = vector.load %arg12[%c0_53, %c0_54, %c0_55] : memref<1x8x128xf32, #tpu.memory_space<vmem>>, vector<1x8x128xf32>
    tpu.vector_store %arg12[%c0_53, %c0_54, %c0_55], %194 {strides = array<i32>} : memref<1x8x128xf32, #tpu.memory_space<vmem>>, vector<1x8x128xf32>,
    return
  }
  func.func @transform_0(%arg0: i32) -> (i32, i32, i32) {
    %c0_i32 = arith.constant 0 : i32
    %c0_i32_0 = arith.constant 0 : i32
    %c0_i32_1 = arith.constant 0 : i32
    return %arg0, %c0_i32, %c0_i32_0 : i32, i32, i32
  }
  func.func @transform_1(%arg0: i32) -> (i32, i32, i32) {
    %c0_i32 = arith.constant 0 : i32
    %c0_i32_0 = arith.constant 0 : i32
    %c0_i32_1 = arith.constant 0 : i32
    return %arg0, %c0_i32, %c0_i32_0 : i32, i32, i32
  }
  func.func @transform_2(%arg0: i32) -> (i32, i32) {
    %c0_i32 = arith.constant 0 : i32
    %c0_i32_0 = arith.constant 0 : i32
    %c0_i32_1 = arith.constant 0 : i32
    return %c0_i32, %c0_i32_0 : i32, i32
  }
  func.func @transform_3(%arg0: i32) -> (i32, i32) {
    %c0_i32 = arith.constant 0 : i32
    %c0_i32_0 = arith.constant 0 : i32
    %c0_i32_1 = arith.constant 0 : i32
    return %c0_i32, %c0_i32_0 : i32, i32
  }
  func.func @transform_4(%arg0: i32) -> (i32, i32) {
    %c0_i32 = arith.constant 0 : i32
    %c0_i32_0 = arith.constant 0 : i32
    %c0_i32_1 = arith.constant 0 : i32
    return %c0_i32, %c0_i32_0 : i32, i32
  }
  func.func @transform_5(%arg0: i32) -> (i32, i32) {
    %c0_i32 = arith.constant 0 : i32
    %c0_i32_0 = arith.constant 0 : i32
    %c0_i32_1 = arith.constant 0 : i32
    return %c0_i32, %c0_i32_0 : i32, i32
  }
  func.func @transform_6(%arg0: i32) -> (i32, i32) {
    %c0_i32 = arith.constant 0 : i32
    %c0_i32_0 = arith.constant 0 : i32
    %c0_i32_1 = arith.constant 0 : i32
    return %c0_i32, %c0_i32_0 : i32, i32
  }
  func.func @transform_7(%arg0: i32) -> (i32, i32) {
    %c0_i32 = arith.constant 0 : i32
    %c0_i32_0 = arith.constant 0 : i32
    %c0_i32_1 = arith.constant 0 : i32
    return %c0_i32, %c0_i32_0 : i32, i32
  }
  func.func @transform_8(%arg0: i32) -> (i32, i32) {
    %c0_i32 = arith.constant 0 : i32
    %c0_i32_0 = arith.constant 0 : i32
    %c0_i32_1 = arith.constant 0 : i32
    return %c0_i32, %c0_i32_0 : i32, i32
  }
  func.func @transform_9(%arg0: i32) -> (i32, i32) {
    %c0_i32 = arith.constant 0 : i32
    %c0_i32_0 = arith.constant 0 : i32
    %c0_i32_1 = arith.constant 0 : i32
    return %c0_i32, %c0_i32_0 : i32, i32
  }
  func.func @transform_10(%arg0: i32) -> (i32, i32) {
    %c0_i32 = arith.constant 0 : i32
    %c0_i32_0 = arith.constant 0 : i32
    %c0_i32_1 = arith.constant 0 : i32
    return %c0_i32, %c0_i32_0 : i32, i32
  }
  func.func @transform_11(%arg0: i32) -> (i32, i32, i32) {
    %c0_i32 = arith.constant 0 : i32
    %c0_i32_0 = arith.constant 0 : i32
    %c0_i32_1 = arith.constant 0 : i32
    return %arg0, %c0_i32, %c0_i32_0 : i32, i32, i32
  }
}

</mosaic_0001>

<bundles_post_ra>
// kernel: decoder_layer.1
= control target key start
LH: loop header
LB: loop body
LE: loop exit
PB: predicated region body
PF: predicated region fallthrough
CT: control target
= control target key end

     0   :  { %s8998_s0 = inlined_call_operand.hbm [shape: f32[2,8,128], index: 0, kind: input, shape index: {}]   ;;  %s8999_s1 = inlined_call_operand.hbm [shape: f32[2,8,128], index: 1, kind: input, shape index: {}]   ;;  %s9000_s2 = inlined_call_operand.hbm [shape: bf16[128,384], index: 2, kind: input, shape index: {}]   ;;  %s9001_s3 = inlined_call_operand.hbm [shape: bf16[128,128], index: 3, kind: input, shape index: {}]   ;;  %s9002_s4 = inlined_call_operand.hbm [shape: bf16[128,128], index: 4, kind: input, shape index: {}]   ;;  %s9003_s5 = inlined_call_operand.hbm [shape: bf16[128,256], index: 5, kind: input, shape index: {}]   ;;  %s9004_s6 = inlined_call_operand.hbm [shape: bf16[128,128], index: 6, kind: input, shape index: {}]   ;;  %s9005_s7 = inlined_call_operand.hbm [shape: bf16[128,512], index: 7, kind: input, shape index: {}]   ;;  %s9006_s8 = inlined_call_operand.hbm [shape: f32[1,512], index: 8, kind: input, shape index: {}]   ;;  %s9007_s9 = inlined_call_operand.hbm [shape: bf16[512,128], index: 9, kind: input, shape index: {}]   ;;  %s9008_s10 = inlined_call_operand.vmem [shape: f32[16,128], index: 10, kind: input, shape index: {}]   ;;  %s9009_s11 = inlined_call_operand.hbm [shape: f32[2,8,128], index: 11, kind: output, shape index: {}]  }
   0x1   :  { %9018 = sst [smem:[#allocation28_spill]] %s9000_s2 }
   0x2   :  { %9019 = sst [smem:[#allocation29_spill]] %s9001_s3 }
   0x3   :  { %9020 = sst [smem:[#allocation30_spill]] %s9002_s4 }
   0x4   :  { %9021 = sst [smem:[#allocation31_spill]] %s9003_s5 }
   0x5   :  { %9022 = sst [smem:[#allocation32_spill]] %s9004_s6 }
   0x6   :  { %9023 = sst [smem:[#allocation33_spill]] %s9005_s7 }
   0x7   :  { %9024 = sst [smem:[#allocation34_spill]] %s9006_s8 }
   0x8   :  { %9025 = sst [smem:[#allocation35_spill]] %s9007_s9 }
   0x9   :  { %16 = vsyncpa [#allocation3], 0 }
   0xa   :  { %18 = vsyncpa [#allocation3 + $0x1], 0 }
   0xb   :  { %19 = vsyncpa [#allocation6], 0 }
   0xc   :  { %21 = vsyncpa [#allocation6 + $0x1], 0 }
   0xd   :  { %22 = vsyncpa [#allocation9], 0 }
   0xe   :  { %23 = vsyncpa [#allocation12], 0 }
   0xf   :  { %24 = vsyncpa [#allocation15], 0 }
  0x10   :  { %25 = vsyncpa [#allocation18], 0 }
  0x11   :  { %26 = vsyncpa [#allocation4], 0 }
  0x12   :  { %28 = vsyncpa [#allocation4 + $0x1], 0  ;;  %s7787_s17 = smov 0   ;;  %s7789_s18 = smov 0  }
  0x13   :  { %s7791_s19 = smov 0   ;;  %s7793_s20 = smov 0  }
  0x14 LB: > { %s7696_s21 = smov [#allocation7]   ;;  %s7808_s23 = sadd.s32 4294967295, %s7694_s20   ;;  %s7694_s20 = sphi %s7793_s20, %s9063_s20   ;;  %s7690_s19 = sphi %s7791_s19, %s9062_s19   ;;  %s7686_s18 = sphi %s7789_s18, %s9061_s18   ;;  %s7682_s17 = sphi %s7787_s17, %s9060_s17  }
  0x15   : > { %s318_s22 = sshll.u32 %s7696_s21, 4  ;;  %p6286_p0 = scmp.ge.s32.totalorder %s7694_s20, 1  ;;  %s319_s22 = int_to_ptr.vmem [resolvable:$true] %s318_s22 }
  0x16   : > { %p9014_p1 = scmp.eq.s32.totalorder %s7808_s23, 0  ;;  %p306_p2 = scmp.lt.s32.totalorder %s7694_s20, 3 }
  0x17   : > { %s7697_s25 = smov [#allocation8]   ;;  %s7698_s28 = smov [#allocation11]  }
  0x18   : > { %p7813_p3 = pnand %p6286_p0, %p306_p2  ;;  %s331_s26 = sshll.u32 %s7697_s25, 4  ;;  %s7826_s26 = int_to_ptr.vmem [resolvable:$true] %s331_s26 }
  0x19   : > { %s7828_s29 = sshll.u32 %s7698_s28, 4  ;;  %s7353_s12 = scalar_lea.vmem %s319_s22, 3072  ;;  %s358_s29 = int_to_ptr.vmem [resolvable:$true] %s7828_s29 }
  0x1a   : > { %s9026_s24 = scalar_select %p7813_p3, 1, 0 }
  0x1b   : > { %p6994_p5 = pneg %p7813_p3  ;;  %p7354_p8 = scmp.ne.s32.totalorder %s319_s22, %s7353_s12 }
  0x1c   : > { %p7361_p11 = scmp.lt.s32.totalorder %s319_s22, %s319_s22  ;;  %p7362_p12 = scmp.lt.s32.totalorder %s7353_s12, %s7353_s12 }
  0x1d   : > { %p7822_p6 = pnand %p6994_p5, %p9014_p1 }
  0x1e   : > { %p7363_p13 = por %p7362_p12, %p7361_p11 }
  0x1f   : > { %p7832_p7 = pneg %p7822_p6 }
  0x21   : > { %p7356_p9 = pnand %p7354_p8, %p7832_p7 }
  0x23   : > { %p7357_p10 = pneg %p7356_p9 }
  0x25   : > { %p7364_p0 = pnand %p7363_p13, %p7357_p10 }
  0x27   : > { %7367 = shalt.err (!%p7364_p0)
}
  0x28   : > { %s7699_s13 = smov 192   ;;  %s7700_s14 = smov 12  }
  0x29   : > { %s9029_s2 = sld [smem:[#allocation28_spill]]  ;;  %s7379_s21 = scalar_lea.vmem %s7826_s26, 1024 }
  0x2a   : > { %p7380_p2 = scmp.ne.s32.totalorder %s7826_s26, %s7379_s21  ;;  %p7387_p9 = scmp.lt.s32.totalorder %s7826_s26, %s7826_s26 }
  0x2b   : > { %p7388_p10 = scmp.lt.s32.totalorder %s7379_s21, %s7379_s21 }
  0x2c   : > { %p7382_p5 = pnand %p7380_p2, %p7832_p7 }
  0x2d   : > { %p7389_p11 = por %p7388_p10, %p7387_p9 }
  0x2e   : > { %p7383_p8 = pneg %p7382_p5 }
  0x2f   : > { %6997 = dma.hbm_to_vmem [thread:$0]  (!%p7822_p6), %s9029_s2, 3072, %s319_s22, [#allocation6], %s7699_s13, %s7699_s13, %s7700_s14  }
  0x30   : > { %p7390_p12 = pnand %p7389_p11, %p7383_p8 }
  0x32   : > { %7393 = shalt.err (!%p7390_p12)
}
  0x33   : > { %s9010_s25 = smov 64   ;;  %s9012_s28 = smov 4  }
  0x34   : > { %s9030_s3 = sld [smem:[#allocation29_spill]]  ;;  %s7405_s13 = scalar_lea.vmem %s358_s29, 2048 }
  0x35   : > { %p7406_p13 = scmp.ne.s32.totalorder %s358_s29, %s7405_s13  ;;  %p7413_p5 = scmp.lt.s32.totalorder %s358_s29, %s358_s29 }
  0x36   : > { %p7414_p8 = scmp.lt.s32.totalorder %s7405_s13, %s7405_s13 }
  0x37   : > { %p7408_p0 = pnand %p7406_p13, %p7832_p7 }
  0x38   : > { %p7415_p9 = por %p7414_p8, %p7413_p5 }
  0x39   : > { %p7409_p2 = pneg %p7408_p0 }
  0x3a   : > { %7000 = dma.hbm_to_vmem [thread:$0]  (!%p7822_p6), %s9030_s3, 1024, %s7826_s26, [#allocation9], %s9010_s25, %s9010_s25, %s9012_s28  }
  0x3b   : > { %p7416_p10 = pnand %p7415_p9, %p7409_p2 }
  0x3d   : > { %7419 = shalt.err (!%p7416_p10)
}
  0x3e   : > { %s7703_s14 = smov 128   ;;  %s7704_s15 = smov 8  }
  0x3f   : > { %s9031_s5 = sld [smem:[#allocation31_spill]]  ;;  %s7705_s26 = smov [#allocation14]  }
  0x40   : > { %s383_s22 = sshll.u32 %s7705_s26, 4  ;;  %s384_s22 = int_to_ptr.vmem [resolvable:$true] %s383_s22 }
  0x41   : > { %s7431_s12 = scalar_lea.vmem %s384_s22, 4096  ;;  %p7439_p0 = scmp.lt.s32.totalorder %s384_s22, %s384_s22 }
  0x42   : > { %p7432_p11 = scmp.ne.s32.totalorder %s384_s22, %s7431_s12  ;;  %p7440_p2 = scmp.lt.s32.totalorder %s7431_s12, %s7431_s12 }
  0x44   : > { %p7434_p12 = pnand %p7432_p11, %p7832_p7  ;;  %p7441_p5 = por %p7440_p2, %p7439_p0 }
  0x45   : > { %7006 = dma.hbm_to_vmem [thread:$0]  (!%p7822_p6), %s9031_s5, 2048, %s358_s29, [#allocation12], %s7703_s14, %s7703_s14, %s7704_s15  }
  0x46   : > { %p7435_p13 = pneg %p7434_p12 }
  0x48   : > { %p7442_p8 = pnand %p7441_p5, %p7435_p13 }
  0x4a   : > { %7445 = shalt.err (!%p7442_p8)
}
  0x4b   : > { %s7706_s13 = smov 256   ;;  %s7707_s25 = smov 16  }
  0x4c   : > { %s9032_s7 = sld [smem:[#allocation33_spill]]  ;;  %s7708_s14 = smov [#allocation10]  }
  0x4d   : > { %s344_s15 = sshll.u32 %s7708_s14, 4  ;;  %s7709_s21 = smov [#allocation13]   ;;  %s345_s15 = int_to_ptr.vmem [resolvable:$true] %s344_s15 }
  0x4e   : > { %s370_s26 = sshll.u32 %s7709_s21, 4  ;;  %s7457_s28 = scalar_lea.vmem %s345_s15, 1024  ;;  %s371_s26 = int_to_ptr.vmem [resolvable:$true] %s370_s26 }
  0x4f   : > { %p7458_p9 = scmp.ne.s32.totalorder %s345_s15, %s7457_s28  ;;  %p7465_p12 = scmp.lt.s32.totalorder %s345_s15, %s345_s15 }
  0x50   : > { %p7466_p13 = scmp.lt.s32.totalorder %s7457_s28, %s7457_s28 }
  0x51   : > { %p7460_p10 = pnand %p7458_p9, %p7832_p7 }
  0x52   : > { %7012 = dma.hbm_to_vmem [thread:$0]  (!%p7822_p6), %s9032_s7, 4096, %s384_s22, [#allocation15], %s7706_s13, %s7706_s13, %s7707_s25  }
  0x53   : > { %p7461_p11 = pneg %p7460_p10  ;;  %p7467_p0 = por %p7466_p13, %p7465_p12 }
  0x55   : > { %p7468_p2 = pnand %p7467_p0, %p7461_p11 }
  0x57   : > { %7471 = shalt.err (!%p7468_p2)
}
  0x58   : > { %s9033_s12 = smov 4   ;;  %s9034_s25 = smov 64  }
  0x59   : > { %s9035_s4 = sld [smem:[#allocation30_spill]]  ;;  %s7483_s16 = scalar_lea.vmem %s371_s26, 1024 }
  0x5a   : > { %p7484_p5 = scmp.ne.s32.totalorder %s371_s26, %s7483_s16  ;;  %p7491_p10 = scmp.lt.s32.totalorder %s371_s26, %s371_s26 }
  0x5b   : > { %p7492_p4 = scmp.lt.s32.totalorder %s7483_s16, %s7483_s16 }
  0x5c   : > { %p7486_p8 = pnand %p7484_p5, %p7832_p7 }
  0x5d   : > { %p7493_p12 = por %p7492_p4, %p7491_p10 }
  0x5e   : > { %p7487_p9 = pneg %p7486_p8 }
  0x5f   : > { %7003 = dma.hbm_to_vmem [thread:$0]  (!%p7822_p6), %s9035_s4, 1024, %s345_s15, [#allocation9], %s9034_s25, %s9034_s25, %s9033_s12  }
  0x60   : > { %p7494_p11 = pnand %p7493_p12, %p7487_p9 }
  0x62   : > { %7497 = shalt.err (!%p7494_p11)
}
  0x63   : > { %s9036_s6 = sld [smem:[#allocation32_spill]]  ;;  %s7710_s14 = smov [#allocation16]  }
  0x64   : > { %s397_s15 = sshll.u32 %s7710_s14, 4  ;;  %s7711_s21 = smov [#allocation17]   ;;  %s398_s15 = int_to_ptr.vmem [resolvable:$true] %s397_s15 }
  0x65   : > { %s407_s22 = sshll.u32 %s7711_s21, 4  ;;  %s7509_s13 = scalar_lea.vmem %s398_s15, 64  ;;  %s408_s22 = int_to_ptr.vmem [resolvable:$true] %s407_s22 }
  0x66   : > { %p7510_p4 = scmp.ne.s32.totalorder %s398_s15, %s7509_s13  ;;  %p7517_p2 = scmp.lt.s32.totalorder %s398_s15, %s398_s15 }
  0x67   : > { %p7518_p5 = scmp.lt.s32.totalorder %s7509_s13, %s7509_s13 }
  0x68   : > { %p7512_p13 = pnand %p7510_p4, %p7832_p7 }
  0x69   : > { %7009 = dma.hbm_to_vmem [thread:$0]  (!%p7822_p6), %s9036_s6, 1024, %s371_s26, [#allocation12], %s9034_s25, %s9034_s25, %s9033_s12  }
  0x6a   : > { %p7513_p0 = pneg %p7512_p13  ;;  %p7519_p8 = por %p7518_p5, %p7517_p2 }
  0x6c   : > { %p7520_p9 = pnand %p7519_p8, %p7513_p0 }
  0x6e   : > { %7523 = shalt.err (!%p7520_p9)
}
  0x6f   : > { %s9037_s8 = sld [smem:[#allocation34_spill]]  ;;  %s7535_s28 = scalar_lea.vmem %s408_s22, 4096 }
  0x70   : > { %p7536_p10 = scmp.ne.s32.totalorder %s408_s22, %s7535_s28  ;;  %p7543_p1 = scmp.lt.s32.totalorder %s408_s22, %s408_s22 }
  0x71   : > { %p7544_p4 = scmp.lt.s32.totalorder %s7535_s28, %s7535_s28 }
  0x72   : > { %p7538_p12 = pnand %p7536_p10, %p7832_p7 }
  0x73   : > { %p7545_p13 = por %p7544_p4, %p7543_p1 }
  0x74   : > { %p7539_p11 = pneg %p7538_p12 }
  0x75   : > { %7015 = dma.hbm_to_vmem [thread:$0]  (!%p7822_p6), %s9037_s8, 64, %s398_s15, [#allocation15]  }
  0x76   : > { %p7546_p3 = pnand %p7545_p13, %p7539_p11 }
  0x78   : > { %7549 = shalt.err (!%p7546_p3)
}
  0x79   : > { %s9038_s9 = sld [smem:[#allocation35_spill]]  ;;  %s6285_s27 = sadd.s32 4294967294, %s7694_s20  }
  0x7a   : > { %s7912_s30 = sadd.s32 1, %s7694_s20   ;;  %s41_s21 = sadd.s32 1, %s7690_s19 }
  0x7b   : > { %s38_s15 = ssub.s32 %s7694_s20, %s7912_s30  ;;  %p48_p3 = scmp.ne.s32.totalorder %s7690_s19, %s7686_s18 }
  0x7c   : > { %p39_p1 = scmp.eq.s32.totalorder %s38_s15, 0  ;;  %p49_p7 = scmp.eq.s32.totalorder %s7694_s20, 0 }
  0x7d   : > { %p54_p0 = scmp.ne.s32.totalorder %s7686_s18, %s7682_s17  ;;  %p9040_p5 = scmp.eq.s32.totalorder %s7808_s23, 0 }
  0x7e   : > { %s7923_s13 = scalar_select %p39_p1, %s7690_s19, %s41_s21  }
  0x7f   : > { %7018 = dma.hbm_to_vmem [thread:$0]  (!%p7822_p6), %s9038_s9, 4096, %s408_s22, [#allocation18], %s9034_s25, %s9034_s25, %s9033_s12  }
  0x80   : > { %p7925_p2 = por %p49_p7, %p48_p3  ;;  %p7931_p6 = por %p9040_p5, %p54_p0 }
  0x81   : > { %p293_p8 = scmp.eq.s32.totalorder %s7808_s23, 1  ;;  %p299_p9 = scmp.eq.s32.totalorder %s6285_s27, 1 }
  0x82   : > { %s9041_s12 = scalar_select %p7931_p6, 1, 0 }
  0x83   : > { %p7038_p10 = scmp.lt.s32.totalorder %s7694_s20, 2  ;;  %s424_s25 = sand.u32 1, %s7690_s19  }
  0x84   : > { %p7938_p12 = por %p293_p8, %p48_p3  ;;  %p7942_p11 = por %p299_p9, %p54_p0 }
  0x85   : > { %s7946_s28 = sshll.u32 %s424_s25, 3  ;;  %s6297_s29 = sshll.u32 %s7694_s20, 7 }
  0x86   : > { %s9042_s22 = scalar_select %p7938_p12, 1, 0 }
  0x87   : > { %s9043_s26 = scalar_select %p7942_p11, 1, 0 }
  0x88   : > { %s7952_s21 = scalar_lea.hbm %s8998_s0, %s6297_s29  ;;  %s428_s27 = scalar_lea.vmem [#allocation2], %s7946_s28 }
  0x89   : > { %s435_s2 = sshll.u32 %s428_s27, 4  ;;  %p7959_p4 = pnand %p7038_p10, %p7925_p2  ;;  %s7955_s2 = int_to_ptr.vmem [resolvable:$true] %s435_s2 }
  0x8a   : > { %s7966_s14 = scalar_lea.hbm %s8999_s1, %s6297_s29  ;;  %s442_s15 = sand.u32 1, %s7694_s20  }
  0x8b   : > { %s425_s6 = scalar_lea.sflag [#allocation3], %s424_s25  ;;  %s7550_s7 = scalar_lea.hbm %s7952_s21, 128 }
  0x8c   : > { %p7551_p13 = scmp.ne.s32.totalorder %s7952_s21, %s7550_s7  ;;  %p7552_p1 = pneg %p7959_p4 }
  0x8d   : > { %s7555_s8 = scalar_lea.hbm %s8998_s0, 256  ;;  %p7556_p0 = scmp.lt.s32.totalorder %s7952_s21, %s8998_s0 }
  0x8e   : > { %p7553_p3 = pnand %p7552_p1, %p7551_p13  ;;  %p7557_p2 = scmp.lt.s32.totalorder %s7555_s8, %s7550_s7 }
  0x90   : > { %p7554_p7 = pneg %p7553_p3  ;;  %p7558_p5 = por %p7557_p2, %p7556_p0 }
  0x92   : > { %p7559_p8 = pnand %p7558_p5, %p7554_p7 }
  0x94   : > { %7562 = shalt.err (!%p7559_p8)
}
  0x95   : > { %s7563_s5 = scalar_lea.vmem %s7955_s2, 128  ;;  %s7712_s25 = smov [#allocation2]  }
  0x96   : > { %p7564_p9 = scmp.ne.s32.totalorder %s7955_s2, %s7563_s5  ;;  %s7568_s29 = sshll.u32 %s7712_s25, 4  ;;  %s7569_s29 = int_to_ptr.vmem [resolvable:$false] %s7568_s29 }
  0x97   : > { %s7570_s16 = scalar_lea.vmem %s7569_s29, 256  ;;  %p7571_p3 = scmp.lt.s32.totalorder %s7955_s2, %s7569_s29 }
  0x98   : > { %p7566_p10 = pnand %p7564_p9, %p7552_p1  ;;  %p7572_p11 = scmp.lt.s32.totalorder %s7570_s16, %s7563_s5 }
  0x9a   : > { %p7567_p13 = pneg %p7566_p10  ;;  %p7573_p12 = por %p7572_p11, %p7571_p3 }
  0x9c   : > { %p7574_p0 = pnand %p7573_p12, %p7567_p13 }
  0x9e   : > { %7577 = shalt.err (!%p7574_p0)
}
  0x9f   : > { %7022 = dma.hbm_to_vmem [thread:$0]  (!%p7959_p4), %s7952_s21, 128, %s7955_s2, %s425_s6  }
  0xa0   : > { %s446_s7 = scalar_lea.vmem [#allocation5], %s7946_s28  ;;  %s443_s9 = scalar_lea.sflag [#allocation6], %s442_s15 }
  0xa1   : > { %s453_s8 = sshll.u32 %s446_s7, 4  ;;  %s7578_s27 = scalar_lea.hbm %s7966_s14, 128  ;;  %s454_s8 = int_to_ptr.vmem [resolvable:$true] %s453_s8 }
  0xa2   : > { %p7579_p11 = scmp.ne.s32.totalorder %s7966_s14, %s7578_s27  ;;  %s7583_s25 = scalar_lea.hbm %s8999_s1, 256 }
  0xa3   : > { %p7584_p2 = scmp.lt.s32.totalorder %s7966_s14, %s8999_s1  ;;  %p7585_p5 = scmp.lt.s32.totalorder %s7583_s25, %s7578_s27 }
  0xa4   : > { %p7581_p12 = pnand %p7579_p11, %p7552_p1 }
  0xa5   : > { %p7586_p8 = por %p7585_p5, %p7584_p2 }
  0xa6   : > { %p7582_p7 = pneg %p7581_p12 }
  0xa8   : > { %p7587_p9 = pnand %p7586_p8, %p7582_p7 }
  0xaa   : > { %7590 = shalt.err (!%p7587_p9)
}
  0xab   : > { %s7591_s2 = scalar_lea.vmem %s454_s8, 128  ;;  %s7713_s6 = smov [#allocation5]  }
  0xac   : > { %p7592_p10 = scmp.ne.s32.totalorder %s454_s8, %s7591_s2  ;;  %s7596_s28 = sshll.u32 %s7713_s6, 4  ;;  %s7597_s28 = int_to_ptr.vmem [resolvable:$false] %s7596_s28 }
  0xad   : > { %s7598_s21 = scalar_lea.vmem %s7597_s28, 256  ;;  %p7599_p0 = scmp.lt.s32.totalorder %s454_s8, %s7597_s28 }
  0xae   : > { %p7594_p13 = pnand %p7592_p10, %p7552_p1  ;;  %p7600_p11 = scmp.lt.s32.totalorder %s7598_s21, %s7591_s2 }
  0xb0   : > { %p7595_p3 = pneg %p7594_p13  ;;  %p7601_p12 = por %p7600_p11, %p7599_p0 }
  0xb2   : > { %p7602_p6 = pnand %p7601_p12, %p7595_p3 }
  0xb4   : > { %7605 = shalt.err (!%p7602_p6)
}
  0xb5   : > { %7025 = dma.hbm_to_vmem [thread:$0]  (!%p7959_p4), %s7966_s14, 128, %s454_s8, %s443_s9  }
  0xb6   : > { %p9045_p7 = scmp.ne.s32.totalorder %s9026_s24, 0 }
  0xb7   : > { %s8017_s15 = sand.u32 (!%p9045_p7), 1, %s7686_s18   ;;  %p9046_p1 = scmp.ne.s32.totalorder (!%p9045_p7), %s9041_s12, 0 }
  0xb8   : > { %462 = sbr.rel (%p9045_p7) target bundleno = 4221 (0x107d), region = 64  ;;  %s8020_s7 = sshll.u32 (!%p9045_p7), %s8017_s15, 3 }
  0xb9   : > { %s465_s27 = scalar_lea.sflag (!%p9045_p7), [#allocation3], %s8017_s15  ;;  %s468_s4 = scalar_lea.vmem (!%p9045_p7), [#allocation2], %s8020_s7 }
  0xbd   : > { %7649 = dma.done.wait (%p9046_p1), %s465_s27, 128  }
  0xbe   : > { %7651 = vsyncadd (%p9046_p1), %s465_s27, 4294967168  ;;  %s473_s3 = sand.u32 1, %s7808_s23   ;;  %s477_s14 = scalar_lea.vmem [#allocation5], %s8020_s7 }
  0xbf   : > { %s474_s24 = scalar_lea.sflag [#allocation6], %s473_s3 }
  0xc0   : > { %7653 = dma.done.wait (%p9046_p1), %s474_s24, 128  }
  0xc1   : > { %7655 = vsyncadd (%p9046_p1), %s474_s24, 4294967168  ;;  %p9047_p6 = scmp.eq.s32.totalorder %s7808_s23, 0 }
  0xc3   : > { %7657 = dma.done.wait (%p9047_p6), [#allocation6], 3072   ;;  %p9048_p4 = pmov %p9047_p6 }
  0xc5   : > { %7659 = vsyncadd (%p9048_p4), [#allocation6], 4294964224  ;;  %p9049_p2 = pmov %p9048_p4 }
  0xc7   : > { %7661 = dma.done.wait (%p9049_p2), [#allocation9], 2048   ;;  %p9050_p5 = pmov %p9049_p2 }
  0xc8   : > { %p9051_p8 = pmov %p9049_p2 }
  0xc9   : > { %7663 = vsyncadd (%p9050_p5), [#allocation9], 4294965248 }
  0xca   : > { %7665 = dma.done.wait (%p9051_p8), [#allocation12], 3072   ;;  %p9052_p9 = pmov %p9049_p2 }
  0xcb   : > { %p9053_p10 = pmov %p9049_p2 }
  0xcc   : > { %7667 = vsyncadd (%p9052_p9), [#allocation12], 4294964224 }
  0xcd   : > { %7669 = dma.done.wait (%p9053_p10), [#allocation15], 4160   ;;  %p9054_p13 = pmov %p9049_p2 }
  0xce   : > { %p9055_p3 = pmov %p9049_p2 }
  0xcf   : > { %7671 = vsyncadd (%p9054_p13), [#allocation15], 4294963136 }
  0xd0   : > { %7673 = dma.done.wait (%p9055_p3), [#allocation18], 4096   ;;  %p9056_p0 = pmov %p9049_p2 }
  0xd1   : > { %v7714_v0 = vmov 0   ;;  %v7715_v1 = vmov 0.0   ;;  %v7108_v2 = vld [vmem:[#allocation7 + $0xac] ss:$12 sps:$4 sm:$0xff]   ;;  %v7110_v3 = vld [vmem:[#allocation7 + $0xa8] ss:$12 sps:$4 sm:$0xff]   ;;  %v800_v28 = vlaneseq }
  0xd2   : > { %7675 = vsyncadd (%p9056_p0), [#allocation18], 4294963200  ;;  %751 = vmatprep.mubr.bf16.mxu0 %v7714_v0  ;;  %6684 = vmatprep.subr.bf16.mxu1 %v7715_v1  ;;  %v7111_v4 = vld [vmem:[#allocation7 + $0x94] ss:$12 sps:$4 sm:$0xff]   ;;  %v7113_v5 = vld [vmem:[#allocation7 + $0x90] ss:$12 sps:$4 sm:$0xff]  }
  0xd3   : > { %719 = vmatprep.subr.bf16.mxu0 %v7108_v2  ;;  %v7114_v6 = vld [vmem:[#allocation7 + $0x7c] ss:$12 sps:$4 sm:$0xff]   ;;  %v7116_v7 = vld [vmem:[#allocation7 + $0x78] ss:$12 sps:$4 sm:$0xff]   ;;  %v7119_v9 = vld [vmem:[#allocation7 + $0x60] ss:$12 sps:$4 sm:$0xff]  }
  0xd4   : > { %720 = vmatpush1.bf16.msra.mxu0 %v7110_v3  ;;  %v7117_v8 = vld [vmem:[#allocation7 + $0x64] ss:$12 sps:$4 sm:$0xff]   ;;  %v7120_v11 = vld [vmem:[#allocation7 + $0x4c] ss:$12 sps:$4 sm:$0xff]   ;;  %v7122_v12 = vld [vmem:[#allocation7 + $0x48] ss:$12 sps:$4 sm:$0xff]  }
  0xd5   : > { %721 = vmatprep.subr.bf16.mxu0 %v7111_v4  ;;  %v7132_v10 = vld [vmem:[#allocation7 + $0xb0] ss:$12 sps:$4 sm:$0xff]   ;;  %v7133_v13 = vld [vmem:[#allocation7 + $0x98] ss:$12 sps:$4 sm:$0xff]   ;;  %v7123_v14 = vld [vmem:[#allocation7 + $0x34] ss:$12 sps:$4 sm:$0xff]  }
  0xd6   : > { %6685 = vmatpush3.bf16.msra.mxu1 %v7132_v10  ;;  %v7134_v15 = vld [vmem:[#allocation7 + $0x80] ss:$12 sps:$4 sm:$0xff]   ;;  %v7125_v16 = vld [vmem:[#allocation7 + $0x30] ss:$12 sps:$4 sm:$0xff]   ;;  %v7135_v18 = vld [vmem:[#allocation7 + $0x68] ss:$12 sps:$4 sm:$0xff]  }
  0xd7   : > { %6686 = vmatprep.subr.bf16.mxu1 %v7715_v1  ;;  %v7126_v17 = vld [vmem:[#allocation7 + $0x1c] ss:$12 sps:$4 sm:$0xff]   ;;  %v7128_v19 = vld [vmem:[#allocation7 + $0x18] ss:$12 sps:$4 sm:$0xff]   ;;  %v7131_v21 = vld [vmem:[#allocation7] ss:$12 sps:$4 sm:$0xff]  }
  0xd8   : > { %722 = vmatpush1.bf16.msra.mxu0 %v7113_v5  ;;  %v7129_v20 = vld [vmem:[#allocation7 + $0x4] ss:$12 sps:$4 sm:$0xff]   ;;  %v7138_v26 = vld [vmem:[#allocation7 + $0x20] ss:$12 sps:$4 sm:$0xff]   ;;  %v7139_v27 = vld [vmem:[#allocation7 + $0x8] ss:$12 sps:$4 sm:$0xff]  }
  0xd9   : > { %723 = vmatprep.subr.bf16.mxu0 %v7114_v6  ;;  %v556_v22 = vld [vmem:[%s468_s4] sm:$0xff]  ;;  %v7136_v24 = vld [vmem:[#allocation7 + $0x50] ss:$12 sps:$4 sm:$0xff]   ;;  %vm7716_vm0 = vmmov 0   ;;  %v8073_v29 = vshrl.u32 %v800_v28, 7  ;;  %s7717_s9 = smov 80  }
  0xda   : > { %6687 = vmatpush3.bf16.msra.mxu1 %v7133_v13  ;;  %v558_v23 = vpack.c.bf16 %v556_v22, %v556_v22  ;;  %v7137_v25 = vld [vmem:[#allocation7 + $0x38] ss:$12 sps:$4 sm:$0xff]   ;;  %6700 = vmatprep.mubr.msk.bf16.mxu1 %vm7716_vm0, %v7715_v1  ;;  %s7718_s5 = smov 112   ;;  %s7719_s25 = smov 96   ;;  %v7724_v48 = vmov 1983009808  }
  0xdb   : > { %6688 = vmatprep.subr.bf16.mxu1 %v7715_v1  ;;  %v8076_v30 = vsub.s32 1, %v8073_v29  ;;  %v554_v31 = vld [vmem:[%s9008_s10] sm:$0xff]  ;;  %v8082_v32 = vsub.s32 0, %v8073_v29  ;;  %s7720_s29 = smov 64   ;;  %s7721_s16 = smov 48   ;;  %v8110_v41 = vsub.s32 2, %v8073_v29  ;;  %v840_v49 = vunpack.c.l.s4 %v7724_v48 }
  0xdc   : > { %724 = vmatpush1.bf16.msra.mxu0 %v7116_v7  ;;  %s7722_s2 = smov 32   ;;  %s7723_s6 = smov 16   ;;  %v7725_v50 = vmov 1934713408   ;;  %vm1721_vm1 = vcmask 130048   ;;  %vm2174_vm2 = vcmask 1043456  }
  0xdd   : > { %725 = vmatprep.subr.bf16.mxu0 %v7117_v8  ;;  %v808_v33 = vrot.slane %v554_v31, %v8076_v30  ;;  %v803_v36 = vrot.slane %v554_v31, %v8082_v32  ;;  %v813_v42 = vrot.slane %v554_v31, %v8110_v41  ;;  %v904_v51 = vunpack.c.l.s4 %v7725_v50  ;;  %s6537_s8 = sshll.u32 %s7808_s23, 7  ;;  %p9057_p12 = scmp.ne.s32.totalorder %s9042_s22, 0 }
  0xde   : > { %6689 = vmatpush3.bf16.msra.mxu1 %v7134_v15  ;;  %v841_v52 = vunpack.c.0.s8 %v840_v49  ;;  %vm2090_vm3 = vcmask 64512   ;;  %vm2857_vm4 = vcmask 261120   ;;  %vm2859_vm5 = vcmask 392192   ;;  %s7726_s28 = smov [#allocation19]  }
  0xdf   : > { %6690 = vmatprep.subr.bf16.mxu1 %v7715_v1  ;;  %v905_v55 = vunpack.c.0.s8 %v904_v51  ;;  %vm2861_vm6 = vcmask 523264   ;;  %vm2863_vm7 = vcmask 654336   ;;  %vm2865_vm8 = vcmask 785408   ;;  %s7610_s21 = sshll.u32 %s7726_s28, 4  ;;  %s7611_s21 = int_to_ptr.vmem [resolvable:$false] %s7610_s21 }
  0xe0   : > { %726 = vmatpush1.bf16.msra.mxu0 %v7119_v9  ;;  %v8126_v56 = vsub.s32 %v841_v52, %v8073_v29  ;;  %vm2867_vm9 = vcmask 916480   ;;  %s7612_s23 = scalar_lea.vmem %s7611_s21, 256 }
  0xe1   : > { %727 = vmatprep.subr.bf16.mxu0 %v7120_v11  ;;  %v8129_v63 = vsub.s32 %v905_v55, %v8073_v29 }
  0xe2   : > { %6691 = vmatpush3.bf16.msra.mxu1 %v7135_v18 }
  0xe3   : > { %6692 = vmatprep.subr.bf16.mxu1 %v7715_v1 }
  0xe4   : > { %728 = vmatpush1.bf16.msra.mxu0 %v7122_v12 }
  0xe5   : > { %729 = vmatprep.subr.bf16.mxu0 %v7123_v14 }
  0xe6   : > { %6693 = vmatpush3.bf16.msra.mxu1 %v7136_v24 }
  0xe7   : > { %6694 = vmatprep.subr.bf16.mxu1 %v7715_v1 }
  0xe8   : > { %730 = vmatpush1.bf16.msra.mxu0 %v7125_v16 }
  0xe9   : > { %731 = vmatprep.subr.bf16.mxu0 %v7126_v17 }
  0xea   : > { %6695 = vmatpush3.bf16.msra.mxu1 %v7137_v25 }
  0xeb   : > { %6696 = vmatprep.subr.bf16.mxu1 %v7715_v1 }
  0xec   : > { %732 = vmatpush1.bf16.msra.mxu0 %v7128_v19 }
  0xed   : > { %733 = vmatprep.subr.bf16.mxu0 %v7129_v20 }
  0xee   : > { %6697 = vmatpush3.bf16.msra.mxu1 %v7138_v26 }
  0xef   : > { %6698 = vmatprep.subr.bf16.mxu1 %v7715_v1 }
  0xf0   : > { %734 = vmatpush1.bf16.msra.mxu0 %v7131_v21 }
  0xf1   : > { %6728 = vmatprep.subr.bf16.mxu0 %v7715_v1 }
  0xf2   : > { %6699 = vmatpush3.bf16.msra.mxu1 %v7139_v27 }
  0xf3   : > { %752 = vmatmul.mubr.bf16.vlgmr.msra.gmra.mxu0 %v558_v23  ;;  %6704 = vmatprep.subr.bf16.mxu1 %v7715_v1 }
  0xf4   : > { %6730 = vmatprep.mubr.msk.bf16.mxu0 %vm7716_vm0, %v7715_v1 }
  0xf5   : > { %6701 = vmatmul.mubr.bf16.vlgmr.msra.gmra.mxu1 %v558_v23 }
  0xf6   : > { %6706 = vmatprep.mubr.msk.bf16.mxu1 %vm7716_vm0, %v7715_v1 }
 0x1b3   : > { %v753_v34 = vpop.f32.mrf.mxu0 }
 0x1b4   : > { %v8088_v40 = vadd.f32 %v803_v36, %v753_v34 }
 0x1b5   : > { %v755_v35 = vpop.f32.mrf.mxu0  ;;  %v794_v43 = vpop.f32.mrf.mxu1 }
 0x1b6   : > { %v809_v37 = vadd.f32 %v808_v33, %v755_v35  ;;  %v8113_v44 = vadd.f32 %v813_v42, %v794_v43 }
 0x1b7   : > { %v757_v38 = vpop.f32.mrf.mxu0  ;;  %v6702_v45 = vpop.f32.mrf.mxu1 }
 0x1b8   : > { %1124 = vrot.lane.b32.xlu1 %v809_v37, %s7717_s9  ;;  %1118 = vrot.lane.b32.xlu0 %v809_v37, %s7718_s5 }
 0x1b9   : > { %v758_v39 = vpop.f32.mrf.mxu0  ;;  %v797_v46 = vpop.f32.mrf.mxu1 }
 0x1bb   : > { %v6703_v47 = vpop.f32.mrf.mxu1 }
 0x1bc   : > { %1121 = vrot.lane.b32.xlu0 %v809_v37, %s7719_s25  ;;  %816 = vrot.lane.b32.xlu1 %v8088_v40, %s7718_s5 }
 0x1c0   : > { %819 = vrot.lane.b32.xlu0 %v8088_v40, %s7719_s25  ;;  %822 = vrot.lane.b32.xlu1 %v8088_v40, %s7717_s9 }
 0x1c4   : > { %1127 = vrot.lane.b32.xlu0 %v809_v37, %s7720_s29  ;;  %1130 = vrot.lane.b32.xlu1 %v809_v37, %s7721_s16 }
 0x1c8   : > { %1133 = vrot.lane.b32.xlu0 %v809_v37, %s7722_s2  ;;  %1136 = vrot.lane.b32.xlu1 %v809_v37, %s7723_s6 }
 0x1cc   : > { %825 = vrot.lane.b32.xlu0 %v8088_v40, %s7720_s29  ;;  %828 = vrot.lane.b32.xlu1 %v8088_v40, %s7721_s16 }
 0x1d0   : > { %831 = vrot.lane.b32.xlu0 %v8088_v40, %s7722_s2  ;;  %834 = vrot.lane.b32.xlu1 %v8088_v40, %s7723_s6 }
 0x1d4   : > { %1420 = vrot.lane.b32.xlu0 %v8113_v44, %s7718_s5  ;;  %1423 = vrot.lane.b32.xlu1 %v8113_v44, %s7719_s25 }
 0x1d8   : > { %1426 = vrot.lane.b32.xlu0 %v8113_v44, %s7717_s9  ;;  %1432 = vrot.lane.b32.xlu1 %v8113_v44, %s7721_s16 }
 0x1dc   : > { %1429 = vrot.lane.b32.xlu0 %v8113_v44, %s7720_s29 }
 0x22a   : > { %v1125_v53 = vpop.permute.xlu1 %1124  ;;  %v1119_v54 = vpop.permute.xlu0 %1118 }
 0x22b   : > { %v1155_v57 = vcombine.low %v1119_v54, %v1125_v53  ;;  %v1156_v58 = vcombine.high %v1119_v54, %v1125_v53 }
 0x22d   : > { %v1163_v2 = vrot.slane %v1155_v57, %v8126_v56  ;;  %v1170_v3 = vrot.slane %v1156_v58, %v8126_v56 }
 0x22e   : > { %v1122_v59 = vpop.permute.xlu0 %1121  ;;  %v817_v60 = vpop.permute.xlu1 %816 }
 0x22f   : > { %v1139_v61 = vcombine.low %v809_v37, %v1122_v59  ;;  %v1140_v62 = vcombine.high %v809_v37, %v1122_v59 }
 0x231   : > { %v1147_v4 = vrot.slane %v1139_v61, %v8126_v56  ;;  %v1154_v5 = vrot.slane %v1140_v62, %v8126_v56 }
 0x232   : > { %v820_v6 = vpop.permute.xlu0 %819  ;;  %v823_v7 = vpop.permute.xlu1 %822 }
 0x233   : > { %v1203_v8 = vcombine.low %v1147_v4, %v1163_v2  ;;  %v1204_v9 = vcombine.high %v1147_v4, %v1163_v2  ;;  %v1219_v10 = vcombine.low %v1154_v5, %v1170_v3  ;;  %v1220_v11 = vcombine.high %v1154_v5, %v1170_v3 }
 0x234   : > { %v837_v12 = vcombine.low %v8088_v40, %v820_v6  ;;  %v838_v13 = vcombine.high %v8088_v40, %v820_v6  ;;  %v853_v14 = vcombine.low %v817_v60, %v823_v7  ;;  %v854_v15 = vcombine.high %v817_v60, %v823_v7 }
 0x235   : > { %v1211_v16 = vrot.slane %v1203_v8, %v8129_v63  ;;  %v1218_v17 = vrot.slane %v1204_v9, %v8129_v63  ;;  %v1227_v18 = vrot.slane %v1219_v10, %v8129_v63  ;;  %v1234_v19 = vrot.slane %v1220_v11, %v8129_v63 }
 0x236   : > { %v845_v20 = vrot.slane %v837_v12, %v8126_v56  ;;  %v852_v21 = vrot.slane %v838_v13, %v8126_v56  ;;  %v861_v22 = vrot.slane %v853_v14, %v8126_v56  ;;  %v868_v23 = vrot.slane %v854_v15, %v8126_v56  ;;  %v1128_v24 = vpop.permute.xlu0 %1127  ;;  %v1131_v25 = vpop.permute.xlu1 %1130 }
 0x237   : > { %v6344_v26 = vcombine.low %v1211_v16, %v1218_v17  ;;  %v6346_v27 = vcombine.high %v1211_v16, %v1218_v17  ;;  %v6348_v37 = vcombine.low %v1227_v18, %v1234_v19  ;;  %v6350_v38 = vcombine.high %v1227_v18, %v1234_v19 }
 0x238   : > { %v901_v28 = vcombine.low %v845_v20, %v861_v22  ;;  %v902_v31 = vcombine.high %v845_v20, %v861_v22  ;;  %v917_v33 = vcombine.low %v852_v21, %v868_v23  ;;  %v918_v34 = vcombine.high %v852_v21, %v868_v23 }
 0x239   : > { %v8146_v35 = vrot.slane %v6344_v26, %v8126_v56  ;;  %v8149_v36 = vrot.slane %v6346_v27, %v8126_v56  ;;  %v8160_v60 = vrot.slane %v6348_v37, %v8126_v56  ;;  %v8163_v61 = vrot.slane %v6350_v38, %v8126_v56 }
 0x23a   : > { %v909_v39 = vrot.slane %v901_v28, %v8129_v63  ;;  %v916_v40 = vrot.slane %v902_v31, %v8129_v63  ;;  %v925_v42 = vrot.slane %v917_v33, %v8129_v63  ;;  %v932_v43 = vrot.slane %v918_v34, %v8129_v63  ;;  %v1134_v45 = vpop.permute.xlu0 %1133  ;;  %v1137_v46 = vpop.permute.xlu1 %1136 }
 0x23b   : > { %v1171_v47 = vcombine.low %v1128_v24, %v1134_v45  ;;  %v1172_v48 = vcombine.high %v1128_v24, %v1134_v45  ;;  %v1187_v49 = vcombine.low %v1131_v25, %v1137_v46  ;;  %v1188_v50 = vcombine.high %v1131_v25, %v1137_v46 }
 0x23c   : > { %v6336_v51 = vcombine.low %v909_v39, %v916_v40  ;;  %v6338_v52 = vcombine.high %v909_v39, %v916_v40  ;;  %v6340_v53 = vcombine.low %v925_v42, %v932_v43  ;;  %v6342_v54 = vcombine.high %v925_v42, %v932_v43 }
 0x23d   : > { %v1179_v55 = vrot.slane %v1171_v47, %v8126_v56  ;;  %v1186_v57 = vrot.slane %v1172_v48, %v8126_v56  ;;  %v1195_v58 = vrot.slane %v1187_v49, %v8126_v56  ;;  %v1202_v59 = vrot.slane %v1188_v50, %v8126_v56 }
 0x23e   : > { %v8166_v62 = vrot.slane %v6336_v51, %v8126_v56  ;;  %v8169_v2 = vrot.slane %v6338_v52, %v8126_v56  ;;  %v826_v3 = vpop.permute.xlu0 %825  ;;  %v829_v4 = vpop.permute.xlu1 %828  ;;  %v8172_v9 = vrot.slane %v6340_v53, %v8126_v56  ;;  %v8175_v10 = vrot.slane %v6342_v54, %v8126_v56 }
 0x23f   : > { %v1235_v5 = vcombine.low %v1179_v55, %v1195_v58  ;;  %v1236_v6 = vcombine.high %v1179_v55, %v1195_v58  ;;  %v1251_v7 = vcombine.low %v1186_v57, %v1202_v59  ;;  %v1252_v8 = vcombine.high %v1186_v57, %v1202_v59 }
 0x240   : > { %v1037_v15 = vcombine.low %v8166_v62, %v8169_v2  ;;  %v1339_v18 = vcombine.low %v8146_v35, %v8149_v36  ;;  %v1371_v19 = vcombine.low %v8160_v60, %v8163_v61  ;;  %v1069_v28 = vcombine.low %v8172_v9, %v8175_v10 }
 0x241   : > { %v1243_v11 = vrot.slane %v1235_v5, %v8129_v63  ;;  %v1250_v12 = vrot.slane %v1236_v6, %v8129_v63  ;;  %v1259_v13 = vrot.slane %v1251_v7, %v8129_v63  ;;  %v1266_v14 = vrot.slane %v1252_v8, %v8129_v63 }
 0x242   : > { %v832_v16 = vpop.permute.xlu0 %831  ;;  %v835_v17 = vpop.permute.xlu1 %834  ;;  %v1347_v43 = vrot.slane %v1339_v18, %v8129_v63  ;;  %v1379_v45 = vrot.slane %v1371_v19, %v8129_v63  ;;  %v1045_v52 = vrot.slane %v1037_v15, %v8129_v63  ;;  %v1077_v53 = vrot.slane %v1069_v28, %v8129_v63 }
 0x243   : > { %v6345_v20 = vcombine.low %v1243_v11, %v1250_v12  ;;  %v6347_v21 = vcombine.high %v1243_v11, %v1250_v12  ;;  %v6349_v22 = vcombine.low %v1259_v13, %v1266_v14  ;;  %v6351_v23 = vcombine.high %v1259_v13, %v1266_v14 }
 0x244   : > { %v869_v24 = vcombine.low %v826_v3, %v832_v16  ;;  %v870_v25 = vcombine.high %v826_v3, %v832_v16  ;;  %v885_v26 = vcombine.low %v829_v4, %v835_v17  ;;  %v886_v27 = vcombine.high %v829_v4, %v835_v17 }
 0x245   : > { %v1290_v31 = vrot.slane %v6345_v20, %v8126_v56  ;;  %v1306_v33 = vrot.slane %v6347_v21, %v8126_v56  ;;  %v1322_v34 = vrot.slane %v6349_v22, %v8126_v56  ;;  %v1338_v42 = vrot.slane %v6351_v23, %v8126_v56 }
 0x246   : > { %v877_v37 = vrot.slane %v869_v24, %v8126_v56  ;;  %v884_v38 = vrot.slane %v870_v25, %v8126_v56  ;;  %v893_v39 = vrot.slane %v885_v26, %v8126_v56  ;;  %v900_v40 = vrot.slane %v886_v27, %v8126_v56 }
 0x247   : > { %v1355_v46 = vcombine.low %v1290_v31, %v1306_v33  ;;  %v1403_v51 = vcombine.low %v1347_v43, %v1379_v45  ;;  %v1387_v4 = vcombine.low %v1322_v34, %v1338_v42  ;;  %v1101_v12 = vcombine.low %v1045_v52, %v1077_v53 }
 0x248   : > { %v933_v47 = vcombine.low %v877_v37, %v893_v39  ;;  %v934_v48 = vcombine.high %v877_v37, %v893_v39  ;;  %v949_v49 = vcombine.low %v884_v38, %v900_v40  ;;  %v950_v50 = vcombine.high %v884_v38, %v900_v40 }
 0x249   : > { %v1411_v59 = vpack.c.bf16 %v1403_v51, %v1403_v51  ;;  %v8206_v3 = vrot.slane %v1355_v46, %v8129_v63  ;;  %v1404_v13 = vcombine.high %v1347_v43, %v1379_v45  ;;  %v8210_v14 = vrot.slane %v1387_v4, %v8129_v63 }
 0x24a   : > { %v941_v54 = vrot.slane %v933_v47, %v8129_v63  ;;  %v948_v55 = vrot.slane %v934_v48, %v8129_v63  ;;  %v957_v57 = vrot.slane %v949_v49, %v8129_v63  ;;  %v964_v58 = vrot.slane %v950_v50, %v8129_v63 }
 0x24b   : > { %v1726_v11 = vsel %vm1721_vm1, %v1411_v59, 0  ;;  %v1407_v19 = vcombine.low %v8206_v3, %v8210_v14  ;;  %v1340_v20 = vcombine.high %v8146_v35, %v8149_v36  ;;  %v1372_v21 = vcombine.high %v8160_v60, %v8163_v61 }
 0x24c   : > { %v6337_v5 = vcombine.low %v941_v54, %v948_v55  ;;  %v6339_v6 = vcombine.high %v941_v54, %v948_v55  ;;  %v6341_v7 = vcombine.low %v957_v57, %v964_v58  ;;  %v6343_v8 = vcombine.high %v957_v57, %v964_v58  ;;  %6705 = vmatpush3.bf16.xpose.msra.mxu1 %v1726_v11 }
 0x24d   : > { %6710 = vmatprep.subr.bf16.mxu1 %v7715_v1  ;;  %v1356_v22 = vcombine.high %v1290_v31, %v1306_v33  ;;  %v1412_v25 = vpack.c.bf16 %v1404_v13, %v1404_v13  ;;  %v1415_v26 = vpack.c.bf16 %v1407_v19, %v1407_v19  ;;  %v1354_v27 = vrot.slane %v1340_v20, %v8129_v63  ;;  %v1421_v19 = vpop.permute.xlu0 %1420 }
 0x24e   : > { %v988_v15 = vrot.slane %v6337_v5, %v8126_v56  ;;  %v1004_v16 = vrot.slane %v6339_v6, %v8126_v56  ;;  %v1020_v17 = vrot.slane %v6341_v7, %v8126_v56  ;;  %v1036_v18 = vrot.slane %v6343_v8, %v8126_v56 }
 0x24f   : > { %v1386_v28 = vrot.slane %v1372_v21, %v8129_v63  ;;  %v1370_v39 = vrot.slane %v1356_v22, %v8129_v63  ;;  %v1388_v40 = vcombine.high %v1322_v34, %v1338_v42  ;;  %v1109_v35 = vpack.c.bf16 %v1101_v12, %v1101_v12  ;;  %v1424_v21 = vpop.permute.xlu1 %1423 }
 0x250   : > { %v1053_v23 = vcombine.low %v988_v15, %v1004_v16  ;;  %v1085_v24 = vcombine.low %v1020_v17, %v1036_v18  ;;  %v1910_v36 = vsel %vm1721_vm1, %v1415_v26, 0  ;;  %v1054_v31 = vcombine.high %v988_v15, %v1004_v16 }
 0x251   : > { %6729 = vmatpush3.bf16.xpose.msra.mxu0 %v1910_v36  ;;  %v1402_v61 = vrot.slane %v1388_v40, %v8129_v63  ;;  %v1086_v33 = vcombine.high %v1020_v17, %v1036_v18  ;;  %v1772_v43 = vsel %vm1721_vm1, %v1412_v25, 0  ;;  %v1405_v45 = vcombine.low %v1354_v27, %v1386_v28  ;;  %v1427_v20 = vpop.permute.xlu0 %1426 }
 0x252   : > { %v1061_v37 = vrot.slane %v1053_v23, %v8129_v63  ;;  %v1093_v38 = vrot.slane %v1085_v24, %v8129_v63  ;;  %6740 = vmatprep.subr.bf16.mxu0 %v7715_v1  ;;  %v1038_v42 = vcombine.high %v8166_v62, %v8169_v2  ;;  %v1070_v46 = vcombine.high %v8172_v9, %v8175_v10 }
 0x253   : > { %6707 = vmatmul.mubr.msk.bf16.vlgmr.msra.gmra.mxu1 %vm1721_vm1, %v1109_v35  ;;  %v1409_v34 = vcombine.low %v1370_v39, %v1402_v61  ;;  %v1102_v47 = vcombine.high %v1045_v52, %v1077_v53  ;;  %v1413_v50 = vpack.c.bf16 %v1405_v45, %v1405_v45  ;;  %v1068_v51 = vrot.slane %v1054_v31, %v8129_v63 }
 0x254   : > { %v1105_v60 = vcombine.low %v1061_v37, %v1093_v38  ;;  %6711 = vmatpush3.bf16.xpose.msra.mxu1 %v1772_v43  ;;  %6712 = vmatprep.mubr.msk.bf16.mxu1 %vm7716_vm0, %v7715_v1  ;;  %v1100_v54 = vrot.slane %v1086_v33, %v8129_v63  ;;  %v1052_v62 = vrot.slane %v1038_v42, %v8129_v63 }
 0x255   : > { %6716 = vmatprep.subr.bf16.mxu1 %v7715_v1  ;;  %v1417_v49 = vpack.c.bf16 %v1409_v34, %v1409_v34  ;;  %v1110_v55 = vpack.c.bf16 %v1102_v47, %v1102_v47  ;;  %v1084_v2 = vrot.slane %v1070_v46, %v8129_v63  ;;  %v1818_v9 = vsel %vm1721_vm1, %v1413_v50, 0 }
 0x256   : > { %v1113_v48 = vpack.c.bf16 %v1105_v60, %v1105_v60  ;;  %v1406_v10 = vcombine.high %v1354_v27, %v1386_v28  ;;  %v1107_v52 = vcombine.low %v1068_v51, %v1100_v54  ;;  %v1408_v6 = vcombine.high %v8206_v3, %v8210_v14 }
 0x257   : > { %v2002_v57 = vsel %vm1721_vm1, %v1417_v49, 0  ;;  %v1103_v53 = vcombine.low %v1052_v62, %v1084_v2  ;;  %v1104_v7 = vcombine.high %v1052_v62, %v1084_v2  ;;  %v1410_v13 = vcombine.high %v1370_v39, %v1402_v61 }
 0x258   : > { %6731 = vmatmul.mubr.msk.bf16.vlgmr.msra.gmra.mxu0 %vm1721_vm1, %v1113_v48  ;;  %v1414_v58 = vpack.c.bf16 %v1406_v10, %v1406_v10  ;;  %v1115_v59 = vpack.c.bf16 %v1107_v52, %v1107_v52  ;;  %v1416_v8 = vpack.c.bf16 %v1408_v6, %v1408_v6  ;;  %v1106_v15 = vcombine.high %v1061_v37, %v1093_v38 }
 0x259   : > { %6741 = vmatpush3.bf16.xpose.msra.mxu0 %v2002_v57  ;;  %6742 = vmatprep.mubr.msk.bf16.mxu0 %vm7716_vm0, %v7715_v1  ;;  %v1111_v4 = vpack.c.bf16 %v1103_v53, %v1103_v53  ;;  %v1112_v11 = vpack.c.bf16 %v1104_v7, %v1104_v7  ;;  %v1418_v3 = vpack.c.bf16 %v1410_v13, %v1410_v13 }
 0x25a   : > { %6752 = vmatprep.subr.bf16.mxu0 %v7715_v1  ;;  %v1864_v5 = vsel %vm1721_vm1, %v1414_v58, 0  ;;  %v1956_v12 = vsel %vm1721_vm1, %v1416_v8, 0  ;;  %v1114_v14 = vpack.c.bf16 %v1106_v15, %v1106_v15  ;;  %v1108_v17 = vcombine.high %v1068_v51, %v1100_v54 }
 0x25b   : > { %6713 = vmatmul.mubr.msk.bf16.vlgmr.msra.gmra.mxu1 %vm1721_vm1, %v1110_v55  ;;  %v2048_v16 = vsel %vm1721_vm1, %v1418_v3, 0  ;;  %v1457_v22 = vcombine.low %v1421_v19, %v1427_v20  ;;  %v1458_v23 = vcombine.high %v1421_v19, %v1427_v20  ;;  %v1441_v24 = vcombine.low %v8113_v44, %v1424_v21 }
 0x25c   : > { %6717 = vmatpush3.bf16.xpose.msra.mxu1 %v1818_v9  ;;  %6718 = vmatprep.mubr.msk.bf16.mxu1 %vm7716_vm0, %v7715_v1  ;;  %v1116_v18 = vpack.c.bf16 %v1108_v17, %v1108_v17  ;;  %v1442_v25 = vcombine.high %v8113_v44, %v1424_v21 }
 0x25d   : > { %6722 = vmatprep.subr.bf16.mxu1 %v7715_v1  ;;  %v1465_v26 = vrot.slane %v1457_v22, %v8126_v56  ;;  %v1472_v27 = vrot.slane %v1458_v23, %v8126_v56  ;;  %v1449_v28 = vrot.slane %v1441_v24, %v8126_v56 }
 0x25e   : > { %v1456_v37 = vrot.slane %v1442_v25, %v8126_v56 }
 0x25f   : > { %v1505_v38 = vcombine.low %v1449_v28, %v1465_v26  ;;  %v1506_v39 = vcombine.high %v1449_v28, %v1465_v26 }
 0x260   : > { %6743 = vmatmul.mubr.msk.bf16.vlgmr.msra.gmra.mxu0 %vm1721_vm1, %v1115_v59  ;;  %v1521_v40 = vcombine.low %v1456_v37, %v1472_v27  ;;  %v1522_v35 = vcombine.high %v1456_v37, %v1472_v27 }
 0x261   : > { %6754 = vmatprep.mubr.msk.bf16.mxu0 %vm7716_vm0, %v7715_v1  ;;  %v1513_v36 = vrot.slane %v1505_v38, %v8129_v63  ;;  %v1520_v60 = vrot.slane %v1506_v39, %v8129_v63 }
 0x262   : > { %v1529_v61 = vrot.slane %v1521_v40, %v8129_v63  ;;  %v1536_v31 = vrot.slane %v1522_v35, %v8129_v63 }
 0x263   : > { %6719 = vmatmul.mubr.msk.bf16.vlgmr.msra.gmra.mxu1 %vm1721_vm1, %v1111_v4  ;;  %v6352_v33 = vcombine.low %v1513_v36, %v1520_v60  ;;  %v6354_v43 = vcombine.high %v1513_v36, %v1520_v60 }
 0x264   : > { %6723 = vmatpush3.bf16.xpose.msra.mxu1 %v1864_v5  ;;  %6724 = vmatprep.mubr.msk.bf16.mxu1 %vm7716_vm0, %v7715_v1  ;;  %v6356_v45 = vcombine.low %v1529_v61, %v1536_v31  ;;  %v6358_v34 = vcombine.high %v1529_v61, %v1536_v31 }
 0x265   : > { %6734 = vmatprep.subr.bf16.mxu1 %v7715_v1  ;;  %v1585_v42 = vrot.slane %v6352_v33, %v8126_v56  ;;  %v1601_v46 = vrot.slane %v6354_v43, %v8126_v56 }
 0x266   : > { %v1617_v47 = vrot.slane %v6356_v45, %v8126_v56  ;;  %v1633_v48 = vrot.slane %v6358_v34, %v8126_v56 }
 0x267   : > { %v1641_v49 = vcombine.low %v1585_v42, %v1601_v46  ;;  %v1642_v51 = vcombine.high %v1585_v42, %v1601_v46 }
 0x268   : > { %v1673_v50 = vcombine.low %v1617_v47, %v1633_v48  ;;  %v1674_v54 = vcombine.high %v1617_v47, %v1633_v48 }
 0x269   : > { %v1649_v55 = vrot.slane %v1641_v49, %v8129_v63  ;;  %v1656_v62 = vrot.slane %v1642_v51, %v8129_v63 }
 0x26a   : > { %v1681_v57 = vrot.slane %v1673_v50, %v8129_v63  ;;  %v1688_v2 = vrot.slane %v1674_v54, %v8129_v63  ;;  %v8324_v50 = vpop.permute.xlu0 %1429 }
 0x26b   : > { %6725 = vmatmul.mubr.msk.bf16.vlgmr.msra.gmra.mxu1 %vm1721_vm1, %v1112_v11 }
 0x26c   : > { %6735 = vmatpush3.bf16.xpose.msra.mxu1 %v1956_v12  ;;  %6736 = vmatprep.mubr.msk.bf16.mxu1 %vm7716_vm0, %v7715_v1  ;;  %v1705_v9 = vcombine.low %v1649_v55, %v1681_v57  ;;  %v1706_v10 = vcombine.high %v1649_v55, %v1681_v57  ;;  %v8295_v52 = vcombine.low %v1656_v62, %v1688_v2  ;;  %v1433_v57 = vpop.permute.xlu1 %1432 }
 0x26d   : > { %6746 = vmatprep.subr.bf16.mxu1 %v7715_v1  ;;  %v8297_v53 = vcombine.high %v1656_v62, %v1688_v2 }
 0x26e   : > { %v1713_v58 = vpack.c.bf16 %v1705_v9, %v1705_v9  ;;  %v1714_v59 = vpack.c.bf16 %v1706_v10, %v1706_v10 }
 0x270   : > { %v2176_v4 = vsel %vm2174_vm2, %v1713_v58, 0  ;;  %v2222_v5 = vsel %vm2174_vm2, %v1714_v59, 0 }
 0x271   : > { %6753 = vmatpush3.bf16.msra.mxu0 %v2176_v4 }
 0x272   : > { %6764 = vmatprep.subr.bf16.mxu0 %v7715_v1 }
 0x273   : > { %6737 = vmatmul.mubr.msk.bf16.vlgmr.msra.gmra.mxu1 %vm1721_vm1, %v1114_v14 }
 0x274   : > { %6747 = vmatpush3.bf16.xpose.msra.mxu1 %v2048_v16  ;;  %6748 = vmatprep.mubr.msk.bf16.mxu1 %vm7716_vm0, %v7715_v1 }
 0x275   : > { %6758 = vmatprep.subr.bf16.mxu1 %v7715_v1 }
 0x27b   : > { %6749 = vmatmul.mubr.msk.bf16.vlgmr.msra.gmra.mxu1 %vm1721_vm1, %v1116_v18 }
 0x27c   : > { %6760 = vmatprep.mubr.msk.bf16.mxu1 %vm7716_vm0, %v7715_v1  ;;  %6759 = vmatpush3.bf16.msra.mxu1 %v2222_v5  ;;  %v1715_v5 = vpack.c.bf16 %v8295_v52, %v8295_v52 }
 0x27d   : > { %6770 = vmatprep.subr.bf16.mxu1 %v7715_v1 }
 0x313   : > { %v1762_v6 = vpop.f32.mrf.mxu1 }
 0x314   : > { %v2091_v7 = vsel %vm2090_vm3, %v1762_v6, -inf }
 0x315   : > { %2092 = vmax.xlane.f32.xlu0 %v2091_v7  ;;  %v6708_v8 = vpop.f32.mrf.mxu1 }
 0x317   : > { %v1765_v11 = vpop.f32.mrf.mxu1 }
 0x318   : > { %v1946_v13 = vpop.f32.mrf.mxu0 }
 0x319   : > { %v6709_v12 = vpop.f32.mrf.mxu1  ;;  %v2103_v15 = vsel %vm2090_vm3, %v1946_v13, -inf }
 0x31a   : > { %2104 = vmax.xlane.f32.xlu0 %v2103_v15  ;;  %v6732_v14 = vpop.f32.mrf.mxu0  ;;  %v2268_v12 = vsel %vm2174_vm2, %v1715_v5, 0 }
 0x31b   : > { %v1808_v3 = vpop.f32.mrf.mxu1 }
 0x31c   : > { %v2094_v16 = vsel %vm2090_vm3, %v1808_v3, -inf  ;;  %v1949_v18 = vpop.f32.mrf.mxu0 }
 0x31d   : > { %2095 = vmax.xlane.f32.xlu1 %v2094_v16  ;;  %v6714_v17 = vpop.f32.mrf.mxu1 }
 0x31e   : > { %v6733_v20 = vpop.f32.mrf.mxu0 }
 0x31f   : > { %v1811_v19 = vpop.f32.mrf.mxu1 }
 0x320   : > { %v8306_v22 = vpop.f32.mrf.mxu0 }
 0x321   : > { %v6715_v21 = vpop.f32.mrf.mxu1  ;;  %v2109_v49 = vsel %vm2090_vm3, %v8306_v22, -inf }
 0x322   : > { %v6744_v24 = vpop.f32.mrf.mxu0 }
 0x323   : > { %v1854_v23 = vpop.f32.mrf.mxu1 }
 0x324   : > { %v2097_v25 = vsel %vm2090_vm3, %v1854_v23, -inf  ;;  %v2041_v27 = vpop.f32.mrf.mxu0 }
 0x325   : > { %2098 = vmax.xlane.f32.xlu1 %v2097_v25  ;;  %v6720_v26 = vpop.f32.mrf.mxu1 }
 0x326   : > { %v6745_v37 = vpop.f32.mrf.mxu0 }
 0x327   : > { %v1857_v28 = vpop.f32.mrf.mxu1 }
 0x329   : > { %v6721_v38 = vpop.f32.mrf.mxu1 }
 0x32b   : > { %v1900_v39 = vpop.f32.mrf.mxu1 }
 0x32c   : > { %v2100_v40 = vsel %vm2090_vm3, %v1900_v39, -inf }
 0x32d   : > { %v6726_v35 = vpop.f32.mrf.mxu1  ;;  %2101 = vmax.xlane.f32.xlu0 %v2100_v40 }
 0x32f   : > { %v1903_v36 = vpop.f32.mrf.mxu1 }
 0x331   : > { %v6727_v60 = vpop.f32.mrf.mxu1 }
 0x333   : > { %v8310_v61 = vpop.f32.mrf.mxu1 }
 0x334   : > { %v2106_v31 = vsel %vm2090_vm3, %v8310_v61, -inf }
 0x335   : > { %2107 = vmax.xlane.f32.xlu1 %v2106_v31  ;;  %v6738_v33 = vpop.f32.mrf.mxu1 }
 0x337   : > { %v1995_v43 = vpop.f32.mrf.mxu1 }
 0x339   : > { %v6739_v45 = vpop.f32.mrf.mxu1 }
 0x33b   : > { %v8314_v34 = vpop.f32.mrf.mxu1 }
 0x33c   : > { %v2112_v48 = vsel %vm2090_vm3, %v8314_v34, -inf }
 0x33d   : > { %v6750_v42 = vpop.f32.mrf.mxu1 }
 0x33f   : > { %v2087_v46 = vpop.f32.mrf.mxu1 }
 0x341   : > { %v6751_v47 = vpop.f32.mrf.mxu1 }
 0x343   : > { %1438 = vrot.lane.b32.xlu0 %v8113_v44, %s7723_s6 }
 0x346   : > { %1435 = vrot.lane.b32.xlu1 %v8113_v44, %s7722_s2 }
 0x362   : > { %2113 = vmax.xlane.f32.xlu0 %v2112_v48 }
 0x36a   : > { %2110 = vmax.xlane.f32.xlu1 %v2109_v49 }
 0x39e   : > { %v2093_v51 = vpop.xlane.xlu0 %2092 }
 0x39f   : > { %v2115_v54 = vsub.f32 %v1762_v6, %v2093_v51 }
 0x3a1   : > { %v2123_v55 = vmul.f32 1.442695, %v2115_v54 }
 0x3a3   : > { %7268 = vpow2.f32 %v2123_v55  ;;  %v2105_v62 = vpop.xlane.xlu0 %2104 }
 0x3a4   : > { %v2119_v2 = vsub.f32 %v1946_v13, %v2105_v62 }
 0x3a6   : > { %v2096_v9 = vpop.xlane.xlu1 %2095  ;;  %v2131_v44 = vmul.f32 1.442695, %v2119_v2 }
 0x3a7   : > { %v2116_v10 = vsub.f32 %v1808_v3, %v2096_v9  ;;  %v1716_v3 = vpack.c.bf16 %v8297_v53, %v8297_v53 }
 0x3a8   : > { %7270 = vpow2.f32 %v2131_v44 }
 0x3a9   : > { %v2125_v58 = vmul.f32 1.442695, %v2116_v10  ;;  %v2314_v20 = vsel %vm2174_vm2, %v1716_v3, 0 }
 0x3ab   : > { %7272 = vpow2.f32 %v2125_v58 }
 0x3ae   : > { %v2099_v59 = vpop.xlane.xlu1 %2098 }
 0x3af   : > { %v2117_v4 = vsub.f32 %v1854_v23, %v2099_v59 }
 0x3b0   : > { %v7269_v7 = vpop.eup %7268 }
 0x3b1   : > { %v2127_v8 = vmul.f32 1.442695, %v2117_v4  ;;  %v2139_v6 = vsel %vm2090_vm3, %v7269_v7, 0.0  ;;  %v2163_v11 = vpack.c.bf16 %v7269_v7, %v7269_v7 }
 0x3b2   : > { %2140 = vadd.xlane.f32.xlu0 %v2139_v6 }
 0x3b3   : > { %7274 = vpow2.f32 %v2127_v8  ;;  %6755 = vmatmul.mubr.msk.bf16.vlgmr.msra.gmra.mxu0 %vm2090_vm3, %v2163_v11 }
 0x3b4   : > { %6765 = vmatpush3.bf16.msra.mxu0 %v2268_v12  ;;  %6766 = vmatprep.mubr.msk.bf16.mxu0 %vm7716_vm0, %v7715_v1 }
 0x3b5   : > { %6776 = vmatprep.subr.bf16.mxu0 %v7715_v1  ;;  %v8334_v13 = vpop.eup %7270 }
 0x3b6   : > { %v2102_v52 = vpop.xlane.xlu0 %2101  ;;  %v2151_v14 = vsel %vm2090_vm3, %v8334_v13, 0.0 }
 0x3b7   : > { %v2118_v15 = vsub.f32 %v1900_v39, %v2102_v52  ;;  %2152 = vadd.xlane.f32.xlu0 %v2151_v14 }
 0x3b8   : > { %v7273_v16 = vpop.eup %7272 }
 0x3b9   : > { %v2129_v17 = vmul.f32 1.442695, %v2118_v15  ;;  %v2142_v18 = vsel %vm2090_vm3, %v7273_v16, 0.0  ;;  %v2164_v19 = vpack.c.bf16 %v7273_v16, %v7273_v16 }
 0x3ba   : > { %2143 = vadd.xlane.f32.xlu1 %v2142_v18  ;;  %v1439_v53 = vpop.permute.xlu0 %1438 }
 0x3bb   : > { %7276 = vpow2.f32 %v2129_v17  ;;  %6761 = vmatmul.mubr.msk.bf16.vlgmr.msra.gmra.mxu1 %vm2090_vm3, %v2164_v19  ;;  %v1489_v25 = vcombine.low %v1433_v57, %v1439_v53  ;;  %v1490_v26 = vcombine.high %v1433_v57, %v1439_v53 }
 0x3bc   : > { %6771 = vmatpush3.bf16.msra.mxu1 %v2314_v20  ;;  %6772 = vmatprep.mubr.msk.bf16.mxu1 %vm7716_vm0, %v7715_v1 }
 0x3bd   : > { %6782 = vmatprep.subr.bf16.mxu1 %v7715_v1  ;;  %v1497_v35 = vrot.slane %v1489_v25, %v8126_v56  ;;  %v1504_v36 = vrot.slane %v1490_v26, %v8126_v56 }
 0x3be   : > { %v2108_v21 = vpop.xlane.xlu1 %2107 }
 0x3bf   : > { %v2120_v23 = vsub.f32 %v8310_v61, %v2108_v21 }
 0x3c0   : > { %v7275_v24 = vpop.eup %7274 }
 0x3c1   : > { %v2133_v27 = vmul.f32 1.442695, %v2120_v23  ;;  %v2145_v28 = vsel %vm2090_vm3, %v7275_v24, 0.0  ;;  %v2165_v37 = vpack.c.bf16 %v7275_v24, %v7275_v24  ;;  %v2167_v23 = vpack.c.bf16 %v8334_v13, %v8334_v13 }
 0x3c2   : > { %2146 = vadd.xlane.f32.xlu0 %v2145_v28  ;;  %v1436_v38 = vpop.permute.xlu1 %1435 }
 0x3c3   : > { %7278 = vpow2.f32 %v2133_v27  ;;  %v1473_v39 = vcombine.low %v8324_v50, %v1436_v38  ;;  %v1474_v40 = vcombine.high %v8324_v50, %v1436_v38  ;;  %6767 = vmatmul.mubr.msk.bf16.vlgmr.msra.gmra.mxu0 %vm2090_vm3, %v2165_v37 }
 0x3c4   : > { %6778 = vmatprep.mubr.msk.bf16.mxu0 %vm7716_vm0, %v7715_v1 }
 0x3c5   : > { %v1481_v60 = vrot.slane %v1473_v39, %v8126_v56  ;;  %v1488_v61 = vrot.slane %v1474_v40, %v8126_v56 }
 0x3c7   : > { %v1537_v31 = vcombine.low %v1481_v60, %v1497_v35  ;;  %v1538_v33 = vcombine.high %v1481_v60, %v1497_v35  ;;  %v1553_v43 = vcombine.low %v1488_v61, %v1504_v36  ;;  %v1554_v45 = vcombine.high %v1488_v61, %v1504_v36 }
 0x3c8   : > { %v7277_v42 = vpop.eup %7276 }
 0x3c9   : > { %v1545_v46 = vrot.slane %v1537_v31, %v8129_v63  ;;  %v1552_v47 = vrot.slane %v1538_v33, %v8129_v63  ;;  %v1561_v48 = vrot.slane %v1553_v43, %v8129_v63  ;;  %v1568_v49 = vrot.slane %v1554_v45, %v8129_v63 }
 0x3ca   : > { %v2148_v50 = vsel %vm2090_vm3, %v7277_v42, 0.0  ;;  %v2166_v51 = vpack.c.bf16 %v7277_v42, %v7277_v42 }
 0x3cb   : > { %v6353_v54 = vcombine.low %v1545_v46, %v1552_v47  ;;  %v6355_v55 = vcombine.high %v1545_v46, %v1552_v47  ;;  %v6357_v57 = vcombine.low %v1561_v48, %v1568_v49  ;;  %v6359_v62 = vcombine.high %v1561_v48, %v1568_v49  ;;  %2149 = vadd.xlane.f32.xlu1 %v2148_v50 }
 0x3cc   : > { %6773 = vmatmul.mubr.msk.bf16.vlgmr.msra.gmra.mxu1 %vm2090_vm3, %v2166_v51 }
 0x3cd   : > { %v1592_v2 = vrot.slane %v6353_v54, %v8126_v56  ;;  %v1608_v9 = vrot.slane %v6355_v55, %v8126_v56  ;;  %v1624_v10 = vrot.slane %v6357_v57, %v8126_v56  ;;  %v1640_v44 = vrot.slane %v6359_v62, %v8126_v56  ;;  %6784 = vmatprep.mubr.msk.bf16.mxu1 %vm7716_vm0, %v7715_v1 }
 0x3cf   : > { %v1657_v58 = vcombine.low %v1592_v2, %v1608_v9  ;;  %v1689_v59 = vcombine.low %v1624_v10, %v1640_v44  ;;  %v1658_v4 = vcombine.high %v1592_v2, %v1608_v9  ;;  %v1690_v5 = vcombine.high %v1624_v10, %v1640_v44 }
 0x3d0   : > { %v7279_v7 = vpop.eup %7278 }
 0x3d1   : > { %v2154_v8 = vsel %vm2090_vm3, %v7279_v7, 0.0  ;;  %v1665_v6 = vrot.slane %v1657_v58, %v8129_v63  ;;  %v1697_v11 = vrot.slane %v1689_v59, %v8129_v63  ;;  %v1672_v12 = vrot.slane %v1658_v4, %v8129_v63 }
 0x3d2   : > { %2155 = vadd.xlane.f32.xlu1 %v2154_v8  ;;  %v1704_v52 = vrot.slane %v1690_v5, %v8129_v63  ;;  %v2168_v24 = vpack.c.bf16 %v7279_v7, %v7279_v7 }
 0x3d3   : > { %v1709_v15 = vcombine.low %v1665_v6, %v1697_v11  ;;  %v1710_v3 = vcombine.high %v1665_v6, %v1697_v11 }
 0x3d4   : > { %v1711_v14 = vcombine.low %v1672_v12, %v1704_v52  ;;  %v1712_v16 = vcombine.high %v1672_v12, %v1704_v52 }
 0x3d5   : > { %v1717_v17 = vpack.c.bf16 %v1709_v15, %v1709_v15  ;;  %v1718_v18 = vpack.c.bf16 %v1710_v3, %v1710_v3 }
 0x3d6   : > { %v1719_v53 = vpack.c.bf16 %v1711_v14, %v1711_v14  ;;  %v1720_v21 = vpack.c.bf16 %v1712_v16, %v1712_v16 }
 0x3d7   : > { %v2360_v19 = vsel %vm2174_vm2, %v1717_v17, 0  ;;  %v2406_v20 = vsel %vm2174_vm2, %v1718_v18, 0 }
 0x3d8   : > { %6777 = vmatpush3.bf16.msra.mxu0 %v2360_v19  ;;  %6783 = vmatpush3.bf16.msra.mxu1 %v2406_v20  ;;  %v2452_v25 = vsel %vm2174_vm2, %v1719_v53, 0  ;;  %v2498_v26 = vsel %vm2174_vm2, %v1720_v21, 0 }
 0x3d9   : > { %6788 = vmatprep.subr.bf16.mxu0 %v7715_v1  ;;  %6794 = vmatprep.subr.bf16.mxu1 %v7715_v1 }
 0x3db   : > { %6779 = vmatmul.mubr.msk.bf16.vlgmr.msra.gmra.mxu0 %vm2090_vm3, %v2167_v23  ;;  %6785 = vmatmul.mubr.msk.bf16.vlgmr.msra.gmra.mxu1 %vm2090_vm3, %v2168_v24 }
 0x3dc   : > { %6789 = vmatpush3.bf16.msra.mxu0 %v2452_v25  ;;  %6795 = vmatpush3.bf16.msra.mxu1 %v2498_v26 }
 0x3dd   : > { %6796 = vmatprep.mubr.msk.bf16.mxu1 %vm7716_vm0, %v7715_v1  ;;  %6790 = vmatprep.mubr.msk.bf16.mxu0 %vm7716_vm0, %v7715_v1 }
 0x3de   : > { %6800 = vmatprep.subr.bf16.mxu0 %v7715_v1  ;;  %6820 = vmatprep.subr.bf16.mxu1 %v7715_v1 }
 0x3eb   : > { %v2114_v13 = vpop.xlane.xlu0 %2113 }
 0x3ec   : > { %v2122_v27 = vsub.f32 %v8314_v34, %v2114_v13 }
 0x3ee   : > { %v2137_v28 = vmul.f32 1.442695, %v2122_v27 }
 0x3f0   : > { %7280 = vpow2.f32 %v2137_v28 }
 0x3f3   : > { %v2111_v37 = vpop.xlane.xlu1 %2110 }
 0x3f4   : > { %v2121_v38 = vsub.f32 %v8306_v22, %v2111_v37 }
 0x3f6   : > { %v2135_v39 = vmul.f32 1.442695, %v2121_v38 }
 0x3f8   : > { %7282 = vpow2.f32 %v2135_v39  ;;  %v7140_v39 = vld [vmem:[#allocation8 + $0x38] sm:$0xff]  }
 0x3fd   : > { %v7281_v40 = vpop.eup %7280 }
 0x3fe   : > { %v2160_v35 = vsel %vm2090_vm3, %v7281_v40, 0.0  ;;  %v2170_v36 = vpack.c.bf16 %v7281_v40, %v7281_v40 }
 0x3ff   : > { %2161 = vadd.xlane.f32.xlu1 %v2160_v35 }
 0x400   : > { %6797 = vmatmul.mubr.msk.bf16.vlgmr.msra.gmra.mxu1 %vm2090_vm3, %v2170_v36 }
 0x401   : > { %6836 = vmatprep.mubr.msk.bf16.mxu1 %vm7716_vm0, %v7715_v1 }
 0x405   : > { %v7283_v60 = vpop.eup %7282 }
 0x406   : > { %v2157_v34 = vsel %vm2090_vm3, %v7283_v60, 0.0  ;;  %v2169_v61 = vpack.c.bf16 %v7283_v60, %v7283_v60 }
 0x407   : > { %2158 = vadd.xlane.f32.xlu0 %v2157_v34  ;;  %v7141_v34 = vld [vmem:[#allocation8 + $0x30] sm:$0xff]  }
 0x408   : > { %6791 = vmatmul.mubr.msk.bf16.vlgmr.msra.gmra.mxu0 %vm2090_vm3, %v2169_v61 }
 0x409   : > { %6816 = vmatprep.mubr.msk.bf16.mxu0 %vm7716_vm0, %v7715_v1  ;;  %6801 = vmatpush3.bf16.msra.mxu0 %v7140_v39 }
 0x40a   : > { %6802 = vmatprep.subr.bf16.mxu0 %v7715_v1 }
 0x40d   : > { %6803 = vmatpush3.bf16.msra.mxu0 %v7141_v34 }
 0x40e   : > { %6804 = vmatprep.subr.bf16.mxu0 %v7715_v1 }
 0x43b   : > { %v2141_v22 = vpop.xlane.xlu0 %2140 }
 0x440   : > { %v8400_v31 = vpop.xlane.xlu0 %2152 }
 0x443   : > { %v2144_v42 = vpop.xlane.xlu1 %2143 }
 0x44b   : > { %v2147_v46 = vpop.xlane.xlu0 %2146 }
 0x44c   : > { %7284 = vrcp.f32 %v2147_v46 }
 0x44d   : > { %7286 = vrcp.f32 %v2141_v22 }
 0x44e   : > { %7288 = vrcp.f32 %v2144_v42 }
 0x454   : > { %v2150_v49 = vpop.xlane.xlu1 %2149 }
 0x455   : > { %7290 = vrcp.f32 %v2150_v49 }
 0x459   : > { %v7285_v2 = vpop.eup %7284 }
 0x45a   : > { %v7287_v44 = vpop.eup %7286 }
 0x45b   : > { %v7289_v58 = vpop.eup %7288 }
 0x462   : > { %v7291_v4 = vpop.eup %7290 }
 0x473   : > { %v2212_v33 = vpop.f32.mrf.mxu0 }
 0x474   : > { %v2548_v59 = vmul.f32 %v7287_v44, %v2212_v33 }
 0x475   : > { %v6756_v43 = vpop.f32.mrf.mxu0 }
 0x477   : > { %v2215_v45 = vpop.f32.mrf.mxu0 }
 0x479   : > { %v6757_v47 = vpop.f32.mrf.mxu0 }
 0x47b   : > { %v2258_v48 = vpop.f32.mrf.mxu1 }
 0x47c   : > { %v2549_v7 = vmul.f32 %v7289_v58, %v2258_v48  ;;  %v7143_v58 = vld [vmem:[#allocation8 + $0x20] sm:$0xff]  }
 0x47d   : > { %v6762_v50 = vpop.f32.mrf.mxu1 }
 0x47f   : > { %v2261_v51 = vpop.f32.mrf.mxu1 }
 0x481   : > { %v6763_v54 = vpop.f32.mrf.mxu1 }
 0x482   : > { %v7142_v54 = vld [vmem:[#allocation8 + $0x28] sm:$0xff]  }
 0x483   : > { %v2304_v55 = vpop.f32.mrf.mxu0  ;;  %6805 = vmatpush3.bf16.msra.mxu0 %v7142_v54 }
 0x484   : > { %v2550_v9 = vmul.f32 %v7285_v2, %v2304_v55  ;;  %6806 = vmatprep.subr.bf16.mxu0 %v7715_v1 }
 0x485   : > { %v6768_v57 = vpop.f32.mrf.mxu0 }
 0x486   : > { %v2556_v8 = vcombine.low %v2548_v59, %v2550_v9  ;;  %v2557_v6 = vcombine.high %v2548_v59, %v2550_v9 }
 0x487   : > { %v2307_v62 = vpop.f32.mrf.mxu0  ;;  %6807 = vmatpush3.bf16.msra.mxu0 %v7143_v58 }
 0x488   : > { %v2564_v14 = vrot.slane %v2556_v8, %v8126_v56  ;;  %v2571_v16 = vrot.slane %v2557_v6, %v8126_v56  ;;  %6808 = vmatprep.subr.bf16.mxu0 %v7715_v1 }
 0x489   : > { %v6769_v10 = vpop.f32.mrf.mxu0 }
 0x48c   : > { %v2350_v5 = vpop.f32.mrf.mxu1 }
 0x48d   : > { %v2551_v11 = vmul.f32 %v7291_v4, %v2350_v5  ;;  %v7144_v4 = vld [vmem:[#allocation8 + $0x18] sm:$0xff]   ;;  %v7145_v5 = vld [vmem:[#allocation8 + $0x10] sm:$0xff]  }
 0x48e   : > { %v6774_v12 = vpop.f32.mrf.mxu1  ;;  %6809 = vmatpush3.bf16.msra.mxu0 %v7144_v4 }
 0x48f   : > { %v2572_v52 = vcombine.low %v2549_v7, %v2551_v11  ;;  %v2573_v15 = vcombine.high %v2549_v7, %v2551_v11  ;;  %6810 = vmatprep.subr.bf16.mxu0 %v7715_v1  ;;  %v2156_v7 = vpop.xlane.xlu1 %2155 }
 0x490   : > { %v2353_v3 = vpop.f32.mrf.mxu1  ;;  %v2159_v6 = vpop.xlane.xlu0 %2158 }
 0x491   : > { %v2580_v17 = vrot.slane %v2572_v52, %v8126_v56  ;;  %v2587_v18 = vrot.slane %v2573_v15, %v8126_v56 }
 0x492   : > { %v6775_v19 = vpop.f32.mrf.mxu1  ;;  %6811 = vmatpush3.bf16.msra.mxu0 %v7145_v5 }
 0x493   : > { %v2620_v20 = vcombine.low %v2564_v14, %v2580_v17  ;;  %v2621_v53 = vcombine.high %v2564_v14, %v2580_v17  ;;  %v2636_v21 = vcombine.low %v2571_v16, %v2587_v18  ;;  %v2637_v23 = vcombine.high %v2571_v16, %v2587_v18  ;;  %6812 = vmatprep.subr.bf16.mxu0 %v7715_v1  ;;  %v2162_v8 = vpop.xlane.xlu1 %2161 }
 0x494   : > { %7292 = vrcp.f32 %v2162_v8 }
 0x495   : > { %v2628_v24 = vrot.slane %v2620_v20, %v8129_v63  ;;  %v2635_v25 = vrot.slane %v2621_v53, %v8129_v63  ;;  %v2644_v26 = vrot.slane %v2636_v21, %v8129_v63  ;;  %v2651_v13 = vrot.slane %v2637_v23, %v8129_v63 }
 0x496   : > { %7294 = vrcp.f32 %v2156_v7 }
 0x497   : > { %v6376_v27 = vcombine.low %v2628_v24, %v2635_v25  ;;  %v6378_v28 = vcombine.high %v2628_v24, %v2635_v25  ;;  %v6380_v37 = vcombine.low %v2644_v26, %v2651_v13  ;;  %v6382_v38 = vcombine.high %v2644_v26, %v2651_v13 }
 0x498   : > { %7296 = vrcp.f32 %v8400_v31 }
 0x499   : > { %v2700_v40 = vrot.slane %v6376_v27, %v8126_v56  ;;  %v2716_v35 = vrot.slane %v6378_v28, %v8126_v56  ;;  %v2732_v36 = vrot.slane %v6380_v37, %v8126_v56  ;;  %v2748_v60 = vrot.slane %v6382_v38, %v8126_v56 }
 0x49a   : > { %7298 = vrcp.f32 %v2159_v6 }
 0x49b   : > { %v2396_v61 = vpop.f32.mrf.mxu0  ;;  %v2442_v22 = vpop.f32.mrf.mxu1  ;;  %v2757_v33 = vcombine.high %v2700_v40, %v2716_v35  ;;  %v2789_v43 = vcombine.high %v2732_v36, %v2748_v60  ;;  %v2756_v45 = vcombine.low %v2700_v40, %v2716_v35  ;;  %v2788_v42 = vcombine.low %v2732_v36, %v2748_v60 }
 0x49d   : > { %v6780_v46 = vpop.f32.mrf.mxu0  ;;  %v6786_v47 = vpop.f32.mrf.mxu1  ;;  %v2771_v48 = vrot.slane %v2757_v33, %v8129_v63  ;;  %v2803_v49 = vrot.slane %v2789_v43, %v8129_v63  ;;  %v8418_v50 = vrot.slane %v2756_v45, %v8129_v63  ;;  %v8421_v51 = vrot.slane %v2788_v42, %v8129_v63  ;;  %v7146_v43 = vld [vmem:[#allocation8 + $0x8] sm:$0xff]  }
 0x49e   : > { %6813 = vmatpush3.bf16.msra.mxu0 %v7146_v43  ;;  %v7157_v43 = vld [vmem:[#allocation11 + $0x40] ss:$8 sps:$4 sm:$0xff]  }
 0x49f   : > { %v2399_v55 = vpop.f32.mrf.mxu0  ;;  %v2445_v57 = vpop.f32.mrf.mxu1  ;;  %v2822_v62 = vcombine.low %v2771_v48, %v2803_v49  ;;  %v2821_v2 = vcombine.high %v8418_v50, %v8421_v51  ;;  %v2820_v9 = vcombine.low %v8418_v50, %v8421_v51  ;;  %v2823_v59 = vcombine.high %v2771_v48, %v2803_v49  ;;  %6814 = vmatprep.subr.bf16.mxu0 %v7715_v1 }
 0x4a0   : > { %v7147_v57 = vld [vmem:[#allocation8] sm:$0xff]  }
 0x4a1   : > { %2833 = vrot.lane.b32.xlu1 %v2822_v62, %s7722_s2  ;;  %2829 = vrot.lane.b32.xlu0 %v2821_v2, %s7723_s6  ;;  %v6781_v10 = vpop.f32.mrf.mxu0  ;;  %v6787_v44 = vpop.f32.mrf.mxu1 }
 0x4a2   : > { %v7293_v52 = vpop.eup %7292  ;;  %6815 = vmatpush3.bf16.msra.mxu0 %v7147_v57  ;;  %v557_v57 = vld [vmem:[%s477_s14] sm:$0xff] }
 0x4a3   : > { %v7295_v14 = vpop.eup %7294 }
 0x4a4   : > { %v2553_v18 = vmul.f32 %v7295_v14, %v2442_v22 }
 0x4a5   : > { %2837 = vrot.lane.b32.xlu1 %v2823_v59, %s7721_s16  ;;  %v7297_v17 = vpop.eup %7296 }
 0x4a6   : > { %v2552_v53 = vmul.f32 %v7297_v17, %v2396_v61 }
 0x4a7   : > { %v7299_v19 = vpop.eup %7298 }
 0x4c0   : > { %v2534_v11 = vpop.f32.mrf.mxu1 }
 0x4c1   : > { %v2555_v3 = vmul.f32 %v7293_v52, %v2534_v11 }
 0x4c2   : > { %v6798_v12 = vpop.f32.mrf.mxu1 }
 0x4c3   : > { %v2604_v21 = vcombine.low %v2553_v18, %v2555_v3  ;;  %v2605_v23 = vcombine.high %v2553_v18, %v2555_v3 }
 0x4c4   : > { %v2537_v15 = vpop.f32.mrf.mxu1 }
 0x4c5   : > { %v2612_v27 = vrot.slane %v2604_v21, %v8126_v56  ;;  %v2619_v28 = vrot.slane %v2605_v23, %v8126_v56  ;;  %v8469_v23 = vsub.s32 3, %v8073_v29 }
 0x4c6   : > { %v6799_v16 = vpop.f32.mrf.mxu1 }
 0x4c8   : > { %v2488_v20 = vpop.f32.mrf.mxu0 }
 0x4c9   : > { %v2554_v24 = vmul.f32 %v7299_v19, %v2488_v20 }
 0x4ca   : > { %v6792_v25 = vpop.f32.mrf.mxu0 }
 0x4cb   : > { %v2588_v26 = vcombine.low %v2552_v53, %v2554_v24  ;;  %v2589_v13 = vcombine.high %v2552_v53, %v2554_v24  ;;  %v8474_v24 = vld [vmem:[%s9008_s10] sm:$0xff] }
 0x4cc   : > { %v2491_v31 = vpop.f32.mrf.mxu0  ;;  %v2889_v25 = vrot.slane %v8474_v24, %v8469_v23 }
 0x4cd   : > { %v2596_v37 = vrot.slane %v2588_v26, %v8126_v56  ;;  %v2603_v38 = vrot.slane %v2589_v13, %v8126_v56 }
 0x4ce   : > { %v6793_v39 = vpop.f32.mrf.mxu0 }
 0x4cf   : > { %v2652_v40 = vcombine.low %v2596_v37, %v2612_v27  ;;  %v2653_v35 = vcombine.high %v2596_v37, %v2612_v27  ;;  %v2668_v36 = vcombine.low %v2603_v38, %v2619_v28  ;;  %v2669_v60 = vcombine.high %v2603_v38, %v2619_v28  ;;  %v7339_v27 = vld [vmem:[%s468_s4] sm:$0xff]  ;;  %v7148_v39 = vld [vmem:[#allocation11 + $0x70] ss:$8 sps:$4 sm:$0xff]  }
 0x4d1   : > { %v2660_v34 = vrot.slane %v2652_v40, %v8129_v63  ;;  %v2667_v61 = vrot.slane %v2653_v35, %v8129_v63  ;;  %v2676_v22 = vrot.slane %v2668_v36, %v8129_v63  ;;  %v2683_v33 = vrot.slane %v2669_v60, %v8129_v63  ;;  %v7150_v40 = vld [vmem:[#allocation11 + $0x74] ss:$8 sps:$4 sm:$0xff]   ;;  %v7153_v35 = vld [vmem:[#allocation11 + $0x64] ss:$8 sps:$4 sm:$0xff]   ;;  %v7151_v36 = vld [vmem:[#allocation11 + $0x60] ss:$8 sps:$4 sm:$0xff]  }
 0x4d2   : > { %3207 = vmatprep.subr.bf16.mxu0 %v7150_v40  ;;  %v7156_v60 = vld [vmem:[#allocation11 + $0x54] ss:$8 sps:$4 sm:$0xff]  }
 0x4d3   : > { %v6377_v45 = vcombine.low %v2660_v34, %v2667_v61  ;;  %v6379_v42 = vcombine.high %v2660_v34, %v2667_v61  ;;  %v6381_v46 = vcombine.low %v2676_v22, %v2683_v33  ;;  %v6383_v47 = vcombine.high %v2676_v22, %v2683_v33  ;;  %v7172_v34 = vld [vmem:[#allocation10 + $0x38] sm:$0xff]   ;;  %v7173_v22 = vld [vmem:[#allocation10 + $0x30] sm:$0xff]   ;;  %v7159_v33 = vld [vmem:[#allocation11 + $0x44] ss:$8 sps:$4 sm:$0xff]  }
 0x4d4   : > { %v7154_v61 = vld [vmem:[#allocation11 + $0x50] ss:$8 sps:$4 sm:$0xff]   ;;  %6821 = vmatpush3.bf16.msra.mxu1 %v7172_v34 }
 0x4d5   : > { %v2707_v48 = vrot.slane %v6377_v45, %v8126_v56  ;;  %v2723_v49 = vrot.slane %v6379_v42, %v8126_v56  ;;  %v2739_v54 = vrot.slane %v6381_v46, %v8126_v56  ;;  %v2755_v55 = vrot.slane %v6383_v47, %v8126_v56  ;;  %6822 = vmatprep.subr.bf16.mxu1 %v7715_v1  ;;  %v7162_v45 = vld [vmem:[#allocation11 + $0x34] ss:$8 sps:$4 sm:$0xff]   ;;  %v7160_v42 = vld [vmem:[#allocation11 + $0x30] ss:$8 sps:$4 sm:$0xff]   ;;  %v7165_v46 = vld [vmem:[#allocation11 + $0x24] ss:$8 sps:$4 sm:$0xff]  }
 0x4d6   : > { %v7163_v47 = vld [vmem:[#allocation11 + $0x20] ss:$8 sps:$4 sm:$0xff]  }
 0x4d7   : > { %v2772_v62 = vcombine.low %v2707_v48, %v2723_v49  ;;  %v2804_v2 = vcombine.low %v2739_v54, %v2755_v55  ;;  %v2773_v10 = vcombine.high %v2707_v48, %v2723_v49  ;;  %v2805_v44 = vcombine.high %v2739_v54, %v2755_v55  ;;  %v7168_v48 = vld [vmem:[#allocation11 + $0x14] ss:$8 sps:$4 sm:$0xff]   ;;  %v7166_v49 = vld [vmem:[#allocation11 + $0x10] ss:$8 sps:$4 sm:$0xff]   ;;  %v7171_v54 = vld [vmem:[#allocation11 + $0x4] ss:$8 sps:$4 sm:$0xff]  }
 0x4d8   : > { %6823 = vmatpush3.bf16.msra.mxu1 %v7173_v22  ;;  %v7169_v55 = vld [vmem:[#allocation11] ss:$8 sps:$4 sm:$0xff]  }
 0x4d9   : > { %v2780_v58 = vrot.slane %v2772_v62, %v8129_v63  ;;  %v2812_v59 = vrot.slane %v2804_v2, %v8129_v63  ;;  %v2787_v7 = vrot.slane %v2773_v10, %v8129_v63  ;;  %v2819_v8 = vrot.slane %v2805_v44, %v8129_v63  ;;  %6824 = vmatprep.subr.bf16.mxu1 %v7715_v1 }
 0x4da   : > { %v3110_v62 = vpack.c.bf16 %v557_v57, %v557_v57 }
 0x4db   : > { %v2825_v4 = vcombine.high %v2780_v58, %v2812_v59  ;;  %v2824_v5 = vcombine.low %v2780_v58, %v2812_v59  ;;  %v2827_v6 = vcombine.high %v2787_v7, %v2819_v8  ;;  %v2826_v11 = vcombine.low %v2787_v7, %v2819_v8  ;;  %v7174_v59 = vld [vmem:[#allocation10 + $0x28] sm:$0xff]   ;;  %v7177_v7 = vld [vmem:[#allocation10 + $0x10] sm:$0xff]  }
 0x4dc   : > { %6825 = vmatpush3.bf16.msra.mxu1 %v7174_v59  ;;  %v7178_v8 = vld [vmem:[#allocation10 + $0x8] sm:$0xff]  }
 0x4dd   : > { %2845 = vrot.lane.b32.xlu1 %v2825_v4, %s7717_s9  ;;  %2841 = vrot.lane.b32.xlu0 %v2824_v5, %s7720_s29  ;;  %v7175_v4 = vld [vmem:[#allocation10 + $0x20] sm:$0xff]   ;;  %v7176_v5 = vld [vmem:[#allocation10 + $0x18] sm:$0xff]  }
 0x4de   : > { %6826 = vmatprep.subr.bf16.mxu1 %v7715_v1 }
 0x4e0   : > { %6827 = vmatpush3.bf16.msra.mxu1 %v7175_v4 }
 0x4e1   : > { %2853 = vrot.lane.b32.xlu1 %v2827_v6, %s7718_s5  ;;  %2849 = vrot.lane.b32.xlu0 %v2826_v11, %s7719_s25  ;;  %v7179_v6 = vld [vmem:[#allocation10] sm:$0xff]   ;;  %v3250_v11 = vsub.s32 5, %v8073_v29 }
 0x4e2   : > { %6828 = vmatprep.subr.bf16.mxu1 %v7715_v1 }
 0x4e4   : > { %6829 = vmatpush3.bf16.msra.mxu1 %v7176_v5 }
 0x4e5   : > { %6830 = vmatprep.subr.bf16.mxu1 %v7715_v1 }
 0x4e8   : > { %6831 = vmatpush3.bf16.msra.mxu1 %v7177_v7 }
 0x4e9   : > { %6832 = vmatprep.subr.bf16.mxu1 %v7715_v1 }
 0x4ec   : > { %6833 = vmatpush3.bf16.msra.mxu1 %v7178_v8 }
 0x4ed   : > { %6834 = vmatprep.subr.bf16.mxu1 %v7715_v1 }
 0x4f0   : > { %6835 = vmatpush3.bf16.msra.mxu1 %v7179_v6 }
 0x4f1   : > { %6840 = vmatprep.subr.bf16.mxu1 %v7715_v1 }
 0x513   : > { %v2834_v12 = vpop.permute.xlu1 %2833  ;;  %v2830_v52 = vpop.permute.xlu0 %2829 }
 0x514   : > { %v2856_v15 = vsel %vm1721_vm1, %v2820_v9, %v2830_v52 }
 0x515   : > { %v2858_v14 = vsel %vm2857_vm4, %v2856_v15, %v2834_v12  ;;  %v3251_v12 = vrot.slane %v8474_v24, %v3250_v11 }
 0x517   : > { %v2838_v3 = vpop.permute.xlu1 %2837 }
 0x518   : > { %v2860_v16 = vsel %vm2859_vm5, %v2858_v14, %v2838_v3 }
 0x54f   : > { %v2842_v17 = vpop.permute.xlu0 %2841  ;;  %v2846_v18 = vpop.permute.xlu1 %2845 }
 0x550   : > { %v2862_v19 = vsel %vm2861_vm6, %v2860_v16, %v2842_v17 }
 0x551   : > { %v2864_v50 = vsel %vm2863_vm7, %v2862_v19, %v2846_v18 }
 0x553   : > { %v2850_v51 = vpop.permute.xlu0 %2849  ;;  %v2854_v9 = vpop.permute.xlu1 %2853 }
 0x554   : > { %v2866_v20 = vsel %vm2865_vm8, %v2864_v50, %v2850_v51  ;;  %v555_v50 = vld [vmem:[%s9008_s10 + $0x8] sm:$0xff] }
 0x555   : > { %v2868_v53 = vsel %vm2867_vm9, %v2866_v20, %v2854_v9  ;;  %v2994_v51 = vrot.slane %v555_v50, %v8076_v30 }
 0x556   : > { %v2869_v21 = vpack.c.bf16 %v2868_v53, %v2868_v53  ;;  %v2999_v53 = vrot.slane %v555_v50, %v8110_v41 }
 0x558   : > { %6817 = vmatmul.mubr.bf16.vlgmr.msra.gmra.mxu0 %v2869_v21 }
 0x559   : > { %3239 = vmatprep.mubr.bf16.mxu0 %v7714_v0  ;;  %3208 = vmatpush1.bf16.msra.mxu0 %v7148_v39 }
 0x55a   : > { %3209 = vmatprep.subr.bf16.mxu0 %v7153_v35 }
 0x55d   : > { %3210 = vmatpush1.bf16.msra.mxu0 %v7151_v36 }
 0x55e   : > { %3211 = vmatprep.subr.bf16.mxu0 %v7156_v60 }
 0x561   : > { %3212 = vmatpush1.bf16.msra.mxu0 %v7154_v61 }
 0x562   : > { %3213 = vmatprep.subr.bf16.mxu0 %v7159_v33 }
 0x565   : > { %3214 = vmatpush1.bf16.msra.mxu0 %v7157_v43 }
 0x566   : > { %3215 = vmatprep.subr.bf16.mxu0 %v7162_v45 }
 0x569   : > { %3216 = vmatpush1.bf16.msra.mxu0 %v7160_v42 }
 0x56a   : > { %3217 = vmatprep.subr.bf16.mxu0 %v7165_v46 }
 0x56d   : > { %3218 = vmatpush1.bf16.msra.mxu0 %v7163_v47 }
 0x56e   : > { %3219 = vmatprep.subr.bf16.mxu0 %v7168_v48 }
 0x571   : > { %3220 = vmatpush1.bf16.msra.mxu0 %v7166_v49 }
 0x572   : > { %3221 = vmatprep.subr.bf16.mxu0 %v7171_v54 }
 0x575   : > { %3222 = vmatpush1.bf16.msra.mxu0 %v7169_v55 }
 0x576   : > { %6864 = vmatprep.subr.bf16.mxu0 %v7715_v1 }
 0x578   : > { %3240 = vmatmul.mubr.bf16.vlgmr.msra.gmra.mxu0 %v3110_v62 }
 0x579   : > { %6866 = vmatprep.mubr.msk.bf16.mxu0 %vm7716_vm0, %v7715_v1 }
 0x618   : > { %v2972_v26 = vpop.f32.mrf.mxu0 }
 0x619   : > { %v2973_v13 = vadd.f32 %v2972_v26, %v2889_v25 }
 0x61a   : > { %v6818_v31 = vpop.f32.mrf.mxu0 }
 0x61b   : > { %v2978_v28 = vadd.f32 %v7339_v27, %v2973_v13 }
 0x61c   : > { %v2975_v37 = vpop.f32.mrf.mxu0 }
 0x61d   : > { %2979 = vadd.xlane.f32.xlu0 %v2978_v28 }
 0x61e   : > { %v6819_v38 = vpop.f32.mrf.mxu0 }
 0x638   : > { %v3241_v52 = vpop.f32.mrf.mxu0 }
 0x639   : > { %v8497_v15 = vadd.f32 %v3251_v12, %v3241_v52 }
 0x63a   : > { %v8499_v3 = vpop.f32.mrf.mxu0 }
 0x63b   : > { %3561 = vrot.lane.b32.xlu0 %v8497_v15, %s7718_s5 }
 0x63c   : > { %v3245_v14 = vpop.f32.mrf.mxu0 }
 0x63e   : > { %v3246_v16 = vpop.f32.mrf.mxu0 }
 0x63f   : > { %3567 = vrot.lane.b32.xlu0 %v8497_v15, %s7717_s9 }
 0x6a6   : > { %v2980_v2 = vpop.xlane.xlu0 %2979 }
 0x6a7   : > { %v2982_v10 = vmul.f32 0.0078125, %v2980_v2 }
 0x6a9   : > { %v2983_v44 = vsub.f32 %v2978_v28, %v2982_v10 }
 0x6ab   : > { %v2984_v58 = vmul.f32 %v2983_v44, %v2983_v44 }
 0x6ad   : > { %2985 = vadd.xlane.f32.xlu1 %v2984_v58  ;;  %v3562_v13 = vpop.permute.xlu0 %3561 }
 0x6b1   : > { %v3568_v37 = vpop.permute.xlu0 %3567 }
 0x6b2   : > { %v3598_v38 = vcombine.low %v3562_v13, %v3568_v37  ;;  %v3599_v39 = vcombine.high %v3562_v13, %v3568_v37 }
 0x6b4   : > { %v3606_v36 = vrot.slane %v3598_v38, %v8126_v56  ;;  %v3613_v60 = vrot.slane %v3599_v39, %v8126_v56 }
 0x6be   : > { %3564 = vrot.lane.b32.xlu1 %v8497_v15, %s7719_s25 }
 0x736   : > { %v2986_v17 = vpop.xlane.xlu1 %2985 }
 0x737   : > { %v2987_v18 = vmul.f32 0.0078125, %v2986_v17 }
 0x739   : > { %v2988_v19 = vadd.f32 1e-05, %v2987_v18  ;;  %v3020_v18 = vsub.s32 4, %v8073_v29 }
 0x73a   : > { %v3565_v31 = vpop.permute.xlu1 %3564 }
 0x73b   : > { %7300 = vrsqrt.f32 %v2988_v19  ;;  %v3582_v27 = vcombine.low %v8497_v15, %v3565_v31  ;;  %v3583_v28 = vcombine.high %v8497_v15, %v3565_v31  ;;  %v3021_v19 = vrot.slane %v8474_v24, %v3020_v18 }
 0x73d   : > { %v3590_v40 = vrot.slane %v3582_v27, %v8126_v56  ;;  %v3597_v35 = vrot.slane %v3583_v28, %v8126_v56 }
 0x73f   : > { %v3646_v34 = vcombine.low %v3590_v40, %v3606_v36  ;;  %v3647_v61 = vcombine.high %v3590_v40, %v3606_v36  ;;  %v3662_v22 = vcombine.low %v3597_v35, %v3613_v60  ;;  %v3663_v33 = vcombine.high %v3597_v35, %v3613_v60 }
 0x741   : > { %v3654_v43 = vrot.slane %v3646_v34, %v8129_v63  ;;  %v3661_v45 = vrot.slane %v3647_v61, %v8129_v63  ;;  %v3670_v42 = vrot.slane %v3662_v22, %v8129_v63  ;;  %v3677_v46 = vrot.slane %v3663_v33, %v8129_v63 }
 0x743   : > { %v6424_v47 = vcombine.low %v3654_v43, %v3661_v45  ;;  %v6426_v48 = vcombine.high %v3654_v43, %v3661_v45  ;;  %v6428_v49 = vcombine.low %v3670_v42, %v3677_v46  ;;  %v6430_v54 = vcombine.high %v3670_v42, %v3677_v46 }
 0x745   : > { %v3726_v55 = vrot.slane %v6424_v47, %v8126_v56  ;;  %v3742_v57 = vrot.slane %v6426_v48, %v8126_v56  ;;  %v3758_v62 = vrot.slane %v6428_v49, %v8126_v56  ;;  %v3774_v2 = vrot.slane %v6430_v54, %v8126_v56 }
 0x747   : > { %v3782_v10 = vcombine.low %v3726_v55, %v3742_v57  ;;  %v3783_v5 = vcombine.high %v3726_v55, %v3742_v57  ;;  %v3815_v7 = vcombine.high %v3758_v62, %v3774_v2 }
 0x748   : > { %v7301_v9 = vpop.eup %7300 }
 0x749   : > { %v2990_v20 = vmul.f32 %v7301_v9, %v2983_v44  ;;  %v3814_v44 = vcombine.low %v3758_v62, %v3774_v2  ;;  %v3790_v58 = vrot.slane %v3782_v10, %v8129_v63  ;;  %v3797_v6 = vrot.slane %v3783_v5, %v8129_v63 }
 0x74a   : > { %v3829_v12 = vrot.slane %v3815_v7, %v8129_v63 }
 0x74b   : > { %v2995_v21 = vmul.f32 %v2994_v51, %v2990_v20  ;;  %v3822_v59 = vrot.slane %v3814_v44, %v8129_v63 }
 0x74c   : > { %v8539_v16 = vcombine.low %v3797_v6, %v3829_v12  ;;  %v8542_v17 = vcombine.high %v3797_v6, %v3829_v12 }
 0x74d   : > { %v8512_v25 = vadd.f32 %v2999_v53, %v2995_v21  ;;  %v3846_v4 = vcombine.low %v3790_v58, %v3822_v59  ;;  %v8537_v14 = vcombine.high %v3790_v58, %v3822_v59  ;;  %v3255_v21 = vsub.s32 6, %v8073_v29 }
 0x74f   : > { %v3001_v26 = vpack.c.bf16 %v8512_v25, %v8512_v25  ;;  %v3854_v8 = vpack.c.bf16 %v3846_v4, %v3846_v4 }
 0x751   : > { %6837 = vmatmul.mubr.bf16.vlgmr.msra.gmra.mxu1 %v3001_v26  ;;  %v4168_v52 = vsel %vm1721_vm1, %v3854_v8, 0  ;;  %v3256_v26 = vrot.slane %v8474_v24, %v3255_v21 }
 0x752   : > { %6842 = vmatprep.mubr.msk.bf16.mxu1 %vm7716_vm0, %v7715_v1  ;;  %6841 = vmatpush3.bf16.xpose.msra.mxu1 %v4168_v52 }
 0x753   : > { %6846 = vmatprep.subr.bf16.mxu1 %v7715_v1  ;;  %v8567_v13 = vadd.f32 %v3256_v26, %v8499_v3 }
 0x811   : > { %v3104_v50 = vpop.f32.mrf.mxu1 }
 0x812   : > { %v3105_v51 = vadd.f32 %v3104_v50, %v3021_v19 }
 0x813   : > { %v6838_v9 = vpop.f32.mrf.mxu1 }
 0x814   : > { %3259 = vrot.lane.b32.xlu1 %v3105_v51, %s7718_s5  ;;  %3262 = vrot.lane.b32.xlu0 %v3105_v51, %s7719_s25 }
 0x815   : > { %v3107_v20 = vpop.f32.mrf.mxu1 }
 0x817   : > { %v6839_v53 = vpop.f32.mrf.mxu1 }
 0x818   : > { %3265 = vrot.lane.b32.xlu1 %v3105_v51, %s7717_s9  ;;  %3570 = vrot.lane.b32.xlu0 %v8497_v15, %s7720_s29 }
 0x81c   : > { %3573 = vrot.lane.b32.xlu1 %v8497_v15, %s7721_s16  ;;  %3576 = vrot.lane.b32.xlu0 %v8497_v15, %s7722_s2 }
 0x820   : > { %3579 = vrot.lane.b32.xlu1 %v8497_v15, %s7723_s6  ;;  %3268 = vrot.lane.b32.xlu0 %v3105_v51, %s7720_s29 }
 0x824   : > { %3271 = vrot.lane.b32.xlu1 %v3105_v51, %s7721_s16  ;;  %3274 = vrot.lane.b32.xlu0 %v3105_v51, %s7722_s2 }
 0x828   : > { %3277 = vrot.lane.b32.xlu1 %v3105_v51, %s7723_s6  ;;  %3863 = vrot.lane.b32.xlu0 %v8567_v13, %s7718_s5 }
 0x82c   : > { %3866 = vrot.lane.b32.xlu1 %v8567_v13, %s7719_s25  ;;  %3869 = vrot.lane.b32.xlu0 %v8567_v13, %s7717_s9 }
 0x830   : > { %3875 = vrot.lane.b32.xlu1 %v8567_v13, %s7721_s16  ;;  %3872 = vrot.lane.b32.xlu0 %v8567_v13, %s7720_s29 }
 0x886   : > { %v3260_v24 = vpop.permute.xlu1 %3259  ;;  %v3263_v15 = vpop.permute.xlu0 %3262 }
 0x887   : > { %v3280_v3 = vcombine.low %v3105_v51, %v3263_v15  ;;  %v3281_v31 = vcombine.high %v3105_v51, %v3263_v15 }
 0x889   : > { %v3288_v39 = vrot.slane %v3280_v3, %v8126_v56  ;;  %v3295_v40 = vrot.slane %v3281_v31, %v8126_v56 }
 0x88a   : > { %v3266_v27 = vpop.permute.xlu1 %3265  ;;  %v3571_v28 = vpop.permute.xlu0 %3570 }
 0x88b   : > { %v3296_v37 = vcombine.low %v3260_v24, %v3266_v27  ;;  %v3297_v38 = vcombine.high %v3260_v24, %v3266_v27 }
 0x88d   : > { %v3304_v35 = vrot.slane %v3296_v37, %v8126_v56  ;;  %v3311_v36 = vrot.slane %v3297_v38, %v8126_v56 }
 0x88e   : > { %v3574_v60 = vpop.permute.xlu1 %3573  ;;  %v3577_v34 = vpop.permute.xlu0 %3576 }
 0x88f   : > { %v3344_v61 = vcombine.low %v3288_v39, %v3304_v35  ;;  %v3345_v22 = vcombine.high %v3288_v39, %v3304_v35  ;;  %v3360_v33 = vcombine.low %v3295_v40, %v3311_v36  ;;  %v3361_v43 = vcombine.high %v3295_v40, %v3311_v36 }
 0x890   : > { %v3614_v48 = vcombine.low %v3571_v28, %v3577_v34  ;;  %v3615_v49 = vcombine.high %v3571_v28, %v3577_v34 }
 0x891   : > { %v3352_v45 = vrot.slane %v3344_v61, %v8129_v63  ;;  %v3359_v42 = vrot.slane %v3345_v22, %v8129_v63  ;;  %v3368_v46 = vrot.slane %v3360_v33, %v8129_v63  ;;  %v3375_v47 = vrot.slane %v3361_v43, %v8129_v63 }
 0x892   : > { %v3580_v54 = vpop.permute.xlu1 %3579  ;;  %v3269_v55 = vpop.permute.xlu0 %3268  ;;  %v3622_v8 = vrot.slane %v3614_v48, %v8126_v56  ;;  %v3629_v6 = vrot.slane %v3615_v49, %v8126_v56  ;;  %v3855_v61 = vpack.c.bf16 %v8537_v14, %v8537_v14 }
 0x893   : > { %v6416_v57 = vcombine.low %v3352_v45, %v3359_v42  ;;  %v6418_v62 = vcombine.high %v3352_v45, %v3359_v42  ;;  %v6420_v2 = vcombine.low %v3368_v46, %v3375_v47  ;;  %v6422_v10 = vcombine.high %v3368_v46, %v3375_v47 }
 0x894   : > { %v3630_v44 = vcombine.low %v3574_v60, %v3580_v54  ;;  %v3631_v58 = vcombine.high %v3574_v60, %v3580_v54 }
 0x895   : > { %v8589_v59 = vrot.slane %v6416_v57, %v8126_v56  ;;  %v8592_v4 = vrot.slane %v6418_v62, %v8126_v56  ;;  %v8595_v5 = vrot.slane %v6420_v2, %v8126_v56  ;;  %v8598_v7 = vrot.slane %v6422_v10, %v8126_v56 }
 0x896   : > { %v3638_v12 = vrot.slane %v3630_v44, %v8126_v56  ;;  %v3645_v52 = vrot.slane %v3631_v58, %v8126_v56  ;;  %v3272_v19 = vpop.permute.xlu1 %3271  ;;  %v3275_v50 = vpop.permute.xlu0 %3274 }
 0x897   : > { %v3480_v51 = vcombine.low %v8589_v59, %v8592_v4  ;;  %v3512_v9 = vcombine.low %v8595_v5, %v8598_v7  ;;  %v3312_v15 = vcombine.low %v3269_v55, %v3275_v50  ;;  %v3313_v3 = vcombine.high %v3269_v55, %v3275_v50 }
 0x898   : > { %v3678_v20 = vcombine.low %v3622_v8, %v3638_v12  ;;  %v3679_v53 = vcombine.high %v3622_v8, %v3638_v12  ;;  %v3694_v26 = vcombine.low %v3629_v6, %v3645_v52  ;;  %v3695_v24 = vcombine.high %v3629_v6, %v3645_v52 }
 0x899   : > { %v8609_v31 = vrot.slane %v3480_v51, %v8129_v63  ;;  %v8612_v27 = vrot.slane %v3512_v9, %v8129_v63  ;;  %v3320_v36 = vrot.slane %v3312_v15, %v8126_v56  ;;  %v3327_v42 = vrot.slane %v3313_v3, %v8126_v56 }
 0x89a   : > { %v3686_v28 = vrot.slane %v3678_v20, %v8129_v63  ;;  %v3693_v37 = vrot.slane %v3679_v53, %v8129_v63  ;;  %v3702_v38 = vrot.slane %v3694_v26, %v8129_v63  ;;  %v3709_v39 = vrot.slane %v3695_v24, %v8129_v63  ;;  %v3278_v40 = vpop.permute.xlu1 %3277  ;;  %v3864_v35 = vpop.permute.xlu0 %3863 }
 0x89b   : > { %v3328_v60 = vcombine.low %v3272_v19, %v3278_v40  ;;  %v3329_v34 = vcombine.high %v3272_v19, %v3278_v40  ;;  %v3544_v48 = vcombine.low %v8609_v31, %v8612_v27 }
 0x89c   : > { %v6425_v22 = vcombine.low %v3686_v28, %v3693_v37  ;;  %v6427_v33 = vcombine.high %v3686_v28, %v3693_v37  ;;  %v6429_v43 = vcombine.low %v3702_v38, %v3709_v39  ;;  %v6431_v45 = vcombine.high %v3702_v38, %v3709_v39 }
 0x89d   : > { %v3336_v46 = vrot.slane %v3328_v60, %v8126_v56  ;;  %v3343_v47 = vrot.slane %v3329_v34, %v8126_v56 }
 0x89e   : > { %v8627_v49 = vrot.slane %v6425_v22, %v8126_v56  ;;  %v8630_v54 = vrot.slane %v6427_v33, %v8126_v56  ;;  %v8633_v14 = vrot.slane %v6429_v43, %v8126_v56  ;;  %v8636_v55 = vrot.slane %v6431_v45, %v8126_v56  ;;  %v3867_v57 = vpop.permute.xlu1 %3866  ;;  %v3870_v62 = vpop.permute.xlu0 %3869 }
 0x89f   : > { %v3376_v2 = vcombine.low %v3320_v36, %v3336_v46  ;;  %v3377_v10 = vcombine.high %v3320_v36, %v3336_v46  ;;  %v3392_v44 = vcombine.low %v3327_v42, %v3343_v47  ;;  %v3393_v58 = vcombine.high %v3327_v42, %v3343_v47 }
 0x8a0   : > { %v3884_v8 = vcombine.low %v8567_v13, %v3867_v57  ;;  %v3885_v6 = vcombine.high %v8567_v13, %v3867_v57  ;;  %v3900_v12 = vcombine.low %v3864_v35, %v3870_v62  ;;  %v3901_v52 = vcombine.high %v3864_v35, %v3870_v62 }
 0x8a1   : > { %v3384_v19 = vrot.slane %v3376_v2, %v8129_v63  ;;  %v3391_v50 = vrot.slane %v3377_v10, %v8129_v63  ;;  %v3400_v51 = vrot.slane %v3392_v44, %v8129_v63  ;;  %v3407_v9 = vrot.slane %v3393_v58, %v8129_v63 }
 0x8a2   : > { %v3892_v20 = vrot.slane %v3884_v8, %v8126_v56  ;;  %v3899_v53 = vrot.slane %v3885_v6, %v8126_v56  ;;  %v3908_v26 = vrot.slane %v3900_v12, %v8126_v56  ;;  %v3915_v24 = vrot.slane %v3901_v52, %v8126_v56 }
 0x8a3   : > { %v6417_v15 = vcombine.low %v3384_v19, %v3391_v50  ;;  %v6419_v3 = vcombine.high %v3384_v19, %v3391_v50  ;;  %v6421_v28 = vcombine.low %v3400_v51, %v3407_v9  ;;  %v6423_v37 = vcombine.high %v3400_v51, %v3407_v9 }
 0x8a4   : > { %v3948_v38 = vcombine.low %v3892_v20, %v3908_v26  ;;  %v3949_v39 = vcombine.high %v3892_v20, %v3908_v26  ;;  %v3964_v40 = vcombine.low %v3899_v53, %v3915_v24  ;;  %v3965_v35 = vcombine.high %v3899_v53, %v3915_v24 }
 0x8a5   : > { %v8649_v36 = vrot.slane %v6417_v15, %v8126_v56  ;;  %v8652_v60 = vrot.slane %v6419_v3, %v8126_v56  ;;  %v8655_v34 = vrot.slane %v6421_v28, %v8126_v56  ;;  %v8658_v22 = vrot.slane %v6423_v37, %v8126_v56 }
 0x8a6   : > { %v3956_v33 = vrot.slane %v3948_v38, %v8129_v63  ;;  %v3963_v43 = vrot.slane %v3949_v39, %v8129_v63  ;;  %v3972_v45 = vrot.slane %v3964_v40, %v8129_v63  ;;  %v3979_v42 = vrot.slane %v3965_v35, %v8129_v63 }
 0x8a7   : > { %v3496_v46 = vcombine.low %v8649_v36, %v8652_v60  ;;  %v3528_v47 = vcombine.low %v8655_v34, %v8658_v22  ;;  %v3552_v44 = vpack.c.bf16 %v3544_v48, %v3544_v48  ;;  %v3798_v58 = vcombine.low %v8627_v49, %v8630_v54 }
 0x8a8   : > { %v6432_v57 = vcombine.low %v3956_v33, %v3963_v43  ;;  %v6434_v62 = vcombine.high %v3956_v33, %v3963_v43  ;;  %v6436_v2 = vcombine.low %v3972_v45, %v3979_v42  ;;  %v6438_v10 = vcombine.high %v3972_v45, %v3979_v42 }
 0x8a9   : > { %v3830_v8 = vcombine.low %v8633_v14, %v8636_v55  ;;  %v3481_v6 = vcombine.high %v8589_v59, %v8592_v4  ;;  %v3513_v12 = vcombine.high %v8595_v5, %v8598_v7  ;;  %v4214_v52 = vsel %vm1721_vm1, %v3855_v61, 0  ;;  %6843 = vmatmul.mubr.msk.bf16.vlgmr.msra.gmra.mxu1 %vm1721_vm1, %v3552_v44 }
 0x8aa   : > { %v3545_v19 = vcombine.high %v8609_v31, %v8612_v27  ;;  %v4028_v50 = vrot.slane %v6432_v57, %v8126_v56  ;;  %v4044_v48 = vrot.slane %v6434_v62, %v8126_v56  ;;  %v3806_v51 = vrot.slane %v3798_v58, %v8129_v63  ;;  %6847 = vmatpush3.bf16.xpose.msra.mxu1 %v4214_v52 }
 0x8ab   : > { %v3838_v9 = vrot.slane %v3830_v8, %v8129_v63  ;;  %6848 = vmatprep.mubr.msk.bf16.mxu1 %vm7716_vm0, %v7715_v1  ;;  %v8687_v59 = vrot.slane %v3496_v46, %v8129_v63  ;;  %v8690_v4 = vrot.slane %v3528_v47, %v8129_v63  ;;  %v3799_v5 = vcombine.high %v8627_v49, %v8630_v54 }
 0x8ac   : > { %v4060_v7 = vrot.slane %v6436_v2, %v8126_v56  ;;  %v4076_v31 = vrot.slane %v6438_v10, %v8126_v56  ;;  %6852 = vmatprep.subr.bf16.mxu1 %v7715_v1  ;;  %v3831_v61 = vcombine.high %v8633_v14, %v8636_v55  ;;  %v3856_v53 = vpack.c.bf16 %v8539_v16, %v8539_v16 }
 0x8ad   : > { %v3850_v27 = vcombine.low %v3806_v51, %v3838_v9  ;;  %v3813_v20 = vrot.slane %v3799_v5, %v8129_v63  ;;  %v3553_v15 = vpack.c.bf16 %v3545_v19, %v3545_v19  ;;  %v3495_v49 = vrot.slane %v3481_v6, %v8129_v63 }
 0x8ae   : > { %v3845_v24 = vrot.slane %v3831_v61, %v8129_v63  ;;  %v3527_v54 = vrot.slane %v3513_v12, %v8129_v63  ;;  %v3548_v3 = vcombine.low %v8687_v59, %v8690_v4  ;;  %v4084_v14 = vcombine.low %v4028_v50, %v4044_v48 }
 0x8af   : > { %v3858_v26 = vpack.c.bf16 %v3850_v27, %v3850_v27  ;;  %v4116_v55 = vcombine.low %v4060_v7, %v4076_v31  ;;  %v3497_v16 = vcombine.high %v8649_v36, %v8652_v60  ;;  %v3529_v38 = vcombine.high %v8655_v34, %v8658_v22 }
 0x8b0   : > { %v3852_v37 = vcombine.low %v3813_v20, %v3845_v24  ;;  %v4260_v39 = vsel %vm1721_vm1, %v3856_v53, 0  ;;  %v3546_v40 = vcombine.low %v3495_v49, %v3527_v54  ;;  %v3556_v35 = vpack.c.bf16 %v3548_v3, %v3548_v3 }
 0x8b1   : > { %v4352_v28 = vsel %vm1721_vm1, %v3858_v26, 0  ;;  %6849 = vmatmul.mubr.msk.bf16.vlgmr.msra.gmra.mxu1 %vm1721_vm1, %v3553_v15  ;;  %v4092_v36 = vrot.slane %v4084_v14, %v8129_v63  ;;  %v4124_v60 = vrot.slane %v4116_v55, %v8129_v63  ;;  %v4085_v34 = vcombine.high %v4028_v50, %v4044_v48 }
 0x8b2   : > { %6865 = vmatpush3.bf16.xpose.msra.mxu0 %v4352_v28  ;;  %6853 = vmatpush3.bf16.xpose.msra.mxu1 %v4260_v39  ;;  %v3860_v33 = vpack.c.bf16 %v3852_v37, %v3852_v37  ;;  %v4117_v22 = vcombine.high %v4060_v7, %v4076_v31  ;;  %v3857_v43 = vpack.c.bf16 %v8542_v17, %v8542_v17 }
 0x8b3   : > { %6876 = vmatprep.subr.bf16.mxu0 %v7715_v1  ;;  %6854 = vmatprep.mubr.msk.bf16.mxu1 %vm7716_vm0, %v7715_v1  ;;  %v3511_v45 = vrot.slane %v3497_v16, %v8129_v63  ;;  %v3543_v42 = vrot.slane %v3529_v38, %v8129_v63  ;;  %v4099_v46 = vrot.slane %v4085_v34, %v8129_v63 }
 0x8b4   : > { %6858 = vmatprep.subr.bf16.mxu1 %v7715_v1  ;;  %v4131_v47 = vrot.slane %v4117_v22, %v8129_v63  ;;  %v3554_v57 = vpack.c.bf16 %v3546_v40, %v3546_v40  ;;  %v4444_v62 = vsel %vm1721_vm1, %v3860_v33, 0  ;;  %v4148_v2 = vcombine.low %v4092_v36, %v4124_v60 }
 0x8b5   : > { %v4306_v44 = vsel %vm1721_vm1, %v3857_v43, 0  ;;  %v3851_v58 = vcombine.high %v3806_v51, %v3838_v9  ;;  %v3550_v8 = vcombine.low %v3511_v45, %v3543_v42  ;;  %v3547_v6 = vcombine.high %v3495_v49, %v3527_v54 }
 0x8b6   : > { %v8730_v10 = vcombine.low %v4099_v46, %v4131_v47  ;;  %v8732_v17 = vcombine.high %v4099_v46, %v4131_v47  ;;  %v4156_v12 = vpack.c.bf16 %v4148_v2, %v4148_v2  ;;  %v3853_v9 = vcombine.high %v3813_v20, %v3845_v24 }
 0x8b7   : > { %v3859_v52 = vpack.c.bf16 %v3851_v58, %v3851_v58  ;;  %v3558_v19 = vpack.c.bf16 %v3550_v8, %v3550_v8  ;;  %v3555_v50 = vpack.c.bf16 %v3547_v6, %v3547_v6  ;;  %v3549_v5 = vcombine.high %v8687_v59, %v8690_v4 }
 0x8b8   : > { %v4616_v48 = vsel %vm2174_vm2, %v4156_v12, 0  ;;  %v3861_v7 = vpack.c.bf16 %v3853_v9, %v3853_v9  ;;  %v4149_v61 = vcombine.high %v4092_v36, %v4124_v60  ;;  %v3551_v20 = vcombine.high %v3511_v45, %v3543_v42 }
 0x8b9   : > { %6867 = vmatmul.mubr.msk.bf16.vlgmr.msra.gmra.mxu0 %vm1721_vm1, %v3556_v35  ;;  %6855 = vmatmul.mubr.msk.bf16.vlgmr.msra.gmra.mxu1 %vm1721_vm1, %v3554_v57  ;;  %v4398_v51 = vsel %vm1721_vm1, %v3859_v52, 0  ;;  %v3557_v31 = vpack.c.bf16 %v3549_v5, %v3549_v5 }
 0x8ba   : > { %6877 = vmatpush3.bf16.xpose.msra.mxu0 %v4444_v62  ;;  %6878 = vmatprep.mubr.msk.bf16.mxu0 %vm7716_vm0, %v7715_v1  ;;  %v4490_v27 = vsel %vm1721_vm1, %v3861_v7, 0  ;;  %v4157_v53 = vpack.c.bf16 %v4149_v61, %v4149_v61  ;;  %v3559_v26 = vpack.c.bf16 %v3551_v20, %v3551_v20  ;;  %v8783_v7 = vpop.permute.xlu0 %3872  ;;  %v3876_v20 = vpop.permute.xlu1 %3875 }
 0x8bb   : > { %6888 = vmatprep.subr.bf16.mxu0 %v7715_v1  ;;  %6859 = vmatpush3.bf16.xpose.msra.mxu1 %v4306_v44 }
 0x8bc   : > { %6860 = vmatprep.mubr.msk.bf16.mxu1 %vm7716_vm0, %v7715_v1  ;;  %6870 = vmatprep.subr.bf16.mxu1 %v7715_v1  ;;  %v4662_v59 = vsel %vm2174_vm2, %v4157_v53, 0 }
 0x8c1   : > { %6879 = vmatmul.mubr.msk.bf16.vlgmr.msra.gmra.mxu0 %vm1721_vm1, %v3558_v19 }
 0x8c2   : > { %6889 = vmatpush3.bf16.msra.mxu0 %v4616_v48  ;;  %6890 = vmatprep.mubr.msk.bf16.mxu0 %vm7716_vm0, %v7715_v1 }
 0x8c3   : > { %6861 = vmatmul.mubr.msk.bf16.vlgmr.msra.gmra.mxu1 %vm1721_vm1, %v3555_v50  ;;  %6900 = vmatprep.subr.bf16.mxu0 %v7715_v1 }
 0x8c4   : > { %6871 = vmatpush3.bf16.xpose.msra.mxu1 %v4398_v51  ;;  %6872 = vmatprep.mubr.msk.bf16.mxu1 %vm7716_vm0, %v7715_v1 }
 0x8c5   : > { %6882 = vmatprep.subr.bf16.mxu1 %v7715_v1 }
 0x8cb   : > { %6873 = vmatmul.mubr.msk.bf16.vlgmr.msra.gmra.mxu1 %vm1721_vm1, %v3557_v31 }
 0x8cc   : > { %6883 = vmatpush3.bf16.xpose.msra.mxu1 %v4490_v27  ;;  %6884 = vmatprep.mubr.msk.bf16.mxu1 %vm7716_vm0, %v7715_v1 }
 0x8cd   : > { %6894 = vmatprep.subr.bf16.mxu1 %v7715_v1 }
 0x8d3   : > { %6885 = vmatmul.mubr.msk.bf16.vlgmr.msra.gmra.mxu1 %vm1721_vm1, %v3559_v26 }
 0x8d4   : > { %6895 = vmatpush3.bf16.msra.mxu1 %v4662_v59  ;;  %6896 = vmatprep.mubr.msk.bf16.mxu1 %vm7716_vm0, %v7715_v1 }
 0x8d5   : > { %6906 = vmatprep.subr.bf16.mxu1 %v7715_v1 }
 0x969   : > { %v4204_v4 = vpop.f32.mrf.mxu1 }
 0x96a   : > { %v4532_v24 = vsel %vm2090_vm3, %v4204_v4, -inf }
 0x96b   : > { %v6844_v15 = vpop.f32.mrf.mxu1  ;;  %4533 = vmax.xlane.f32.xlu0 %v4532_v24 }
 0x96d   : > { %v4207_v49 = vpop.f32.mrf.mxu1 }
 0x96f   : > { %v6845_v54 = vpop.f32.mrf.mxu1 }
 0x971   : > { %v4250_v3 = vpop.f32.mrf.mxu1 }
 0x972   : > { %v4535_v28 = vsel %vm2090_vm3, %v4250_v3, -inf }
 0x973   : > { %v6850_v37 = vpop.f32.mrf.mxu1  ;;  %4536 = vmax.xlane.f32.xlu1 %v4535_v28  ;;  %v4158_v28 = vpack.c.bf16 %v8730_v10, %v8730_v10 }
 0x975   : > { %v4253_v14 = vpop.f32.mrf.mxu1 }
 0x977   : > { %v6851_v55 = vpop.f32.mrf.mxu1 }
 0x979   : > { %v4388_v16 = vpop.f32.mrf.mxu0  ;;  %v4296_v39 = vpop.f32.mrf.mxu1 }
 0x97a   : > { %v4544_v38 = vsel %vm2090_vm3, %v4388_v16, -inf  ;;  %v4538_v35 = vsel %vm2090_vm3, %v4296_v39, -inf }
 0x97b   : > { %4545 = vmax.xlane.f32.xlu0 %v4544_v38  ;;  %v6868_v40 = vpop.f32.mrf.mxu0  ;;  %v6856_v33 = vpop.f32.mrf.mxu1  ;;  %4539 = vmax.xlane.f32.xlu1 %v4538_v35  ;;  %v4159_v38 = vpack.c.bf16 %v8732_v17, %v8732_v17 }
 0x97d   : > { %v4391_v36 = vpop.f32.mrf.mxu0  ;;  %v4299_v60 = vpop.f32.mrf.mxu1 }
 0x97e   : > { %v4754_v36 = vsel %vm2174_vm2, %v4159_v38, 0 }
 0x97f   : > { %v6869_v34 = vpop.f32.mrf.mxu0  ;;  %v6857_v22 = vpop.f32.mrf.mxu1 }
 0x981   : > { %v8766_v43 = vpop.f32.mrf.mxu0 }
 0x982   : > { %v4550_v5 = vsel %vm2090_vm3, %v8766_v43, -inf }
 0x983   : > { %v4342_v45 = vpop.f32.mrf.mxu1  ;;  %v6880_v42 = vpop.f32.mrf.mxu0 }
 0x984   : > { %v4541_v46 = vsel %vm2090_vm3, %v4342_v45, -inf }
 0x985   : > { %v6862_v47 = vpop.f32.mrf.mxu1  ;;  %4542 = vmax.xlane.f32.xlu0 %v4541_v46  ;;  %v4483_v57 = vpop.f32.mrf.mxu0 }
 0x987   : > { %v4345_v62 = vpop.f32.mrf.mxu1  ;;  %v6881_v2 = vpop.f32.mrf.mxu0 }
 0x989   : > { %v6863_v44 = vpop.f32.mrf.mxu1 }
 0x98b   : > { %v8769_v58 = vpop.f32.mrf.mxu1 }
 0x98c   : > { %v4547_v8 = vsel %vm2090_vm3, %v8769_v58, -inf }
 0x98d   : > { %v6874_v6 = vpop.f32.mrf.mxu1  ;;  %4548 = vmax.xlane.f32.xlu1 %v4547_v8 }
 0x98f   : > { %v4437_v12 = vpop.f32.mrf.mxu1 }
 0x991   : > { %v6875_v52 = vpop.f32.mrf.mxu1 }
 0x993   : > { %v8773_v19 = vpop.f32.mrf.mxu1 }
 0x994   : > { %v4553_v9 = vsel %vm2090_vm3, %v8773_v19, -inf }
 0x995   : > { %v6886_v50 = vpop.f32.mrf.mxu1 }
 0x997   : > { %v4529_v48 = vpop.f32.mrf.mxu1 }
 0x999   : > { %v6887_v51 = vpop.f32.mrf.mxu1 }
 0x99b   : > { %3881 = vrot.lane.b32.xlu0 %v8567_v13, %s7723_s6 }
 0x99e   : > { %3878 = vrot.lane.b32.xlu1 %v8567_v13, %s7722_s2 }
 0x9ba   : > { %4554 = vmax.xlane.f32.xlu0 %v4553_v9 }
 0x9c2   : > { %4551 = vmax.xlane.f32.xlu1 %v4550_v5 }
 0x9f4   : > { %v4534_v31 = vpop.xlane.xlu0 %4533 }
 0x9f5   : > { %v4556_v27 = vsub.f32 %v4204_v4, %v4534_v31 }
 0x9f7   : > { %v4564_v61 = vmul.f32 1.442695, %v4556_v27 }
 0x9f9   : > { %7302 = vpow2.f32 %v4564_v61 }
 0x9fc   : > { %v4537_v53 = vpop.xlane.xlu1 %4536 }
 0x9fd   : > { %v4557_v26 = vsub.f32 %v4250_v3, %v4537_v53  ;;  %v4708_v3 = vsel %vm2174_vm2, %v4158_v28, 0 }
 0x9ff   : > { %v4566_v59 = vmul.f32 1.442695, %v4557_v26 }
 0xa01   : > { %7304 = vpow2.f32 %v4566_v59 }
 0xa04   : > { %v4546_v13 = vpop.xlane.xlu0 %4545  ;;  %v4540_v15 = vpop.xlane.xlu1 %4539 }
 0xa05   : > { %v4560_v24 = vsub.f32 %v4388_v16, %v4546_v13  ;;  %v4558_v49 = vsub.f32 %v4296_v39, %v4540_v15 }
 0xa06   : > { %v7303_v37 = vpop.eup %7302 }
 0xa07   : > { %v4572_v54 = vmul.f32 1.442695, %v4560_v24  ;;  %v4568_v14 = vmul.f32 1.442695, %v4558_v49  ;;  %v4580_v4 = vsel %vm2090_vm3, %v7303_v37, 0.0  ;;  %v4604_v55 = vpack.c.bf16 %v7303_v37, %v7303_v37 }
 0xa08   : > { %4581 = vadd.xlane.f32.xlu0 %v4580_v4 }
 0xa09   : > { %7306 = vpow2.f32 %v4572_v54  ;;  %6891 = vmatmul.mubr.msk.bf16.vlgmr.msra.gmra.mxu0 %vm2090_vm3, %v4604_v55 }
 0xa0a   : > { %7308 = vpow2.f32 %v4568_v14  ;;  %6901 = vmatpush3.bf16.msra.mxu0 %v4708_v3  ;;  %6902 = vmatprep.mubr.msk.bf16.mxu0 %vm7716_vm0, %v7715_v1 }
 0xa0b   : > { %6912 = vmatprep.subr.bf16.mxu0 %v7715_v1 }
 0xa0e   : > { %v4543_v16 = vpop.xlane.xlu0 %4542  ;;  %v7305_v39 = vpop.eup %7304 }
 0xa0f   : > { %v4559_v10 = vsub.f32 %v4342_v45, %v4543_v16  ;;  %v4583_v35 = vsel %vm2090_vm3, %v7305_v39, 0.0  ;;  %v4605_v33 = vpack.c.bf16 %v7305_v39, %v7305_v39 }
 0xa10   : > { %4584 = vadd.xlane.f32.xlu1 %v4583_v35 }
 0xa11   : > { %v4570_v40 = vmul.f32 1.442695, %v4559_v10  ;;  %6897 = vmatmul.mubr.msk.bf16.vlgmr.msra.gmra.mxu1 %vm2090_vm3, %v4605_v33 }
 0xa12   : > { %6907 = vmatpush3.bf16.msra.mxu1 %v4754_v36  ;;  %6908 = vmatprep.mubr.msk.bf16.mxu1 %vm7716_vm0, %v7715_v1  ;;  %v3882_v17 = vpop.permute.xlu0 %3881 }
 0xa13   : > { %7310 = vpow2.f32 %v4570_v40  ;;  %6918 = vmatprep.subr.bf16.mxu1 %v7715_v1  ;;  %v3932_v46 = vcombine.low %v3876_v20, %v3882_v17  ;;  %v3933_v47 = vcombine.high %v3876_v20, %v3882_v17 }
 0xa15   : > { %v3947_v12 = vrot.slane %v3933_v47, %v8126_v56 }
 0xa16   : > { %v8801_v60 = vpop.eup %7306  ;;  %v4549_v34 = vpop.xlane.xlu1 %4548 }
 0xa17   : > { %v4561_v22 = vsub.f32 %v8769_v58, %v4549_v34  ;;  %v4592_v45 = vsel %vm2090_vm3, %v8801_v60, 0.0  ;;  %v7309_v42 = vpop.eup %7308  ;;  %v3940_v58 = vrot.slane %v3932_v46, %v8126_v56 }
 0xa18   : > { %4593 = vadd.xlane.f32.xlu0 %v4592_v45  ;;  %v4606_v62 = vpack.c.bf16 %v7309_v42, %v7309_v42  ;;  %v4586_v6 = vsel %vm2090_vm3, %v7309_v42, 0.0 }
 0xa19   : > { %v4574_v57 = vmul.f32 1.442695, %v4561_v22 }
 0xa1a   : > { %v3879_v2 = vpop.permute.xlu1 %3878  ;;  %6903 = vmatmul.mubr.msk.bf16.vlgmr.msra.gmra.mxu0 %vm2090_vm3, %v4606_v62  ;;  %v4608_v62 = vpack.c.bf16 %v8801_v60, %v8801_v60 }
 0xa1b   : > { %7312 = vpow2.f32 %v4574_v57  ;;  %v3916_v44 = vcombine.low %v8783_v7, %v3879_v2  ;;  %v3917_v8 = vcombine.high %v8783_v7, %v3879_v2  ;;  %6914 = vmatprep.mubr.msk.bf16.mxu0 %vm7716_vm0, %v7715_v1 }
 0xa1c   : > { %4587 = vadd.xlane.f32.xlu0 %v4586_v6 }
 0xa1d   : > { %v3924_v52 = vrot.slane %v3916_v44, %v8126_v56  ;;  %v3931_v50 = vrot.slane %v3917_v8, %v8126_v56 }
 0xa1f   : > { %v3980_v48 = vcombine.low %v3924_v52, %v3940_v58  ;;  %v3981_v51 = vcombine.high %v3924_v52, %v3940_v58  ;;  %v3996_v9 = vcombine.low %v3931_v50, %v3947_v12  ;;  %v3997_v5 = vcombine.high %v3931_v50, %v3947_v12 }
 0xa20   : > { %v7311_v7 = vpop.eup %7310 }
 0xa21   : > { %v3988_v31 = vrot.slane %v3980_v48, %v8129_v63  ;;  %v3995_v27 = vrot.slane %v3981_v51, %v8129_v63  ;;  %v4004_v61 = vrot.slane %v3996_v9, %v8129_v63  ;;  %v4011_v20 = vrot.slane %v3997_v5, %v8129_v63 }
 0xa22   : > { %v4589_v53 = vsel %vm2090_vm3, %v7311_v7, 0.0  ;;  %v4607_v26 = vpack.c.bf16 %v7311_v7, %v7311_v7 }
 0xa23   : > { %v6433_v59 = vcombine.low %v3988_v31, %v3995_v27  ;;  %v6435_v13 = vcombine.high %v3988_v31, %v3995_v27  ;;  %v6437_v24 = vcombine.low %v4004_v61, %v4011_v20  ;;  %v6439_v15 = vcombine.high %v4004_v61, %v4011_v20  ;;  %4590 = vadd.xlane.f32.xlu1 %v4589_v53 }
 0xa24   : > { %6909 = vmatmul.mubr.msk.bf16.vlgmr.msra.gmra.mxu1 %vm2090_vm3, %v4607_v26 }
 0xa25   : > { %v4035_v49 = vrot.slane %v6433_v59, %v8126_v56  ;;  %v4051_v54 = vrot.slane %v6435_v13, %v8126_v56  ;;  %v4067_v28 = vrot.slane %v6437_v24, %v8126_v56  ;;  %v4083_v37 = vrot.slane %v6439_v15, %v8126_v56  ;;  %6920 = vmatprep.mubr.msk.bf16.mxu1 %vm7716_vm0, %v7715_v1 }
 0xa27   : > { %v4100_v14 = vcombine.low %v4035_v49, %v4051_v54  ;;  %v4132_v4 = vcombine.low %v4067_v28, %v4083_v37  ;;  %v4101_v55 = vcombine.high %v4035_v49, %v4051_v54  ;;  %v4133_v3 = vcombine.high %v4067_v28, %v4083_v37 }
 0xa28   : > { %v7313_v16 = vpop.eup %7312 }
 0xa29   : > { %v4595_v10 = vsel %vm2090_vm3, %v7313_v16, 0.0  ;;  %v4108_v38 = vrot.slane %v4100_v14, %v8129_v63  ;;  %v4140_v39 = vrot.slane %v4132_v4, %v8129_v63  ;;  %v4115_v40 = vrot.slane %v4101_v55, %v8129_v63 }
 0xa2a   : > { %4596 = vadd.xlane.f32.xlu1 %v4595_v10  ;;  %v4147_v35 = vrot.slane %v4133_v3, %v8129_v63  ;;  %v4609_v2 = vpack.c.bf16 %v7313_v16, %v7313_v16 }
 0xa2b   : > { %v4152_v33 = vcombine.low %v4108_v38, %v4140_v39  ;;  %v4153_v36 = vcombine.high %v4108_v38, %v4140_v39 }
 0xa2c   : > { %v4154_v17 = vcombine.low %v4115_v40, %v4147_v35  ;;  %v4155_v34 = vcombine.high %v4115_v40, %v4147_v35 }
 0xa2d   : > { %v4160_v22 = vpack.c.bf16 %v4152_v33, %v4152_v33  ;;  %v4161_v45 = vpack.c.bf16 %v4153_v36, %v4153_v36 }
 0xa2e   : > { %v4162_v47 = vpack.c.bf16 %v4154_v17, %v4154_v17  ;;  %v4163_v57 = vpack.c.bf16 %v4155_v34, %v4155_v34 }
 0xa2f   : > { %v4800_v42 = vsel %vm2174_vm2, %v4160_v22, 0  ;;  %v4846_v46 = vsel %vm2174_vm2, %v4161_v45, 0 }
 0xa30   : > { %6913 = vmatpush3.bf16.msra.mxu0 %v4800_v42  ;;  %6919 = vmatpush3.bf16.msra.mxu1 %v4846_v46  ;;  %v4892_v44 = vsel %vm2174_vm2, %v4162_v47, 0  ;;  %v4938_v8 = vsel %vm2174_vm2, %v4163_v57, 0 }
 0xa31   : > { %6924 = vmatprep.subr.bf16.mxu0 %v7715_v1  ;;  %6930 = vmatprep.subr.bf16.mxu1 %v7715_v1 }
 0xa33   : > { %6915 = vmatmul.mubr.msk.bf16.vlgmr.msra.gmra.mxu0 %vm2090_vm3, %v4608_v62  ;;  %6921 = vmatmul.mubr.msk.bf16.vlgmr.msra.gmra.mxu1 %vm2090_vm3, %v4609_v2 }
 0xa34   : > { %6925 = vmatpush3.bf16.msra.mxu0 %v4892_v44  ;;  %6931 = vmatpush3.bf16.msra.mxu1 %v4938_v8 }
 0xa35   : > { %6932 = vmatprep.mubr.msk.bf16.mxu1 %vm7716_vm0, %v7715_v1  ;;  %6926 = vmatprep.mubr.msk.bf16.mxu0 %vm7716_vm0, %v7715_v1 }
 0xa36   : > { %6936 = vmatprep.subr.bf16.mxu0 %v7715_v1 }
 0xa43   : > { %v4555_v60 = vpop.xlane.xlu0 %4554 }
 0xa44   : > { %v4563_v6 = vsub.f32 %v8773_v19, %v4555_v60 }
 0xa46   : > { %v4578_v58 = vmul.f32 1.442695, %v4563_v6 }
 0xa48   : > { %7314 = vpow2.f32 %v4578_v58 }
 0xa4b   : > { %v4552_v12 = vpop.xlane.xlu1 %4551 }
 0xa4c   : > { %v4562_v52 = vsub.f32 %v8766_v43, %v4552_v12 }
 0xa4e   : > { %v4576_v50 = vmul.f32 1.442695, %v4562_v52 }
 0xa50   : > { %7316 = vpow2.f32 %v4576_v50 }
 0xa55   : > { %v7315_v48 = vpop.eup %7314 }
 0xa56   : > { %v4601_v51 = vsel %vm2090_vm3, %v7315_v48, 0.0  ;;  %v4611_v9 = vpack.c.bf16 %v7315_v48, %v7315_v48 }
 0xa57   : > { %4602 = vadd.xlane.f32.xlu1 %v4601_v51 }
 0xa58   : > { %6933 = vmatmul.mubr.msk.bf16.vlgmr.msra.gmra.mxu1 %vm2090_vm3, %v4611_v9 }
 0xa59   : > { %5681 = vmatprep.mubr.bf16.mxu1 %v7714_v0 }
 0xa5d   : > { %v7317_v5 = vpop.eup %7316 }
 0xa5e   : > { %v4598_v7 = vsel %vm2090_vm3, %v7317_v5, 0.0  ;;  %v4610_v19 = vpack.c.bf16 %v7317_v5, %v7317_v5 }
 0xa5f   : > { %4599 = vadd.xlane.f32.xlu0 %v4598_v7  ;;  %v7180_v7 = vld [vmem:[#allocation13 + $0x38] sm:$0xff]  }
 0xa60   : > { %6927 = vmatmul.mubr.msk.bf16.vlgmr.msra.gmra.mxu0 %vm2090_vm3, %v4610_v19 }
 0xa61   : > { %6952 = vmatprep.mubr.msk.bf16.mxu0 %vm7716_vm0, %v7715_v1  ;;  %6937 = vmatpush3.bf16.msra.mxu0 %v7180_v7 }
 0xa62   : > { %6938 = vmatprep.subr.bf16.mxu0 %v7715_v1 }
 0xa91   : > { %v4582_v43 = vpop.xlane.xlu0 %4581 }
 0xa99   : > { %v4585_v53 = vpop.xlane.xlu1 %4584 }
 0xaa1   : > { %v8857_v31 = vpop.xlane.xlu0 %4593 }
 0xaa5   : > { %v4588_v26 = vpop.xlane.xlu0 %4587 }
 0xaa6   : > { %7318 = vrcp.f32 %v4588_v26 }
 0xaa7   : > { %7320 = vrcp.f32 %v4582_v43 }
 0xaa8   : > { %7322 = vrcp.f32 %v4585_v53 }
 0xaac   : > { %v4591_v24 = vpop.xlane.xlu1 %4590 }
 0xaad   : > { %7324 = vrcp.f32 %v4591_v24 }
 0xab3   : > { %v7319_v4 = vpop.eup %7318 }
 0xab4   : > { %v7321_v16 = vpop.eup %7320 }
 0xab5   : > { %v7323_v10 = vpop.eup %7322 }
 0xaba   : > { %v7325_v39 = vpop.eup %7324 }
 0xac9   : > { %v4652_v27 = vpop.f32.mrf.mxu0 }
 0xaca   : > { %v4988_v38 = vmul.f32 %v7321_v16, %v4652_v27 }
 0xacb   : > { %v6892_v61 = vpop.f32.mrf.mxu0 }
 0xacd   : > { %v4655_v20 = vpop.f32.mrf.mxu0 }
 0xace   : > { %v7181_v20 = vld [vmem:[#allocation13 + $0x30] sm:$0xff]  }
 0xacf   : > { %v6893_v59 = vpop.f32.mrf.mxu0  ;;  %6939 = vmatpush3.bf16.msra.mxu0 %v7181_v20 }
 0xad0   : > { %6940 = vmatprep.subr.bf16.mxu0 %v7715_v1 }
 0xad1   : > { %v4698_v13 = vpop.f32.mrf.mxu1 }
 0xad2   : > { %v4989_v35 = vmul.f32 %v7323_v10, %v4698_v13 }
 0xad3   : > { %v6898_v15 = vpop.f32.mrf.mxu1 }
 0xad5   : > { %v4701_v49 = vpop.f32.mrf.mxu1 }
 0xad7   : > { %v6899_v54 = vpop.f32.mrf.mxu1 }
 0xada   : > { %v4744_v28 = vpop.f32.mrf.mxu0 }
 0xadb   : > { %v4990_v55 = vmul.f32 %v7319_v4, %v4744_v28 }
 0xadc   : > { %v6904_v37 = vpop.f32.mrf.mxu0 }
 0xadd   : > { %v4996_v33 = vcombine.low %v4988_v38, %v4990_v55  ;;  %v4997_v36 = vcombine.high %v4988_v38, %v4990_v55  ;;  %v7182_v55 = vld [vmem:[#allocation13 + $0x28] sm:$0xff]  }
 0xade   : > { %v4747_v14 = vpop.f32.mrf.mxu0  ;;  %6941 = vmatpush3.bf16.msra.mxu0 %v7182_v55 }
 0xadf   : > { %v5004_v46 = vrot.slane %v4996_v33, %v8126_v56  ;;  %v5011_v47 = vrot.slane %v4997_v36, %v8126_v56  ;;  %v7183_v33 = vld [vmem:[#allocation13 + $0x20] sm:$0xff]   ;;  %6942 = vmatprep.subr.bf16.mxu0 %v7715_v1 }
 0xae0   : > { %v6905_v3 = vpop.f32.mrf.mxu0 }
 0xae2   : > { %6943 = vmatpush3.bf16.msra.mxu0 %v7183_v33  ;;  %v7187_v33 = vld [vmem:[#allocation13] sm:$0xff]  }
 0xae3   : > { %6944 = vmatprep.subr.bf16.mxu0 %v7715_v1 }
 0xae4   : > { %v4790_v40 = vpop.f32.mrf.mxu1 }
 0xae5   : > { %v4991_v17 = vmul.f32 %v7325_v39, %v4790_v40 }
 0xae6   : > { %v6910_v34 = vpop.f32.mrf.mxu1 }
 0xae7   : > { %v5012_v22 = vcombine.low %v4989_v35, %v4991_v17  ;;  %v5013_v45 = vcombine.high %v4989_v35, %v4991_v17  ;;  %v7184_v17 = vld [vmem:[#allocation13 + $0x18] sm:$0xff]   ;;  %v7185_v34 = vld [vmem:[#allocation13 + $0x10] sm:$0xff]  }
 0xae8   : > { %v4793_v42 = vpop.f32.mrf.mxu1  ;;  %6945 = vmatpush3.bf16.msra.mxu0 %v7184_v17 }
 0xae9   : > { %v5020_v57 = vrot.slane %v5012_v22, %v8126_v56  ;;  %v5027_v62 = vrot.slane %v5013_v45, %v8126_v56  ;;  %6946 = vmatprep.subr.bf16.mxu0 %v7715_v1  ;;  %v4597_v22 = vpop.xlane.xlu1 %4596  ;;  %v4600_v42 = vpop.xlane.xlu0 %4599 }
 0xaea   : > { %v6911_v2 = vpop.f32.mrf.mxu1 }
 0xaeb   : > { %v5060_v44 = vcombine.low %v5004_v46, %v5020_v57  ;;  %v5061_v8 = vcombine.high %v5004_v46, %v5020_v57  ;;  %v5076_v60 = vcombine.low %v5011_v47, %v5027_v62  ;;  %v5077_v6 = vcombine.high %v5011_v47, %v5027_v62 }
 0xaec   : > { %6947 = vmatpush3.bf16.msra.mxu0 %v7185_v34 }
 0xaed   : > { %v5068_v58 = vrot.slane %v5060_v44, %v8129_v63  ;;  %v5075_v12 = vrot.slane %v5061_v8, %v8129_v63  ;;  %v5084_v52 = vrot.slane %v5076_v60, %v8129_v63  ;;  %v5091_v50 = vrot.slane %v5077_v6, %v8129_v63  ;;  %6948 = vmatprep.subr.bf16.mxu0 %v7715_v1  ;;  %v4603_v45 = vpop.xlane.xlu1 %4602 }
 0xaee   : > { %7326 = vrcp.f32 %v4603_v45 }
 0xaef   : > { %v6456_v48 = vcombine.low %v5068_v58, %v5075_v12  ;;  %v6458_v51 = vcombine.high %v5068_v58, %v5075_v12  ;;  %v6460_v9 = vcombine.low %v5084_v52, %v5091_v50  ;;  %v6462_v5 = vcombine.high %v5084_v52, %v5091_v50 }
 0xaf0   : > { %7328 = vrcp.f32 %v4597_v22 }
 0xaf1   : > { %v5140_v19 = vrot.slane %v6456_v48, %v8126_v56  ;;  %v5156_v43 = vrot.slane %v6458_v51, %v8126_v56  ;;  %v5172_v27 = vrot.slane %v6460_v9, %v8126_v56  ;;  %v5188_v61 = vrot.slane %v6462_v5, %v8126_v56 }
 0xaf2   : > { %7330 = vrcp.f32 %v8857_v31 }
 0xaf3   : > { %v4836_v53 = vpop.f32.mrf.mxu0  ;;  %v4882_v26 = vpop.f32.mrf.mxu1  ;;  %v5197_v59 = vcombine.high %v5140_v19, %v5156_v43  ;;  %v5229_v13 = vcombine.high %v5172_v27, %v5188_v61  ;;  %v5196_v24 = vcombine.low %v5140_v19, %v5156_v43  ;;  %v5228_v15 = vcombine.low %v5172_v27, %v5188_v61 }
 0xaf4   : > { %7332 = vrcp.f32 %v4600_v42 }
 0xaf5   : > { %v6916_v49 = vpop.f32.mrf.mxu0  ;;  %v6922_v54 = vpop.f32.mrf.mxu1  ;;  %v5211_v28 = vrot.slane %v5197_v59, %v8129_v63  ;;  %v5243_v37 = vrot.slane %v5229_v13, %v8129_v63  ;;  %v8875_v14 = vrot.slane %v5196_v24, %v8129_v63  ;;  %v8878_v4 = vrot.slane %v5228_v15, %v8129_v63  ;;  %v7186_v24 = vld [vmem:[#allocation13 + $0x8] sm:$0xff]  }
 0xaf6   : > { %6949 = vmatpush3.bf16.msra.mxu0 %v7186_v24  ;;  %v7199_v24 = vld [vmem:[#allocation14 + $0xcc] ss:$16 sps:$4 sm:$0xff]  }
 0xaf7   : > { %v4839_v3 = vpop.f32.mrf.mxu0  ;;  %v4885_v16 = vpop.f32.mrf.mxu1  ;;  %v5262_v10 = vcombine.low %v5211_v28, %v5243_v37  ;;  %v5261_v38 = vcombine.high %v8875_v14, %v8878_v4  ;;  %v5260_v39 = vcombine.low %v8875_v14, %v8878_v4  ;;  %v5263_v36 = vcombine.high %v5211_v28, %v5243_v37  ;;  %6950 = vmatprep.subr.bf16.mxu0 %v7715_v1 }
 0xaf8   : > { %v5322_v4 = vsub.s32 7, %v8073_v29 }
 0xaf9   : > { %5273 = vrot.lane.b32.xlu1 %v5262_v10, %s7722_s2  ;;  %5269 = vrot.lane.b32.xlu0 %v5261_v38, %s7723_s6  ;;  %v6917_v40 = vpop.f32.mrf.mxu0  ;;  %v6923_v35 = vpop.f32.mrf.mxu1  ;;  %s6103_s2 = scalar_lea.sflag [#allocation4], %s8017_s15 }
 0xafa   : > { %6951 = vmatpush3.bf16.msra.mxu0 %v7187_v33  ;;  %v7209_v33 = vld [vmem:[#allocation14 + $0x88] ss:$16 sps:$4 sm:$0xff]  }
 0xafb   : > { %v7327_v57 = vpop.eup %7326 }
 0xafd   : > { %5277 = vrot.lane.b32.xlu1 %v5263_v36, %s7721_s16  ;;  %v7329_v44 = vpop.eup %7328  ;;  %s6114_s16 = scalar_lea.hbm %s9009_s11, %s6537_s8 }
 0xafe   : > { %v4993_v6 = vmul.f32 %v7329_v44, %v4882_v26 }
 0xaff   : > { %v7331_v60 = vpop.eup %7330 }
 0xb00   : > { %v4992_v52 = vmul.f32 %v7331_v60, %v4836_v53 }
 0xb01   : > { %v7333_v58 = vpop.eup %7332 }
 0xb18   : > { %v4974_v46 = vpop.f32.mrf.mxu1 }
 0xb19   : > { %v4995_v2 = vmul.f32 %v7327_v57, %v4974_v46 }
 0xb1a   : > { %v6934_v47 = vpop.f32.mrf.mxu1 }
 0xb1b   : > { %v5044_v50 = vcombine.low %v4993_v6, %v4995_v2  ;;  %v5045_v48 = vcombine.high %v4993_v6, %v4995_v2 }
 0xb1c   : > { %v4977_v62 = vpop.f32.mrf.mxu1 }
 0xb1d   : > { %v5052_v19 = vrot.slane %v5044_v50, %v8126_v56  ;;  %v5059_v43 = vrot.slane %v5045_v48, %v8126_v56 }
 0xb1e   : > { %v6935_v8 = vpop.f32.mrf.mxu1 }
 0xb20   : > { %v4928_v12 = vpop.f32.mrf.mxu0 }
 0xb21   : > { %v4994_v51 = vmul.f32 %v7333_v58, %v4928_v12 }
 0xb22   : > { %v6928_v9 = vpop.f32.mrf.mxu0 }
 0xb23   : > { %v5028_v5 = vcombine.low %v4992_v52, %v4994_v51  ;;  %v5029_v7 = vcombine.high %v4992_v52, %v4994_v51 }
 0xb24   : > { %v4931_v31 = vpop.f32.mrf.mxu0 }
 0xb25   : > { %v5036_v27 = vrot.slane %v5028_v5, %v8126_v56  ;;  %v5043_v61 = vrot.slane %v5029_v7, %v8126_v56 }
 0xb26   : > { %v6929_v20 = vpop.f32.mrf.mxu0 }
 0xb27   : > { %v5092_v26 = vcombine.low %v5036_v27, %v5052_v19  ;;  %v5093_v59 = vcombine.high %v5036_v27, %v5052_v19  ;;  %v5108_v13 = vcombine.low %v5043_v61, %v5059_v43  ;;  %v5109_v53 = vcombine.high %v5043_v61, %v5059_v43 }
 0xb29   : > { %v5100_v15 = vrot.slane %v5092_v26, %v8129_v63  ;;  %v5107_v49 = vrot.slane %v5093_v59, %v8129_v63  ;;  %v5116_v54 = vrot.slane %v5108_v13, %v8129_v63  ;;  %v5123_v28 = vrot.slane %v5109_v53, %v8129_v63  ;;  %v7188_v26 = vld [vmem:[#allocation14 + $0xe0] ss:$16 sps:$4 sm:$0xff]   ;;  %v7190_v59 = vld [vmem:[#allocation14 + $0xe4] ss:$16 sps:$4 sm:$0xff]   ;;  %v7191_v13 = vld [vmem:[#allocation14 + $0xe8] ss:$16 sps:$4 sm:$0xff]  }
 0xb2a   : > { %v7193_v53 = vld [vmem:[#allocation14 + $0xec] ss:$16 sps:$4 sm:$0xff]   ;;  %5649 = vmatprep.subr.bf16.mxu1 %v7190_v59 }
 0xb2b   : > { %v6457_v37 = vcombine.low %v5100_v15, %v5107_v49  ;;  %v6459_v55 = vcombine.high %v5100_v15, %v5107_v49  ;;  %v6461_v3 = vcombine.low %v5116_v54, %v5123_v28  ;;  %v6463_v16 = vcombine.high %v5116_v54, %v5123_v28  ;;  %5690 = vmatprep.subr.bf16.mxu0 %v7193_v53  ;;  %v7194_v15 = vld [vmem:[#allocation14 + $0xc0] ss:$16 sps:$4 sm:$0xff]   ;;  %v7197_v49 = vld [vmem:[#allocation14 + $0xc8] ss:$16 sps:$4 sm:$0xff]  }
 0xb2c   : > { %5650 = vmatpush1.bf16.msra.mxu1 %v7188_v26  ;;  %v7246_v26 = vld [vmem:[#allocation17 + $0x28] sm:$0xff]   ;;  %v7249_v53 = vld [vmem:[#allocation17 + $0xe0] sm:$0xff]  }
 0xb2d   : > { %v5147_v10 = vrot.slane %v6457_v37, %v8126_v56  ;;  %v5163_v38 = vrot.slane %v6459_v55, %v8126_v56  ;;  %v5179_v40 = vrot.slane %v6461_v3, %v8126_v56  ;;  %v5195_v35 = vrot.slane %v6463_v16, %v8126_v56  ;;  %v7200_v55 = vld [vmem:[#allocation14 + $0xa0] ss:$16 sps:$4 sm:$0xff]   ;;  %v7202_v3 = vld [vmem:[#allocation14 + $0xa4] ss:$16 sps:$4 sm:$0xff]   ;;  %v7203_v16 = vld [vmem:[#allocation14 + $0xa8] ss:$16 sps:$4 sm:$0xff]  }
 0xb2e   : > { %v7247_v59 = vld [vmem:[#allocation17 + $0xa8] sm:$0xff]  }
 0xb2f   : > { %v5212_v36 = vcombine.low %v5147_v10, %v5163_v38  ;;  %v5244_v17 = vcombine.low %v5179_v40, %v5195_v35  ;;  %v5213_v34 = vcombine.high %v5147_v10, %v5163_v38  ;;  %v5245_v22 = vcombine.high %v5179_v40, %v5195_v35  ;;  %v7205_v10 = vld [vmem:[#allocation14 + $0xac] ss:$16 sps:$4 sm:$0xff]   ;;  %v7208_v38 = vld [vmem:[#allocation14 + $0x84] ss:$16 sps:$4 sm:$0xff]   ;;  %v7206_v35 = vld [vmem:[#allocation14 + $0x80] ss:$16 sps:$4 sm:$0xff]  }
 0xb30   : > { %v7211_v40 = vld [vmem:[#allocation14 + $0x8c] ss:$16 sps:$4 sm:$0xff]  }
 0xb31   : > { %v5220_v45 = vrot.slane %v5212_v36, %v8129_v63  ;;  %v5252_v42 = vrot.slane %v5244_v17, %v8129_v63  ;;  %v5227_v47 = vrot.slane %v5213_v34, %v8129_v63  ;;  %v5259_v57 = vrot.slane %v5245_v22, %v8129_v63  ;;  %v7214_v36 = vld [vmem:[#allocation14 + $0x64] ss:$16 sps:$4 sm:$0xff]   ;;  %v7217_v17 = vld [vmem:[#allocation14 + $0x6c] ss:$16 sps:$4 sm:$0xff]   ;;  %v7212_v34 = vld [vmem:[#allocation14 + $0x60] ss:$16 sps:$4 sm:$0xff]  }
 0xb32   : > { %v7215_v22 = vld [vmem:[#allocation14 + $0x68] ss:$16 sps:$4 sm:$0xff]  }
 0xb33   : > { %v5265_v46 = vcombine.high %v5220_v45, %v5252_v42  ;;  %v5264_v1 = vcombine.low %v5220_v45, %v5252_v42  ;;  %v5267_v56 = vcombine.high %v5227_v47, %v5259_v57  ;;  %v5266_v62 = vcombine.low %v5227_v47, %v5259_v57  ;;  %v7220_v45 = vld [vmem:[#allocation14 + $0x44] ss:$16 sps:$4 sm:$0xff]   ;;  %v7223_v42 = vld [vmem:[#allocation14 + $0x4c] ss:$16 sps:$4 sm:$0xff]  }
 0xb34   : > { %v7226_v47 = vld [vmem:[#allocation14 + $0x24] ss:$16 sps:$4 sm:$0xff]   ;;  %v7229_v57 = vld [vmem:[#allocation14 + $0x2c] ss:$16 sps:$4 sm:$0xff]  }
 0xb35   : > { %5285 = vrot.lane.b32.xlu1 %v5265_v46, %s7717_s9  ;;  %5281 = vrot.lane.b32.xlu0 %v5264_v1, %s7720_s29  ;;  %v7218_v46 = vld [vmem:[#allocation14 + $0x40] ss:$16 sps:$4 sm:$0xff]   ;;  %v7221_v1 = vld [vmem:[#allocation14 + $0x48] ss:$16 sps:$4 sm:$0xff]   ;;  %s552_s9 = scalar_lea.vmem [#allocation19], %s8020_s7 }
 0xb39   : > { %5293 = vrot.lane.b32.xlu1 %v5267_v56, %s7718_s5  ;;  %5289 = vrot.lane.b32.xlu0 %v5266_v62, %s7719_s25  ;;  %v7224_v56 = vld [vmem:[#allocation14 + $0x20] ss:$16 sps:$4 sm:$0xff]   ;;  %v7227_v62 = vld [vmem:[#allocation14 + $0x28] ss:$16 sps:$4 sm:$0xff]   ;;  %s6116_s5 = sshll.u32 %s552_s9, 4  ;;  %s6117_s5 = int_to_ptr.vmem [resolvable:$true] %s6116_s5 }
 0xb3a   : > { %s7606_s6 = scalar_lea.vmem %s6117_s5, 128  ;;  %p7613_p6 = scmp.lt.s32.totalorder %s6117_s5, %s7611_s21 }
 0xb3b   : > { %p7607_p11 = scmp.ne.s32.totalorder %s6117_s5, %s7606_s6  ;;  %p7614_p4 = scmp.lt.s32.totalorder %s7612_s23, %s7606_s6 }
 0xb3d   : > { %p7608_p7 = pnand %p7607_p11, %p9057_p12  ;;  %p7615_p2 = por %p7614_p4, %p7613_p6 }
 0xb3f   : > { %p7609_p1 = pneg %p7608_p7 }
 0xb41   : > { %p7616_p5 = pnand %p7615_p2, %p7609_p1 }
 0xb6b   : > { %v5274_v2 = vpop.permute.xlu1 %5273  ;;  %v5270_v44 = vpop.permute.xlu0 %5269 }
 0xb6c   : > { %v5296_v8 = vsel %vm1721_vm1, %v5260_v39, %v5270_v44  ;;  %v7340_v39 = vld [vmem:[%s9008_s10] sm:$0xff]  ;;  %v7235_v44 = vld [vmem:[#allocation14 + $0xc] ss:$16 sps:$4 sm:$0xff]  }
 0xb6d   : > { %v5297_v63 = vsel %vm2857_vm4, %v5296_v8, %v5274_v2  ;;  %v5323_v7 = vrot.slane %v7340_v39, %v5322_v4  ;;  %v7232_v2 = vld [vmem:[#allocation14 + $0x4] ss:$16 sps:$4 sm:$0xff]   ;;  %v7230_v8 = vld [vmem:[#allocation14] ss:$16 sps:$4 sm:$0xff]  }
 0xb6e   : > { %v7238_v39 = vld [vmem:[#allocation17 + $0x38] sm:$0xff]  }
 0xb6f   : > { %v5278_v60 = vpop.permute.xlu1 %5277 }
 0xb70   : > { %v5298_v6 = vsel %vm2859_vm5, %v5297_v63, %v5278_v60  ;;  %v7233_v60 = vld [vmem:[#allocation14 + $0x8] ss:$16 sps:$4 sm:$0xff]   ;;  %v7236_v63 = vld [vmem:[#allocation17 + $0x78] sm:$0xff]  }
 0xba7   : > { %v5286_v58 = vpop.permute.xlu1 %5285  ;;  %v5282_v12 = vpop.permute.xlu0 %5281 }
 0xba8   : > { %v5299_v52 = vsel %vm2861_vm6, %v5298_v6, %v5282_v12  ;;  %v7237_v6 = vld [vmem:[#allocation17 + $0xf8] sm:$0xff]  }
 0xba9   : > { %v5300_v48 = vsel %vm2863_vm7, %v5299_v52, %v5286_v58 }
 0xbab   : > { %v5294_v50 = vpop.permute.xlu1 %5293  ;;  %v5290_v51 = vpop.permute.xlu0 %5289 }
 0xbac   : > { %v5301_v9 = vsel %vm2865_vm8, %v5300_v48, %v5290_v51 }
 0xbad   : > { %v5302_v5 = vsel %vm2867_vm9, %v5301_v9, %v5294_v50  ;;  %v8937_v50 = vld [vmem:[%s9008_s10 + $0x8] sm:$0xff] }
 0xbae   : > { %v5303_v14 = vpack.c.bf16 %v5302_v5, %v5302_v5  ;;  %v5427_v48 = vrot.slane %v8937_v50, %v8469_v23  ;;  %v5432_v9 = vrot.slane %v8937_v50, %v3020_v18  ;;  %v7244_v18 = vld [vmem:[#allocation17 + $0x68] sm:$0xff]  }
 0xbb0   : > { %6953 = vmatmul.mubr.bf16.vlgmr.msra.gmra.mxu0 %v5303_v14 }
 0xbb1   : > { %5722 = vmatprep.mubr.bf16.mxu0 %v7714_v0  ;;  %v7196_v0 = vld [vmem:[#allocation14 + $0xc4] ss:$16 sps:$4 sm:$0xff]   ;;  %5691 = vmatpush1.bf16.msra.mxu0 %v7191_v13 }
 0xbb2   : > { %5651 = vmatprep.subr.bf16.mxu1 %v7196_v0  ;;  %5692 = vmatprep.subr.bf16.mxu0 %v7199_v24  ;;  %v7248_v13 = vld [vmem:[#allocation17 + $0x60] sm:$0xff]  }
 0xbb3   : > { %5652 = vmatpush1.bf16.msra.mxu1 %v7194_v15  ;;  %v7250_v0 = vld [vmem:[#allocation17 + $0x20] sm:$0xff]   ;;  %v7252_v15 = vld [vmem:[#allocation17 + $0x58] sm:$0xff]  }
 0xbb4   : > { %5653 = vmatprep.subr.bf16.mxu1 %v7202_v3  ;;  %v7251_v24 = vld [vmem:[#allocation17 + $0xa0] sm:$0xff]   ;;  %v7259_v3 = vld [vmem:[#allocation17 + $0x90] sm:$0xff]  }
 0xbb5   : > { %5693 = vmatpush1.bf16.msra.mxu0 %v7197_v49  ;;  %v7253_v49 = vld [vmem:[#allocation17 + $0xd8] sm:$0xff]  }
 0xbb6   : > { %5694 = vmatprep.subr.bf16.mxu0 %v7205_v10  ;;  %v7261_v10 = vld [vmem:[#allocation17 + $0xc8] sm:$0xff]  }
 0xbb7   : > { %5654 = vmatpush1.bf16.msra.mxu1 %v7200_v55  ;;  %v7258_v55 = vld [vmem:[#allocation17 + $0x10] sm:$0xff]  }
 0xbb8   : > { %5655 = vmatprep.subr.bf16.mxu1 %v7208_v38  ;;  %v7262_v38 = vld [vmem:[#allocation17 + $0x8] sm:$0xff]  }
 0xbb9   : > { %5695 = vmatpush1.bf16.msra.mxu0 %v7203_v16  ;;  %v7260_v16 = vld [vmem:[#allocation17 + $0x48] sm:$0xff]  }
 0xbba   : > { %5696 = vmatprep.subr.bf16.mxu0 %v7211_v40  ;;  %v7263_v40 = vld [vmem:[#allocation17 + $0x88] sm:$0xff]  }
 0xbbb   : > { %5656 = vmatpush1.bf16.msra.mxu1 %v7206_v35  ;;  %v7264_v35 = vld [vmem:[#allocation17 + $0x40] sm:$0xff]  }
 0xbbc   : > { %5657 = vmatprep.subr.bf16.mxu1 %v7214_v36  ;;  %v7266_v36 = vld [vmem:[#allocation17] sm:$0xff]  }
 0xbbd   : > { %5697 = vmatpush1.bf16.msra.mxu0 %v7209_v33  ;;  %v7265_v33 = vld [vmem:[#allocation17 + $0xc0] sm:$0xff]  }
 0xbbe   : > { %5698 = vmatprep.subr.bf16.mxu0 %v7217_v17  ;;  %v7267_v17 = vld [vmem:[#allocation17 + $0x80] sm:$0xff]  }
 0xbbf   : > { %5658 = vmatpush1.bf16.msra.mxu1 %v7212_v34  ;;  %v5467_v34 = vld [vmem:[#allocation16] sm:$0xf] }
 0xbc0   : > { %5659 = vmatprep.subr.bf16.mxu1 %v7220_v45  ;;  %v5480_v45 = vrot.slane %v5467_v34, %v8110_v41 }
 0xbc1   : > { %5699 = vmatpush1.bf16.msra.mxu0 %v7215_v22  ;;  %v5472_v22 = vrot.slane %v5467_v34, %v8082_v32 }
 0xbc2   : > { %5700 = vmatprep.subr.bf16.mxu0 %v7223_v42  ;;  %v5476_v42 = vrot.slane %v5467_v34, %v8076_v30 }
 0xbc3   : > { %5660 = vmatpush1.bf16.msra.mxu1 %v7218_v46  ;;  %v5484_v46 = vrot.slane %v5467_v34, %v8469_v23 }
 0xbc4   : > { %5661 = vmatprep.subr.bf16.mxu1 %v7226_v47 }
 0xbc5   : > { %5701 = vmatpush1.bf16.msra.mxu0 %v7221_v1 }
 0xbc6   : > { %5702 = vmatprep.subr.bf16.mxu0 %v7229_v57 }
 0xbc7   : > { %5662 = vmatpush1.bf16.msra.mxu1 %v7224_v56 }
 0xbc8   : > { %5663 = vmatprep.subr.bf16.mxu1 %v7232_v2 }
 0xbc9   : > { %5703 = vmatpush1.bf16.msra.mxu0 %v7227_v62 }
 0xbca   : > { %5704 = vmatprep.subr.bf16.mxu0 %v7235_v44 }
 0xbcb   : > { %5664 = vmatpush1.bf16.msra.mxu1 %v7230_v8 }
 0xbcc   : > { %6640 = vmatprep.subr.bf16.mxu1 %v7236_v63 }
 0xbcd   : > { %5705 = vmatpush1.bf16.msra.mxu0 %v7233_v60 }
 0xbce   : > { %6662 = vmatprep.subr.bf16.mxu0 %v7237_v6 }
 0xc70   : > { %v5406_v31 = vpop.f32.mrf.mxu0 }
 0xc71   : > { %v5407_v19 = vadd.f32 %v5406_v31, %v5323_v7  ;;  %v7239_v7 = vld [vmem:[#allocation17 + $0xb8] sm:$0xff]  }
 0xc72   : > { %v6954_v43 = vpop.f32.mrf.mxu0 }
 0xc73   : > { %v5412_v27 = vadd.f32 %v5407_v19, %v8512_v25  ;;  %v7240_v19 = vld [vmem:[#allocation17 + $0x70] sm:$0xff]  }
 0xc74   : > { %v5409_v61 = vpop.f32.mrf.mxu0  ;;  %v7241_v43 = vld [vmem:[#allocation17 + $0xf0] sm:$0xff]  }
 0xc75   : > { %5413 = vadd.xlane.f32.xlu0 %v5412_v27  ;;  %v7243_v61 = vld [vmem:[#allocation17 + $0xb0] sm:$0xff]  }
 0xc76   : > { %v6955_v20 = vpop.f32.mrf.mxu0 }
 0xc77   : > { %v7245_v20 = vld [vmem:[#allocation17 + $0xe8] sm:$0xff]  }
 0xcfe   : > { %v5414_v25 = vpop.xlane.xlu0 %5413 }
 0xcff   : > { %v5415_v54 = vmul.f32 0.0078125, %v5414_v25  ;;  %v7254_v25 = vld [vmem:[#allocation17 + $0x18] sm:$0xff]  }
 0xd01   : > { %v8930_v28 = vsub.f32 %v5412_v27, %v5415_v54  ;;  %v7242_v27 = vld [vmem:[#allocation17 + $0x30] sm:$0xff]   ;;  %v7255_v54 = vld [vmem:[#allocation17 + $0x98] sm:$0xff]  }
 0xd03   : > { %v5417_v37 = vmul.f32 %v8930_v28, %v8930_v28 }
 0xd05   : > { %5418 = vadd.xlane.f32.xlu1 %v5417_v37  ;;  %v7257_v37 = vld [vmem:[#allocation17 + $0xd0] sm:$0xff]  }
 0xd8e   : > { %v5419_v58 = vpop.xlane.xlu1 %5418 }
 0xd8f   : > { %v5420_v12 = vmul.f32 0.0078125, %v5419_v58 }
 0xd91   : > { %v5421_v52 = vadd.f32 1e-05, %v5420_v12 }
 0xd93   : > { %7334 = vrsqrt.f32 %v5421_v52 }
 0xda0   : > { %v7335_v51 = vpop.eup %7334 }
 0xda1   : > { %v5423_v5 = vmul.f32 %v7335_v51, %v8930_v28  ;;  %v7256_v28 = vld [vmem:[#allocation17 + $0x50] sm:$0xff]  }
 0xda3   : > { %v5428_v14 = vmul.f32 %v5427_v48, %v5423_v5 }
 0xda5   : > { %v8945_v4 = vadd.f32 %v5432_v9, %v5428_v14 }
 0xda7   : > { %v5434_v31 = vpack.c.bf16 %v8945_v4, %v8945_v4 }
 0xda9   : > { %5682 = vmatmul.mubr.bf16.vlgmr.msra.gmra.mxu1 %v5434_v31  ;;  %5723 = vmatmul.mubr.bf16.vlgmr.msra.gmra.mxu0 %v5434_v31 }
 0xdaa   : > { %6641 = vmatpush3.bf16.msra.mxu1 %v7238_v39  ;;  %6663 = vmatpush3.bf16.msra.mxu0 %v7239_v7  ;;  %v5806_v39 = vrot.slane %v8937_v50, %v8082_v32 }
 0xdab   : > { %6642 = vmatprep.subr.bf16.mxu1 %v7240_v19  ;;  %6664 = vmatprep.subr.bf16.mxu0 %v7241_v43 }
 0xdae   : > { %6643 = vmatpush3.bf16.msra.mxu1 %v7242_v27  ;;  %6665 = vmatpush3.bf16.msra.mxu0 %v7243_v61 }
 0xdaf   : > { %6644 = vmatprep.subr.bf16.mxu1 %v7244_v18  ;;  %6666 = vmatprep.subr.bf16.mxu0 %v7245_v20 }
 0xdb2   : > { %6645 = vmatpush3.bf16.msra.mxu1 %v7246_v26  ;;  %6667 = vmatpush3.bf16.msra.mxu0 %v7247_v59 }
 0xdb3   : > { %6646 = vmatprep.subr.bf16.mxu1 %v7248_v13  ;;  %6668 = vmatprep.subr.bf16.mxu0 %v7249_v53 }
 0xdb6   : > { %6647 = vmatpush3.bf16.msra.mxu1 %v7250_v0  ;;  %6669 = vmatpush3.bf16.msra.mxu0 %v7251_v24 }
 0xdb7   : > { %6648 = vmatprep.subr.bf16.mxu1 %v7252_v15  ;;  %6670 = vmatprep.subr.bf16.mxu0 %v7253_v49 }
 0xdba   : > { %6649 = vmatpush3.bf16.msra.mxu1 %v7254_v25  ;;  %6671 = vmatpush3.bf16.msra.mxu0 %v7255_v54  ;;  %v6094_v54 = vrot.slane %v8937_v50, %v3250_v11 }
 0xdbb   : > { %6650 = vmatprep.subr.bf16.mxu1 %v7256_v28  ;;  %6672 = vmatprep.subr.bf16.mxu0 %v7257_v37 }
 0xdbe   : > { %6651 = vmatpush3.bf16.msra.mxu1 %v7258_v55  ;;  %6673 = vmatpush3.bf16.msra.mxu0 %v7259_v3 }
 0xdbf   : > { %6652 = vmatprep.subr.bf16.mxu1 %v7260_v16  ;;  %6674 = vmatprep.subr.bf16.mxu0 %v7261_v10 }
 0xdc2   : > { %6653 = vmatpush3.bf16.msra.mxu1 %v7262_v38  ;;  %6675 = vmatpush3.bf16.msra.mxu0 %v7263_v40 }
 0xdc3   : > { %6654 = vmatprep.subr.bf16.mxu1 %v7264_v35  ;;  %6676 = vmatprep.subr.bf16.mxu0 %v7265_v33 }
 0xdc6   : > { %6655 = vmatpush3.bf16.msra.mxu1 %v7266_v36  ;;  %6677 = vmatpush3.bf16.msra.mxu0 %v7267_v17 }
 0xe69   : > { %v5683_v1 = vpop.f32.mrf.mxu1  ;;  %v5724_v47 = vpop.f32.mrf.mxu0 }
 0xe6a   : > { %v5684_v57 = vadd.f32 %v5683_v1, %v5472_v22  ;;  %v5725_v56 = vadd.f32 %v5724_v47, %v5480_v45 }
 0xe6b   : > { %v5685_v62 = vpop.f32.mrf.mxu1  ;;  %v5726_v2 = vpop.f32.mrf.mxu0 }
 0xe6c   : > { %v5686_v44 = vadd.f32 %v5685_v62, %v5476_v42  ;;  %v5727_v8 = vadd.f32 %v5726_v2, %v5484_v46  ;;  %v5731_v60 = vmax.f32 %v5684_v57, 0.0  ;;  %v5733_v63 = vmax.f32 %v5725_v56, 0.0 }
 0xe6d   : > { %v5687_v6 = vpop.f32.mrf.mxu1  ;;  %v5728_v58 = vpop.f32.mrf.mxu0 }
 0xe6e   : > { %v5732_v12 = vmax.f32 %v5686_v44, 0.0  ;;  %v5734_v52 = vmax.f32 %v5727_v8, 0.0  ;;  %v5735_v9 = vpack.c.bf16 %v5731_v60, %v5731_v60  ;;  %v5737_v23 = vpack.c.bf16 %v5733_v63, %v5733_v63 }
 0xe6f   : > { %v5688_v48 = vpop.f32.mrf.mxu1  ;;  %v5729_v41 = vpop.f32.mrf.mxu0 }
 0xe70   : > { %v5736_v51 = vpack.c.bf16 %v5732_v12, %v5732_v12  ;;  %v5738_v30 = vpack.c.bf16 %v5734_v52, %v5734_v52 }
 0xe72   : > { %6031 = vmatprep.mubr.bf16.mxu1 %v5736_v51  ;;  %6071 = vmatprep.mubr.bf16.mxu0 %v5738_v30 }
 0xe73   : > { %6032 = vmatmul.mubr.bf16.vlgmr.msra.gmra.mxu1 %v5735_v9  ;;  %6072 = vmatmul.mubr.bf16.vlgmr.msra.gmra.mxu0 %v5737_v23 }
 0xf33   : > { %v6656_v5 = vpop.f32.mrf.mxu1  ;;  %v6678_v14 = vpop.f32.mrf.mxu0 }
 0xf35   : > { %v6657_v7 = vpop.f32.mrf.mxu1  ;;  %v6679_v31 = vpop.f32.mrf.mxu0 }
 0xf36   : > { %v6658_v19 = vadd.f32 %v6657_v7, %v6656_v5  ;;  %v6680_v18 = vadd.f32 %v6679_v31, %v6678_v14 }
 0xf37   : > { %v6659_v43 = vpop.f32.mrf.mxu1  ;;  %v6681_v27 = vpop.f32.mrf.mxu0 }
 0xf38   : > { %v6034_v61 = vadd.f32 %v6658_v19, %v5806_v39 }
 0xf39   : > { %v6660_v20 = vpop.f32.mrf.mxu1  ;;  %v6682_v26 = vpop.f32.mrf.mxu0 }
 0xf3a   : > { %v6074_v59 = vadd.f32 %v6680_v18, %v6034_v61 }
 0xf3c   : > { %v6079_v13 = vadd.f32 %v6074_v59, %v8945_v4  ;;  %v6099_v4 = vrot.slane %v8937_v50, %v3255_v21 }
 0xf3e   : > { %6080 = vadd.xlane.f32.xlu0 %v6079_v13 }
 0xfc7   : > { %v6081_v53 = vpop.xlane.xlu0 %6080 }
 0xfc8   : > { %v6082_v0 = vmul.f32 0.0078125, %v6081_v53 }
 0xfca   : > { %v6083_v24 = vsub.f32 %v6079_v13, %v6082_v0 }
 0xfcc   : > { %v6084_v15 = vmul.f32 %v6083_v24, %v6083_v24 }
 0xfce   : > { %6085 = vadd.xlane.f32.xlu0 %v6084_v15 }
0x1057   : > { %v6086_v32 = vpop.xlane.xlu0 %6085 }
0x1058   : > { %v6087_v49 = vmul.f32 0.0078125, %v6086_v32 }
0x105a   : > { %v6088_v25 = vadd.f32 1e-05, %v6087_v49 }
0x105c   : > { %7336 = vrsqrt.f32 %v6088_v25 }
0x1069   : > { %v7337_v28 = vpop.eup %7336 }
0x106a   : > { %v6090_v37 = vmul.f32 %v7337_v28, %v6083_v24 }
0x106c   : > { %v6095_v55 = vmul.f32 %v6094_v54, %v6090_v37 }
0x106e   : > { %v6100_v3 = vadd.f32 %v6099_v4, %v6095_v55 }
0x1070   : > { %6101 = vst [vmem:[%s552_s9] sm:$0xff] %v6100_v3 }
0x1071   : > { %7619 = shalt.err (!%p7616_p5)
}
0x1072   : > { %s7620_s7 = scalar_lea.hbm %s6114_s16, 128  ;;  %s7624_s4 = scalar_lea.hbm %s9009_s11, 256 }
0x1073   : > { %p7621_p8 = scmp.ne.s32.totalorder %s6114_s16, %s7620_s7  ;;  %p7625_p13 = scmp.lt.s32.totalorder %s6114_s16, %s9009_s11 }
0x1074   : > { %p7626_p3 = scmp.lt.s32.totalorder %s7624_s4, %s7620_s7 }
0x1075   : > { %p7622_p9 = pnand %p7621_p8, %p9057_p12 }
0x1076   : > { %p7627_p0 = por %p7626_p3, %p7625_p13 }
0x1077   : > { %p7623_p10 = pneg %p7622_p9 }
0x1079   : > { %p7628_p11 = pnand %p7627_p0, %p7623_p10 }
0x107b   : > { %7631 = shalt.err (!%p7628_p11)
}
0x107c   : > { %6992 = dma.vmem_to_hbm [thread:$0]  (%p9057_p12), %s6117_s5, 128, %s6114_s16, %s6103_s2  }
0x107d PF: > { %s6128_s14 = sand.u32 1, %s7682_s17   ;;  %p9058_p7 = scmp.ne.s32.totalorder %s9043_s26, 0 }
0x107e   : > { %p9059_p1 = scmp.ge.s32.totalorder %s7694_s20, 2  ;;  %s6129_s12 = scalar_lea.sflag [#allocation4], %s6128_s14 }
0x1080   : > { %p7027_p6 = pnand %p9059_p1, %p9058_p7 }
0x1082   : > { %p7028_p4 = pneg %p7027_p6 }
0x1084   : > { %7677 = dma.done.wait (%p7028_p4), %s6129_s12, 128  }
0x1085   : > { %7679 = vsyncadd (%p7028_p4), %s6129_s12, 4294967168  ;;  %p31_p2 = scmp.ge.s32.totalorder %s7912_s30, 4   ;;  %s9060_s17 = smov %s7686_s18 }
0x1086   : > { %s9061_s18 = smov %s7690_s19  ;;  %s9062_s19 = smov %s7923_s13 }
0x1087   : > { %s9063_s20 = smov %s7912_s30  ;;  %33 = sbr.rel (!%p31_p2) target bundleno = 20 (0x14), region = 154 }
0x108c   :  { %6134 = vsyncpa [#allocation3], 1 }
0x108d   :  { %6136 = vsyncpa [#allocation3 + $0x1], 1 }
0x108e   :  { %6137 = vsyncpa [#allocation6], 1 }
0x108f   :  { %6139 = vsyncpa [#allocation6 + $0x1], 1 }
0x1090   :  { %6140 = vsyncpa [#allocation9], 1 }
0x1091   :  { %6141 = vsyncpa [#allocation12], 1 }
0x1092   :  { %6142 = vsyncpa [#allocation15], 1 }
0x1093   :  { %6143 = vsyncpa [#allocation18], 1 }
0x1094   :  { %6144 = vsyncpa [#allocation4], 1 }
0x1095   :  { %6146 = vsyncpa [#allocation4 + $0x1], 1 }

</bundles_post_ra>
